<compile_context>
chip_gen: v6e
topology: v6e:2x2x1
jax: 0.10.0
libtpu: 0.0.40
codegen_flags: <defaults>
</compile_context>

<pallas_src>
import numpy as np
import jax
import jax.numpy as jnp
from jax import lax
from jax.experimental import pallas as pl
from jax.experimental.pallas import tpu as pltpu

C = 640          # in_planes (hard-coded by match_block's .view(-1, 640, 6, 6))
H = W = 6        # spatial size (hard-coded)
P = H * W        # 36 flattened spatial positions
HID = C // 10    # 64, ChannelAttention bottleneck
EPS = 1e-8       # F.normalize eps used by the module


# ---------------------------------------------------------------------------
# Pallas kernel: one grid step == one (Bq x Bw) block of (query, support) pairs
# ---------------------------------------------------------------------------
def match_block_kernel(spt_ref, qry_ref, w1_ref, w2_ref, bd_s_ref, bd_q_ref,
                       x2_ref, x1_ref, sptn_sc, qryn_sc):
    """
    spt_ref : [Bw*P, C]        bf16  support maps, rows ordered (support, position)
    qry_ref : [Bq*P, C]        bf16  query maps, rows ordered (query, position)
    w1_ref  : [C, HID]         f32   fc1.weight^T
    w2_ref  : [HID, C]         f32   fc2.weight^T
    bd_s_ref: [2, Bw*P, Bw*P]  bf16  block-diag 3x3 stencils (avg, max) - support rows
    bd_q_ref: [2, Bq*P, Bq*P]  bf16  block-diag 3x3 stencils (avg, max) - query rows
    x2_ref  : [Bq, Bw*P, C]    bf16  output, support path
    x1_ref  : [Bw, Bq*P, C]    bf16  output, query path (support-major pair order)
    sptn_sc / qryn_sc : bf16 VMEM scratch holding the l2-normalized maps
    """
    Bw = spt_ref.shape[0] // P
    Bq = qry_ref.shape[0] // P

    # F.normalize(x, p=2, dim=channel) == x * rsqrt(max(ss, eps^2))  (EUP rsqrt)
    def l2norm(x):
        ss = jnp.sum(x * x, axis=-1, keepdims=True)
        return x * lax.rsqrt(jnp.maximum(ss, EPS * EPS))

    # Support block changes on every (inner) grid step -> always renormalize.
    sptn_sc[...] = l2norm(spt_ref[...].astype(jnp.float32)).astype(sptn_sc.dtype)

    # Query block is constant along the inner (support) axis -> cache in scratch.
    @pl.when(pl.program_id(1) == 0)
    def _():
        qryn_sc[...] = l2norm(qry_ref[...].astype(jnp.float32)).astype(qryn_sc.dtype)

    # ---- ChannelAttention: pooled stats + ONE batched MLP (2 dots) -------------
    pooled_avg, pooled_max = [], []
    for n_blk, ref in ((Bw, sptn_sc), (Bq, qryn_sc)):
        for i in range(n_blk):
            blk = ref[i * P:(i + 1) * P, :].astype(jnp.float32)   # [P, C]
            pooled_avg.append(jnp.mean(blk, axis=0, keepdims=True))
            pooled_max.append(jnp.max(blk, axis=0, keepdims=True))
    pooled = jnp.concatenate(pooled_avg + pooled_max, axis=0)     # [2*(Bw+Bq), C]

    h = jnp.maximum(jnp.dot(pooled, w1_ref[...],
                            preferred_element_type=jnp.float32), 0.0)
    o = jnp.dot(h, w2_ref[...], preferred_element_type=jnp.float32)
    # row order: [spt_avg(Bw); qry_avg(Bq); spt_max(Bw); qry_max(Bq)]
    cw_spt = jax.nn.sigmoid(o[0:Bw] + o[Bw + Bq:2 * Bw + Bq])              # [Bw, C]
    cw_qry = jax.nn.sigmoid(o[Bw:Bw + Bq] + o[2 * Bw + Bq:2 * Bw + 2 * Bq])  # [Bq, C]
    cws_b = cw_spt.astype(jnp.bfloat16)
    cwq_b = cw_qry.astype(jnp.bfloat16)

    inv_c = jnp.float32(1.0 / C)

    # ---- SpatialAttention, fully batched over the block ------------------------
    # base rows = (self, position); cw rows = the *other* side's channel weights.
    def spatial_sigmoid(base_sc, cw_b, bd_ref, n_other):
        # mean over channels for ALL pairings at once on the MXU:
        #   mean[r, j] = (1/C) * sum_c base[r, c] * cw[j, c]
        mean_all = lax.dot_general(
            base_sc[...], cw_b, (((1,), (1,)), ((), ())),
            preferred_element_type=jnp.float32) * inv_c            # f32 [rows, n_other]
        # max over channels still needs a cross-lane reduction per pairing.
        cols = []
        for j in range(n_other):
            prod = base_sc[...] * cw_b[j]                          # bf16 [rows, C]
            cols.append(jnp.max(prod, axis=1, keepdims=True))      # bf16 [rows, 1]
        max_all = jnp.concatenate(cols, axis=1)                    # bf16 [rows, n_other]
        # 3x3 conv for every pairing == one block-diagonal stencil matmul per channel.
        conv = (jnp.dot(bd_ref[0], mean_all.astype(jnp.bfloat16),
                        preferred_element_type=jnp.float32) +
                jnp.dot(bd_ref[1], max_all,
                        preferred_element_type=jnp.float32))
        return jax.nn.sigmoid(conv).astype(jnp.bfloat16)           # [rows, n_other]

    s_s = spatial_sigmoid(sptn_sc, cwq_b, bd_s_ref, Bq)   # SA(spt_n * cw_qry[q]) [Bw*P, Bq]
    s_q = spatial_sigmoid(qryn_sc, cws_b, bd_q_ref, Bw)   # SA(qry_n * cw_spt[w]) [Bq*P, Bw]

    # ---- Outputs: x = base * (cw * SA + 1), one lane-dense slab per store ------
    for q in range(Bq):
        factor = cwq_b[q] * s_s[:, q:q + 1] + 1.0          # bf16 [Bw*P, C] via bcast
        x2_ref[q] = (sptn_sc[...] * factor).astype(x2_ref.dtype)
    for w in range(Bw):
        factor = cws_b[w] * s_q[:, w:w + 1] + 1.0          # bf16 [Bq*P, C] via bcast
        x1_ref[w] = (qryn_sc[...] * factor).astype(x1_ref.dtype)


# ---------------------------------------------------------------------------
# Host-side helpers: stencil operators, block selection, VMEM budget
# ---------------------------------------------------------------------------
def _build_stencil(w_sa):
    """w_sa: np.ndarray [2,3,3] -> A[c, p_out, p_in] s.t. conv(x)[p_out]=sum A*x[p_in]."""
    A = np.zeros((2, P, P), np.float32)
    for i in range(H):
        for j in range(W):
            po = i * W + j
            for di in range(3):
                for dj in range(3):
                    ii, jj = i + di - 1, j + dj - 1
                    if 0 <= ii < H and 0 <= jj < W:
                        A[:, po, ii * W + jj] = w_sa[:, di, dj]
    return A


def _block_diag_stencil(A, nblk):
    eye = np.eye(nblk, dtype=np.float32)
    bd = np.stack([np.kron(eye, A[c]) for c in range(2)], axis=0)  # [2, nblk*P, nblk*P]
    return jnp.asarray(bd).astype(jnp.bfloat16)


def _pick_block(n, bmax, split_outer=False):
    """Block size must be even (when padding) or cover the full axis."""
    if n > bmax:
        b = bmax if bmax % 2 == 0 else max(bmax - 1, 2)
    elif split_outer and n >= 4 and n % 4 == 0:
        b = n // 2        # >= 2 grid steps on the parallel axis (v7x megacore)
    else:
        b = n             # single full block (any size: equals the array dim)
    n_pad = -(-n // b) * b
    return b, n_pad


def _vmem_limit_bytes(Bq, Bw):
    lane = lambda x: -(-x // 128) * 128
    sub = lambda x: -(-x // 16) * 16
    in_b = 2 * (sub(Bw * P) * C + sub(Bq * P) * C) * 2                  # dbl-buf bf16 inputs
    w_b = 2 * (C * HID + HID * C) * 4                                    # fc weights (f32)
    bd_b = 2 * 2 * (sub(Bw * P) * lane(Bw * P) + sub(Bq * P) * lane(Bq * P)) * 2
    out_b = 2 * (Bq * sub(Bw * P) * C + Bw * sub(Bq * P) * C) * 2        # dbl-buf bf16 outputs
    scr_b = (sub(Bw * P) * C + sub(Bq * P) * C) * 2                      # normalized-map scratch
    est = in_b + w_b + bd_b + out_b + scr_b
    return int(min(max(2 * est, 32 * 1024 * 1024), 48 * 1024 * 1024))


# ---------------------------------------------------------------------------
# Glue: parameter prep, layout transforms, pallas_call
# ---------------------------------------------------------------------------
def match_block_forward(spt, qry, fc1_w, fc2_w, sa_w, *, bq_max=8, bw_max=8):
    """spt: [way, C, H, W], qry: [num_qry, C, H, W] (NCHW, like PyTorch)."""
    way, num_qry = spt.shape[0], qry.shape[0]
    Bq, nq_pad = _pick_block(num_qry, bq_max, split_outer=True)
    Bw, nw_pad = _pick_block(way, bw_max)

    def to_flat(x, n, n_pad):
        x = x.reshape(n, C, P).transpose(0, 2, 1).reshape(n * P, C).astype(jnp.bfloat16)
        if n_pad != n:
            x = jnp.pad(x, ((0, (n_pad - n) * P), (0, 0)))
        return x

    spt_f = to_flat(spt, way, nw_pad)      # [nw_pad*P, C]
    qry_f = to_flat(qry, num_qry, nq_pad)  # [nq_pad*P, C]

    w1 = fc1_w.reshape(HID, C).T.astype(jnp.float32)   # [C, HID]
    w2 = fc2_w.reshape(C, HID).T.astype(jnp.float32)   # [HID, C]
    A = _build_stencil(np.asarray(sa_w)[0])
    bd_s = _block_diag_stencil(A, Bw)                  # [2, Bw*P, Bw*P]
    bd_q = _block_diag_stencil(A, Bq)                  # [2, Bq*P, Bq*P]

    grid = (nq_pad // Bq, nw_pad // Bw)   # support axis innermost -> query block cached

    out_shape = (jax.ShapeDtypeStruct((nq_pad, nw_pad * P, C), jnp.bfloat16),   # x2
                 jax.ShapeDtypeStruct((nw_pad, nq_pad * P, C), jnp.bfloat16))   # x1

    x2_f, x1_f = pl.pallas_call(
        match_block_kernel,
        out_shape=out_shape,
        grid_spec=pltpu.PrefetchScalarGridSpec(
            num_scalar_prefetch=0,
            grid=grid,
            in_specs=[
                pl.BlockSpec((Bw * P, C), lambda qi, wi: (wi, 0)),          # support block
                pl.BlockSpec((Bq * P, C), lambda qi, wi: (qi, 0)),          # query block
                pl.BlockSpec((C, HID), lambda qi, wi: (0, 0)),              # fc1^T
                pl.BlockSpec((HID, C), lambda qi, wi: (0, 0)),              # fc2^T
                pl.BlockSpec((2, Bw * P, Bw * P), lambda qi, wi: (0, 0, 0)),  # stencil (spt rows)
                pl.BlockSpec((2, Bq * P, Bq * P), lambda qi, wi: (0, 0, 0)),  # stencil (qry rows)
            ],
            out_specs=[
                pl.BlockSpec((Bq, Bw * P, C), lambda qi, wi: (qi, wi, 0)),   # x2
                pl.BlockSpec((Bw, Bq * P, C), lambda qi, wi: (wi, qi, 0)),   # x1
            ],
            scratch_shapes=[
                pltpu.VMEM((Bw * P, C), jnp.bfloat16),   # normalized support maps
                pltpu.VMEM((Bq * P, C), jnp.bfloat16),   # normalized query maps (cached)
            ],
        ),
        compiler_params=pltpu.CompilerParams(
            dimension_semantics=("parallel", "arbitrary"),   # inner axis carries qry cache
            vmem_limit_bytes=_vmem_limit_bytes(Bq, Bw)),
    )(spt_f, qry_f, w1, w2, bd_s, bd_q)

    # Unpad, restore the PyTorch pair order (n = q*way + w) and NCHW layout.
    # Kept in bf16 end-to-end (no f32 round trip); consumers wanting channels-last
    # bf16 can use x2_f / x1_f directly.
    x2 = x2_f.reshape(nq_pad, nw_pad, P, C)[:num_qry, :way]
    x1 = x1_f.reshape(nw_pad, nq_pad, P, C)[:way, :num_qry].transpose(1, 0, 2, 3)

    def to_nchw(t):
        t = t.reshape(num_qry * way, P, C).transpose(0, 2, 1)
        return t.reshape(num_qry * way, C, H, W)

    return to_nchw(x2), to_nchw(x1)


# ---------------------------------------------------------------------------
# Pure-JAX reference (mirrors the PyTorch module) for a sanity check.
# ---------------------------------------------------------------------------
def ref_forward(spt, qry, fc1_w, fc2_w, sa_w):
    way, num_qry = spt.shape[0], qry.shape[0]
    N = way * num_qry

    def norm(x):
        n = jnp.sqrt(jnp.sum(x * x, axis=1, keepdims=True))
        return x / jnp.maximum(n, 1e-8)

    spt = norm(spt)
    qry = norm(qry)
    spt_e = jnp.broadcast_to(spt[None], (num_qry, way, C, H, W)).reshape(N, C, H, W)
    qry_e = jnp.broadcast_to(qry[:, None], (num_qry, way, C, H, W)).reshape(N, C, H, W)

    w1 = fc1_w.reshape(HID, C)
    w2 = fc2_w.reshape(C, HID)

    def ca(x):
        avg_p = jnp.mean(x, axis=(2, 3))
        max_p = jnp.max(x, axis=(2, 3))
        mlp = lambda v: jnp.maximum(v @ w1.T, 0.0) @ w2.T
        return jax.nn.sigmoid(mlp(avg_p) + mlp(max_p))[:, :, None, None]

    cw1 = ca(spt_e)
    cw2 = ca(qry_e)
    xq = qry_e * cw1
    xs = spt_e * cw2

    def sa(x):
        avg_m = jnp.mean(x, axis=1, keepdims=True)
        max_m = jnp.max(x, axis=1, keepdims=True)
        cat = jnp.concatenate([avg_m, max_m], axis=1)
        out = lax.conv_general_dilated(
            cat, sa_w, (1, 1), "SAME",
            dimension_numbers=("NCHW", "OIHW", "NCHW"))
        return jax.nn.sigmoid(out)

    x1 = xq * sa(xq) + qry_e
    x2 = xs * sa(xs) + spt_e
    return x2, x1


if __name__ == "__main__":
    key = jax.random.PRNGKey(0)
    k1, k2, k3, k4, k5 = jax.random.split(key, 5)

    # deterministic synthetic parameters (module Conv2d layers are all bias=False)
    fc1_w = jax.random.normal(k3, (HID, C, 1, 1), jnp.float32) * 0.05   # Conv2d(640,64,1)
    fc2_w = jax.random.normal(k4, (C, HID, 1, 1), jnp.float32) * 0.05   # Conv2d(64,640,1)
    sa_w = jax.random.normal(k5, (1, 2, 3, 3), jnp.float32) * 0.3       # Conv2d(2,1,3,pad=1)

    # Case 1: tiny, single grid step.  Case 2: multi-step grid (exercises padding,
    # the cached query normalization across the inner axis, and the block mapping).
    cases = [
        dict(way=2, num_qry=2, kw={}),
        dict(way=5, num_qry=3, kw=dict(bq_max=2, bw_max=2)),
    ]
    for case in cases:
        way, num_qry = case["way"], case["num_qry"]
        kq, ks = jax.random.split(jax.random.fold_in(k1, way * 100 + num_qry))
        spt = jax.random.normal(ks, (way, C, H, W), jnp.float32)
        qry = jax.random.normal(kq, (num_qry, C, H, W), jnp.float32)

        x2, x1 = match_block_forward(spt, qry, fc1_w, fc2_w, sa_w, **case["kw"])
        jax.block_until_ready((x2, x1))

        x2_r, x1_r = ref_forward(spt, qry, fc1_w, fc2_w, sa_w)
        err = max(float(jnp.max(jnp.abs(x2.astype(jnp.float32) - x2_r))),
                  float(jnp.max(jnp.abs(x1.astype(jnp.float32) - x1_r))))
        # bf16 kernel I/O + bf16 normalized-map scratch -> relaxed tolerance vs f32 ref
        assert err < 3e-2, f"mismatch vs reference (way={way}, num_qry={num_qry}), max abs err = {err}"

    print("KERNEL_OK")
</pallas_src>

<mosaic_0001>
module attributes {stable_mosaic.version = 11 : i64} {
  func.func @match_block_kernel(%arg0: i32, %arg1: i32, %arg2: memref<72x640xbf16, #tpu.memory_space<vmem>>, %arg3: memref<72x640xbf16, #tpu.memory_space<vmem>>, %arg4: memref<640x64xf32, #tpu.memory_space<vmem>>, %arg5: memref<64x640xf32, #tpu.memory_space<vmem>>, %arg6: memref<2x72x72xbf16, #tpu.memory_space<vmem>>, %arg7: memref<2x72x72xbf16, #tpu.memory_space<vmem>>, %arg8: memref<2x72x640xbf16, #tpu.memory_space<vmem>>, %arg9: memref<2x72x640xbf16, #tpu.memory_space<vmem>>, %arg10: memref<72x640xbf16, #tpu.memory_space<vmem>>, %arg11: memref<72x640xbf16, #tpu.memory_space<vmem>>) attributes {dimension_semantics = [#tpu.dimension_semantics<parallel>, #tpu.dimension_semantics<arbitrary>], iteration_bounds = array<i64: 1, 1>, scalar_prefetch = 0 : i64, scratch_operands = 2 : i64, tpu.core_type = #tpu.core_type<tc>, window_params = [{transform_indices = @transform_0, window_bounds = array<i64: 72, 640>}, {transform_indices = @transform_1, window_bounds = array<i64: 72, 640>}, {pipeline_mode = #tpu.pipeline_mode<synchronous>, transform_indices = @transform_2, window_bounds = array<i64: 640, 64>}, {pipeline_mode = #tpu.pipeline_mode<synchronous>, transform_indices = @transform_3, window_bounds = array<i64: 64, 640>}, {pipeline_mode = #tpu.pipeline_mode<synchronous>, transform_indices = @transform_4, window_bounds = array<i64: 2, 72, 72>}, {pipeline_mode = #tpu.pipeline_mode<synchronous>, transform_indices = @transform_5, window_bounds = array<i64: 2, 72, 72>}, {transform_indices = @transform_6, window_bounds = array<i64: 2, 72, 640>}, {transform_indices = @transform_7, window_bounds = array<i64: 2, 72, 640>}]} {
    %c0 = arith.constant 0 : index
    %c0_0 = arith.constant 0 : index
    %0 = vector.load %arg2[%c0, %c0_0] : memref<72x640xbf16, #tpu.memory_space<vmem>>, vector<72x640xbf16>
    %1 = arith.extf %0 : vector<72x640xbf16> to vector<72x640xf32>
    %2 = arith.mulf %1, %1 : vector<72x640xf32>
    %cst = arith.constant dense<0.000000e+00> : vector<72xf32>
    %3 = vector.multi_reduction <add>, %2, %cst [1] : vector<72x640xf32> to vector<72xf32>
    %4 = vector.shape_cast %3 : vector<72xf32> to vector<72x1xf32>
    %cst_1 = arith.constant 1.000000e-16 : f32
    %5 = vector.broadcast %cst_1 : f32 to vector<72x1xf32>
    %6 = arith.maximumf %4, %5 : vector<72x1xf32>
    %7 = math.rsqrt %6 : vector<72x1xf32>
    %8 = vector.broadcast %7 : vector<72x1xf32> to vector<72x640xf32>
    %9 = arith.mulf %1, %8 : vector<72x640xf32>
    %10 = arith.truncf %9 : vector<72x640xf32> to vector<72x640xbf16>
    %c0_2 = arith.constant 0 : index
    %c0_3 = arith.constant 0 : index
    %11 = vector.load %arg10[%c0_2, %c0_3] : memref<72x640xbf16, #tpu.memory_space<vmem>>, vector<72x640xbf16>
    tpu.vector_store %arg10[%c0_2, %c0_3], %10 {strides = array<i32>} : memref<72x640xbf16, #tpu.memory_space<vmem>>, vector<72x640xbf16>,
    %c0_i32 = arith.constant 0 : i32
    %12 = arith.cmpi eq, %arg1, %c0_i32 : i32
    %13 = arith.extui %12 : i1 to i32
    %c0_i32_4 = arith.constant 0 : i32
    %14 = arith.cmpi ne, %13, %c0_i32_4 : i32
    scf.if %14 {
      %c0_94 = arith.constant 0 : index
      %c0_95 = arith.constant 0 : index
      %198 = vector.load %arg3[%c0_94, %c0_95] : memref<72x640xbf16, #tpu.memory_space<vmem>>, vector<72x640xbf16>
      %199 = arith.extf %198 : vector<72x640xbf16> to vector<72x640xf32>
      %200 = arith.mulf %199, %199 : vector<72x640xf32>
      %cst_96 = arith.constant dense<0.000000e+00> : vector<72xf32>
      %201 = vector.multi_reduction <add>, %200, %cst_96 [1] : vector<72x640xf32> to vector<72xf32>
      %202 = vector.shape_cast %201 : vector<72xf32> to vector<72x1xf32>
      %cst_97 = arith.constant 1.000000e-16 : f32
      %203 = vector.broadcast %cst_97 : f32 to vector<72x1xf32>
      %204 = arith.maximumf %202, %203 : vector<72x1xf32>
      %205 = math.rsqrt %204 : vector<72x1xf32>
      %206 = vector.broadcast %205 : vector<72x1xf32> to vector<72x640xf32>
      %207 = arith.mulf %199, %206 : vector<72x640xf32>
      %208 = arith.truncf %207 : vector<72x640xf32> to vector<72x640xbf16>
      %c0_98 = arith.constant 0 : index
      %c0_99 = arith.constant 0 : index
      %209 = vector.load %arg11[%c0_98, %c0_99] : memref<72x640xbf16, #tpu.memory_space<vmem>>, vector<72x640xbf16>
      tpu.vector_store %arg11[%c0_98, %c0_99], %208 {strides = array<i32>} : memref<72x640xbf16, #tpu.memory_space<vmem>>, vector<72x640xbf16>,
    } else {
    }
    %c0_5 = arith.constant 0 : index
    %c0_6 = arith.constant 0 : index
    %15 = vector.load %arg10[%c0_5, %c0_6] : memref<72x640xbf16, #tpu.memory_space<vmem>>, vector<36x640xbf16>
    %16 = arith.extf %15 : vector<36x640xbf16> to vector<36x640xf32>
    %cst_7 = arith.constant dense<0.000000e+00> : vector<640xf32>
    %17 = vector.multi_reduction <add>, %16, %cst_7 [0] : vector<36x640xf32> to vector<640xf32>
    %18 = vector.shape_cast %17 : vector<640xf32> to vector<1x640xf32>
    %cst_8 = arith.constant 3.600000e+01 : f32
    %19 = vector.broadcast %cst_8 : f32 to vector<1x640xf32>
    %20 = arith.divf %18, %19 : vector<1x640xf32>
    %cst_9 = arith.constant dense<0xFF800000> : vector<640xf32>
    %21 = vector.multi_reduction <maximumf>, %16, %cst_9 [0] : vector<36x640xf32> to vector<640xf32>
    %22 = vector.shape_cast %21 : vector<640xf32> to vector<1x640xf32>
    %c36 = arith.constant 36 : index
    %c0_10 = arith.constant 0 : index
    %23 = vector.load %arg10[%c36, %c0_10] : memref<72x640xbf16, #tpu.memory_space<vmem>>, vector<36x640xbf16>
    %24 = arith.extf %23 : vector<36x640xbf16> to vector<36x640xf32>
    %cst_11 = arith.constant dense<0.000000e+00> : vector<640xf32>
    %25 = vector.multi_reduction <add>, %24, %cst_11 [0] : vector<36x640xf32> to vector<640xf32>
    %26 = vector.shape_cast %25 : vector<640xf32> to vector<1x640xf32>
    %cst_12 = arith.constant 3.600000e+01 : f32
    %27 = vector.broadcast %cst_12 : f32 to vector<1x640xf32>
    %28 = arith.divf %26, %27 : vector<1x640xf32>
    %cst_13 = arith.constant dense<0xFF800000> : vector<640xf32>
    %29 = vector.multi_reduction <maximumf>, %24, %cst_13 [0] : vector<36x640xf32> to vector<640xf32>
    %30 = vector.shape_cast %29 : vector<640xf32> to vector<1x640xf32>
    %c0_14 = arith.constant 0 : index
    %c0_15 = arith.constant 0 : index
    %31 = vector.load %arg11[%c0_14, %c0_15] : memref<72x640xbf16, #tpu.memory_space<vmem>>, vector<36x640xbf16>
    %32 = arith.extf %31 : vector<36x640xbf16> to vector<36x640xf32>
    %cst_16 = arith.constant dense<0.000000e+00> : vector<640xf32>
    %33 = vector.multi_reduction <add>, %32, %cst_16 [0] : vector<36x640xf32> to vector<640xf32>
    %34 = vector.shape_cast %33 : vector<640xf32> to vector<1x640xf32>
    %cst_17 = arith.constant 3.600000e+01 : f32
    %35 = vector.broadcast %cst_17 : f32 to vector<1x640xf32>
    %36 = arith.divf %34, %35 : vector<1x640xf32>
    %cst_18 = arith.constant dense<0xFF800000> : vector<640xf32>
    %37 = vector.multi_reduction <maximumf>, %32, %cst_18 [0] : vector<36x640xf32> to vector<640xf32>
    %38 = vector.shape_cast %37 : vector<640xf32> to vector<1x640xf32>
    %c36_19 = arith.constant 36 : index
    %c0_20 = arith.constant 0 : index
    %39 = vector.load %arg11[%c36_19, %c0_20] : memref<72x640xbf16, #tpu.memory_space<vmem>>, vector<36x640xbf16>
    %40 = arith.extf %39 : vector<36x640xbf16> to vector<36x640xf32>
    %cst_21 = arith.constant dense<0.000000e+00> : vector<640xf32>
    %41 = vector.multi_reduction <add>, %40, %cst_21 [0] : vector<36x640xf32> to vector<640xf32>
    %42 = vector.shape_cast %41 : vector<640xf32> to vector<1x640xf32>
    %cst_22 = arith.constant 3.600000e+01 : f32
    %43 = vector.broadcast %cst_22 : f32 to vector<1x640xf32>
    %44 = arith.divf %42, %43 : vector<1x640xf32>
    %cst_23 = arith.constant dense<0xFF800000> : vector<640xf32>
    %45 = vector.multi_reduction <maximumf>, %40, %cst_23 [0] : vector<36x640xf32> to vector<640xf32>
    %46 = vector.shape_cast %45 : vector<640xf32> to vector<1x640xf32>
    %47 = tpu.concatenate %20, %28, %36, %44, %22, %30, %38, %46 in 0 : vector<1x640xf32>, vector<1x640xf32>, vector<1x640xf32>, vector<1x640xf32>, vector<1x640xf32>, vector<1x640xf32>, vector<1x640xf32>, vector<1x640xf32> -> vector<8x640xf32>
    %c0_24 = arith.constant 0 : index
    %c0_25 = arith.constant 0 : index
    %48 = vector.load %arg4[%c0_24, %c0_25] : memref<640x64xf32, #tpu.memory_space<vmem>>, vector<640x64xf32>
    %cst_26 = arith.constant dense<0.000000e+00> : vector<8x64xf32>
    %49 = tpu.matmul %47, %48, %cst_26 {dimension_numbers = #tpu.dot_dimension_numbers<[1], [0], [0], [1], [0, 0, 1, 1], [], []>} : vector<8x640xf32>, vector<640x64xf32>, vector<8x64xf32> -> vector<8x64xf32>
    %cst_27 = arith.constant 0.000000e+00 : f32
    %50 = vector.broadcast %cst_27 : f32 to vector<8x64xf32>
    %51 = arith.maximumf %49, %50 : vector<8x64xf32>
    %c0_28 = arith.constant 0 : index
    %c0_29 = arith.constant 0 : index
    %52 = vector.load %arg5[%c0_28, %c0_29] : memref<64x640xf32, #tpu.memory_space<vmem>>, vector<64x640xf32>
    %cst_30 = arith.constant dense<0.000000e+00> : vector<8x640xf32>
    %53 = tpu.matmul %51, %52, %cst_30 {dimension_numbers = #tpu.dot_dimension_numbers<[1], [0], [0], [1], [0, 0, 1, 1], [], []>} : vector<8x64xf32>, vector<64x640xf32>, vector<8x640xf32> -> vector<8x640xf32>
    %54 = vector.extract_strided_slice %53 {offsets = [0, 0], sizes = [2, 640], strides = [1, 1]} : vector<8x640xf32> to vector<2x640xf32>
    %55 = vector.extract_strided_slice %53 {offsets = [4, 0], sizes = [2, 640], strides = [1, 1]} : vector<8x640xf32> to vector<2x640xf32>
    %56 = arith.addf %54, %55 : vector<2x640xf32>
    %57 = arith.negf %56 : vector<2x640xf32>
    %58 = math.exp %57 : vector<2x640xf32>
    %cst_31 = arith.constant 1.000000e+00 : f32
    %59 = vector.broadcast %cst_31 : f32 to vector<2x640xf32>
    %60 = arith.addf %59, %58 : vector<2x640xf32>
    %61 = arith.divf %59, %60 : vector<2x640xf32>
    %62 = vector.extract_strided_slice %53 {offsets = [2, 0], sizes = [2, 640], strides = [1, 1]} : vector<8x640xf32> to vector<2x640xf32>
    %63 = vector.extract_strided_slice %53 {offsets = [6, 0], sizes = [2, 640], strides = [1, 1]} : vector<8x640xf32> to vector<2x640xf32>
    %64 = arith.addf %62, %63 : vector<2x640xf32>
    %65 = arith.negf %64 : vector<2x640xf32>
    %66 = math.exp %65 : vector<2x640xf32>
    %cst_32 = arith.constant 1.000000e+00 : f32
    %67 = vector.broadcast %cst_32 : f32 to vector<2x640xf32>
    %68 = arith.addf %67, %66 : vector<2x640xf32>
    %69 = arith.divf %67, %68 : vector<2x640xf32>
    %70 = arith.truncf %61 : vector<2x640xf32> to vector<2x640xbf16>
    %71 = arith.truncf %69 : vector<2x640xf32> to vector<2x640xbf16>
    %c0_33 = arith.constant 0 : index
    %c0_34 = arith.constant 0 : index
    %72 = vector.load %arg10[%c0_33, %c0_34] : memref<72x640xbf16, #tpu.memory_space<vmem>>, vector<72x640xbf16>
    %cst_35 = arith.constant dense<0.000000e+00> : vector<72x2xf32>
    %73 = tpu.matmul %72, %71, %cst_35 {dimension_numbers = #tpu.dot_dimension_numbers<[1], [1], [0], [0], [0, 0, 1, 0], [], []>} : vector<72x640xbf16>, vector<2x640xbf16>, vector<72x2xf32> -> vector<72x2xf32>
    %cst_36 = arith.constant 1.562500e-03 : f32
    %74 = vector.broadcast %cst_36 : f32 to vector<72x2xf32>
    %75 = arith.mulf %73, %74 : vector<72x2xf32>
    %c0_37 = arith.constant 0 : index
    %c0_38 = arith.constant 0 : index
    %76 = vector.load %arg10[%c0_37, %c0_38] : memref<72x640xbf16, #tpu.memory_space<vmem>>, vector<72x640xbf16>
    %77 = vector.extract_strided_slice %71 {offsets = [0, 0], sizes = [1, 640], strides = [1, 1]} : vector<2x640xbf16> to vector<1x640xbf16>
    %78 = vector.shape_cast %77 : vector<1x640xbf16> to vector<640xbf16>
    %79 = vector.shape_cast %78 : vector<640xbf16> to vector<1x640xbf16>
    %80 = vector.broadcast %79 : vector<1x640xbf16> to vector<72x640xbf16>
    %81 = arith.mulf %76, %80 : vector<72x640xbf16>
    %cst_39 = arith.constant dense<0xFF80> : vector<72xbf16>
    %82 = vector.multi_reduction <maximumf>, %81, %cst_39 [1] : vector<72x640xbf16> to vector<72xbf16>
    %83 = vector.shape_cast %82 : vector<72xbf16> to vector<72x1xbf16>
    %c0_40 = arith.constant 0 : index
    %c0_41 = arith.constant 0 : index
    %84 = vector.load %arg10[%c0_40, %c0_41] : memref<72x640xbf16, #tpu.memory_space<vmem>>, vector<72x640xbf16>
    %85 = vector.extract_strided_slice %71 {offsets = [1, 0], sizes = [1, 640], strides = [1, 1]} : vector<2x640xbf16> to vector<1x640xbf16>
    %86 = vector.shape_cast %85 : vector<1x640xbf16> to vector<640xbf16>
    %87 = vector.shape_cast %86 : vector<640xbf16> to vector<1x640xbf16>
    %88 = vector.broadcast %87 : vector<1x640xbf16> to vector<72x640xbf16>
    %89 = arith.mulf %84, %88 : vector<72x640xbf16>
    %cst_42 = arith.constant dense<0xFF80> : vector<72xbf16>
    %90 = vector.multi_reduction <maximumf>, %89, %cst_42 [1] : vector<72x640xbf16> to vector<72xbf16>
    %91 = vector.shape_cast %90 : vector<72xbf16> to vector<72x1xbf16>
    %92 = tpu.concatenate %83, %91 in 1 : vector<72x1xbf16>, vector<72x1xbf16> -> vector<72x2xbf16>
    %c0_43 = arith.constant 0 : index
    %c0_44 = arith.constant 0 : index
    %c0_45 = arith.constant 0 : index
    %93 = vector.load %arg6[%c0_43, %c0_44, %c0_45] : memref<2x72x72xbf16, #tpu.memory_space<vmem>>, vector<1x72x72xbf16>
    %94 = vector.shape_cast %93 : vector<1x72x72xbf16> to vector<72x72xbf16>
    %95 = arith.truncf %75 : vector<72x2xf32> to vector<72x2xbf16>
    %cst_46 = arith.constant dense<0.000000e+00> : vector<72x2xf32>
    %96 = tpu.matmul %94, %95, %cst_46 {dimension_numbers = #tpu.dot_dimension_numbers<[1], [0], [0], [1], [0, 0, 1, 1], [], []>} : vector<72x72xbf16>, vector<72x2xbf16>, vector<72x2xf32> -> vector<72x2xf32>
    %c1 = arith.constant 1 : index
    %c0_47 = arith.constant 0 : index
    %c0_48 = arith.constant 0 : index
    %97 = vector.load %arg6[%c1, %c0_47, %c0_48] : memref<2x72x72xbf16, #tpu.memory_space<vmem>>, vector<1x72x72xbf16>
    %98 = vector.shape_cast %97 : vector<1x72x72xbf16> to vector<72x72xbf16>
    %cst_49 = arith.constant dense<0.000000e+00> : vector<72x2xf32>
    %99 = tpu.matmul %98, %92, %cst_49 {dimension_numbers = #tpu.dot_dimension_numbers<[1], [0], [0], [1], [0, 0, 1, 1], [], []>} : vector<72x72xbf16>, vector<72x2xbf16>, vector<72x2xf32> -> vector<72x2xf32>
    %100 = arith.addf %96, %99 : vector<72x2xf32>
    %101 = arith.negf %100 : vector<72x2xf32>
    %102 = math.exp %101 : vector<72x2xf32>
    %cst_50 = arith.constant 1.000000e+00 : f32
    %103 = vector.broadcast %cst_50 : f32 to vector<72x2xf32>
    %104 = arith.addf %103, %102 : vector<72x2xf32>
    %105 = arith.divf %103, %104 : vector<72x2xf32>
    %106 = arith.truncf %105 : vector<72x2xf32> to vector<72x2xbf16>
    %c0_51 = arith.constant 0 : index
    %c0_52 = arith.constant 0 : index
    %107 = vector.load %arg11[%c0_51, %c0_52] : memref<72x640xbf16, #tpu.memory_space<vmem>>, vector<72x640xbf16>
    %cst_53 = arith.constant dense<0.000000e+00> : vector<72x2xf32>
    %108 = tpu.matmul %107, %70, %cst_53 {dimension_numbers = #tpu.dot_dimension_numbers<[1], [1], [0], [0], [0, 0, 1, 0], [], []>} : vector<72x640xbf16>, vector<2x640xbf16>, vector<72x2xf32> -> vector<72x2xf32>
    %cst_54 = arith.constant 1.562500e-03 : f32
    %109 = vector.broadcast %cst_54 : f32 to vector<72x2xf32>
    %110 = arith.mulf %108, %109 : vector<72x2xf32>
    %c0_55 = arith.constant 0 : index
    %c0_56 = arith.constant 0 : index
    %111 = vector.load %arg11[%c0_55, %c0_56] : memref<72x640xbf16, #tpu.memory_space<vmem>>, vector<72x640xbf16>
    %112 = vector.extract_strided_slice %70 {offsets = [0, 0], sizes = [1, 640], strides = [1, 1]} : vector<2x640xbf16> to vector<1x640xbf16>
    %113 = vector.shape_cast %112 : vector<1x640xbf16> to vector<640xbf16>
    %114 = vector.shape_cast %113 : vector<640xbf16> to vector<1x640xbf16>
    %115 = vector.broadcast %114 : vector<1x640xbf16> to vector<72x640xbf16>
    %116 = arith.mulf %111, %115 : vector<72x640xbf16>
    %cst_57 = arith.constant dense<0xFF80> : vector<72xbf16>
    %117 = vector.multi_reduction <maximumf>, %116, %cst_57 [1] : vector<72x640xbf16> to vector<72xbf16>
    %118 = vector.shape_cast %117 : vector<72xbf16> to vector<72x1xbf16>
    %c0_58 = arith.constant 0 : index
    %c0_59 = arith.constant 0 : index
    %119 = vector.load %arg11[%c0_58, %c0_59] : memref<72x640xbf16, #tpu.memory_space<vmem>>, vector<72x640xbf16>
    %120 = vector.extract_strided_slice %70 {offsets = [1, 0], sizes = [1, 640], strides = [1, 1]} : vector<2x640xbf16> to vector<1x640xbf16>
    %121 = vector.shape_cast %120 : vector<1x640xbf16> to vector<640xbf16>
    %122 = vector.shape_cast %121 : vector<640xbf16> to vector<1x640xbf16>
    %123 = vector.broadcast %122 : vector<1x640xbf16> to vector<72x640xbf16>
    %124 = arith.mulf %119, %123 : vector<72x640xbf16>
    %cst_60 = arith.constant dense<0xFF80> : vector<72xbf16>
    %125 = vector.multi_reduction <maximumf>, %124, %cst_60 [1] : vector<72x640xbf16> to vector<72xbf16>
    %126 = vector.shape_cast %125 : vector<72xbf16> to vector<72x1xbf16>
    %127 = tpu.concatenate %118, %126 in 1 : vector<72x1xbf16>, vector<72x1xbf16> -> vector<72x2xbf16>
    %c0_61 = arith.constant 0 : index
    %c0_62 = arith.constant 0 : index
    %c0_63 = arith.constant 0 : index
    %128 = vector.load %arg7[%c0_61, %c0_62, %c0_63] : memref<2x72x72xbf16, #tpu.memory_space<vmem>>, vector<1x72x72xbf16>
    %129 = vector.shape_cast %128 : vector<1x72x72xbf16> to vector<72x72xbf16>
    %130 = arith.truncf %110 : vector<72x2xf32> to vector<72x2xbf16>
    %cst_64 = arith.constant dense<0.000000e+00> : vector<72x2xf32>
    %131 = tpu.matmul %129, %130, %cst_64 {dimension_numbers = #tpu.dot_dimension_numbers<[1], [0], [0], [1], [0, 0, 1, 1], [], []>} : vector<72x72xbf16>, vector<72x2xbf16>, vector<72x2xf32> -> vector<72x2xf32>
    %c1_65 = arith.constant 1 : index
    %c0_66 = arith.constant 0 : index
    %c0_67 = arith.constant 0 : index
    %132 = vector.load %arg7[%c1_65, %c0_66, %c0_67] : memref<2x72x72xbf16, #tpu.memory_space<vmem>>, vector<1x72x72xbf16>
    %133 = vector.shape_cast %132 : vector<1x72x72xbf16> to vector<72x72xbf16>
    %cst_68 = arith.constant dense<0.000000e+00> : vector<72x2xf32>
    %134 = tpu.matmul %133, %127, %cst_68 {dimension_numbers = #tpu.dot_dimension_numbers<[1], [0], [0], [1], [0, 0, 1, 1], [], []>} : vector<72x72xbf16>, vector<72x2xbf16>, vector<72x2xf32> -> vector<72x2xf32>
    %135 = arith.addf %131, %134 : vector<72x2xf32>
    %136 = arith.negf %135 : vector<72x2xf32>
    %137 = math.exp %136 : vector<72x2xf32>
    %cst_69 = arith.constant 1.000000e+00 : f32
    %138 = vector.broadcast %cst_69 : f32 to vector<72x2xf32>
    %139 = arith.addf %138, %137 : vector<72x2xf32>
    %140 = arith.divf %138, %139 : vector<72x2xf32>
    %141 = arith.truncf %140 : vector<72x2xf32> to vector<72x2xbf16>
    %142 = vector.extract_strided_slice %71 {offsets = [0, 0], sizes = [1, 640], strides = [1, 1]} : vector<2x640xbf16> to vector<1x640xbf16>
    %143 = vector.shape_cast %142 : vector<1x640xbf16> to vector<640xbf16>
    %144 = vector.extract_strided_slice %106 {offsets = [0, 0], sizes = [72, 1], strides = [1, 1]} : vector<72x2xbf16> to vector<72x1xbf16>
    %145 = vector.shape_cast %143 : vector<640xbf16> to vector<1x640xbf16>
    %146 = vector.broadcast %145 : vector<1x640xbf16> to vector<72x640xbf16>
    %147 = vector.broadcast %144 : vector<72x1xbf16> to vector<72x640xbf16>
    %148 = arith.mulf %146, %147 : vector<72x640xbf16>
    %cst_70 = arith.constant 1.000000e+00 : bf16
    %149 = vector.broadcast %cst_70 : bf16 to vector<72x640xbf16>
    %150 = arith.addf %148, %149 : vector<72x640xbf16>
    %c0_71 = arith.constant 0 : index
    %c0_72 = arith.constant 0 : index
    %151 = vector.load %arg10[%c0_71, %c0_72] : memref<72x640xbf16, #tpu.memory_space<vmem>>, vector<72x640xbf16>
    %152 = arith.mulf %151, %150 : vector<72x640xbf16>
    %c0_73 = arith.constant 0 : index
    %c0_74 = arith.constant 0 : index
    %c0_75 = arith.constant 0 : index
    %153 = vector.load %arg8[%c0_73, %c0_74, %c0_75] : memref<2x72x640xbf16, #tpu.memory_space<vmem>>, vector<1x72x640xbf16>
    %154 = vector.shape_cast %153 : vector<1x72x640xbf16> to vector<72x640xbf16>
    %155 = vector.shape_cast %152 : vector<72x640xbf16> to vector<1x72x640xbf16>
    tpu.vector_store %arg8[%c0_73, %c0_74, %c0_75], %155 {strides = array<i32>} : memref<2x72x640xbf16, #tpu.memory_space<vmem>>, vector<1x72x640xbf16>,
    %156 = vector.extract_strided_slice %71 {offsets = [1, 0], sizes = [1, 640], strides = [1, 1]} : vector<2x640xbf16> to vector<1x640xbf16>
    %157 = vector.shape_cast %156 : vector<1x640xbf16> to vector<640xbf16>
    %158 = vector.extract_strided_slice %106 {offsets = [0, 1], sizes = [72, 1], strides = [1, 1]} : vector<72x2xbf16> to vector<72x1xbf16>
    %159 = vector.shape_cast %157 : vector<640xbf16> to vector<1x640xbf16>
    %160 = vector.broadcast %159 : vector<1x640xbf16> to vector<72x640xbf16>
    %161 = vector.broadcast %158 : vector<72x1xbf16> to vector<72x640xbf16>
    %162 = arith.mulf %160, %161 : vector<72x640xbf16>
    %cst_76 = arith.constant 1.000000e+00 : bf16
    %163 = vector.broadcast %cst_76 : bf16 to vector<72x640xbf16>
    %164 = arith.addf %162, %163 : vector<72x640xbf16>
    %c0_77 = arith.constant 0 : index
    %c0_78 = arith.constant 0 : index
    %165 = vector.load %arg10[%c0_77, %c0_78] : memref<72x640xbf16, #tpu.memory_space<vmem>>, vector<72x640xbf16>
    %166 = arith.mulf %165, %164 : vector<72x640xbf16>
    %c1_79 = arith.constant 1 : index
    %c0_80 = arith.constant 0 : index
    %c0_81 = arith.constant 0 : index
    %167 = vector.load %arg8[%c1_79, %c0_80, %c0_81] : memref<2x72x640xbf16, #tpu.memory_space<vmem>>, vector<1x72x640xbf16>
    %168 = vector.shape_cast %167 : vector<1x72x640xbf16> to vector<72x640xbf16>
    %169 = vector.shape_cast %166 : vector<72x640xbf16> to vector<1x72x640xbf16>
    tpu.vector_store %arg8[%c1_79, %c0_80, %c0_81], %169 {strides = array<i32>} : memref<2x72x640xbf16, #tpu.memory_space<vmem>>, vector<1x72x640xbf16>,
    %170 = vector.extract_strided_slice %70 {offsets = [0, 0], sizes = [1, 640], strides = [1, 1]} : vector<2x640xbf16> to vector<1x640xbf16>
    %171 = vector.shape_cast %170 : vector<1x640xbf16> to vector<640xbf16>
    %172 = vector.extract_strided_slice %141 {offsets = [0, 0], sizes = [72, 1], strides = [1, 1]} : vector<72x2xbf16> to vector<72x1xbf16>
    %173 = vector.shape_cast %171 : vector<640xbf16> to vector<1x640xbf16>
    %174 = vector.broadcast %173 : vector<1x640xbf16> to vector<72x640xbf16>
    %175 = vector.broadcast %172 : vector<72x1xbf16> to vector<72x640xbf16>
    %176 = arith.mulf %174, %175 : vector<72x640xbf16>
    %cst_82 = arith.constant 1.000000e+00 : bf16
    %177 = vector.broadcast %cst_82 : bf16 to vector<72x640xbf16>
    %178 = arith.addf %176, %177 : vector<72x640xbf16>
    %c0_83 = arith.constant 0 : index
    %c0_84 = arith.constant 0 : index
    %179 = vector.load %arg11[%c0_83, %c0_84] : memref<72x640xbf16, #tpu.memory_space<vmem>>, vector<72x640xbf16>
    %180 = arith.mulf %179, %178 : vector<72x640xbf16>
    %c0_85 = arith.constant 0 : index
    %c0_86 = arith.constant 0 : index
    %c0_87 = arith.constant 0 : index
    %181 = vector.load %arg9[%c0_85, %c0_86, %c0_87] : memref<2x72x640xbf16, #tpu.memory_space<vmem>>, vector<1x72x640xbf16>
    %182 = vector.shape_cast %181 : vector<1x72x640xbf16> to vector<72x640xbf16>
    %183 = vector.shape_cast %180 : vector<72x640xbf16> to vector<1x72x640xbf16>
    tpu.vector_store %arg9[%c0_85, %c0_86, %c0_87], %183 {strides = array<i32>} : memref<2x72x640xbf16, #tpu.memory_space<vmem>>, vector<1x72x640xbf16>,
    %184 = vector.extract_strided_slice %70 {offsets = [1, 0], sizes = [1, 640], strides = [1, 1]} : vector<2x640xbf16> to vector<1x640xbf16>
    %185 = vector.shape_cast %184 : vector<1x640xbf16> to vector<640xbf16>
    %186 = vector.extract_strided_slice %141 {offsets = [0, 1], sizes = [72, 1], strides = [1, 1]} : vector<72x2xbf16> to vector<72x1xbf16>
    %187 = vector.shape_cast %185 : vector<640xbf16> to vector<1x640xbf16>
    %188 = vector.broadcast %187 : vector<1x640xbf16> to vector<72x640xbf16>
    %189 = vector.broadcast %186 : vector<72x1xbf16> to vector<72x640xbf16>
    %190 = arith.mulf %188, %189 : vector<72x640xbf16>
    %cst_88 = arith.constant 1.000000e+00 : bf16
    %191 = vector.broadcast %cst_88 : bf16 to vector<72x640xbf16>
    %192 = arith.addf %190, %191 : vector<72x640xbf16>
    %c0_89 = arith.constant 0 : index
    %c0_90 = arith.constant 0 : index
    %193 = vector.load %arg11[%c0_89, %c0_90] : memref<72x640xbf16, #tpu.memory_space<vmem>>, vector<72x640xbf16>
    %194 = arith.mulf %193, %192 : vector<72x640xbf16>
    %c1_91 = arith.constant 1 : index
    %c0_92 = arith.constant 0 : index
    %c0_93 = arith.constant 0 : index
    %195 = vector.load %arg9[%c1_91, %c0_92, %c0_93] : memref<2x72x640xbf16, #tpu.memory_space<vmem>>, vector<1x72x640xbf16>
    %196 = vector.shape_cast %195 : vector<1x72x640xbf16> to vector<72x640xbf16>
    %197 = vector.shape_cast %194 : vector<72x640xbf16> to vector<1x72x640xbf16>
    tpu.vector_store %arg9[%c1_91, %c0_92, %c0_93], %197 {strides = array<i32>} : memref<2x72x640xbf16, #tpu.memory_space<vmem>>, vector<1x72x640xbf16>,
    return
  }
  func.func @transform_0(%arg0: i32, %arg1: i32) -> (i32, i32) {
    %c0_i32 = arith.constant 0 : i32
    %c0_i32_0 = arith.constant 0 : i32
    return %arg1, %c0_i32 : i32, i32
  }
  func.func @transform_1(%arg0: i32, %arg1: i32) -> (i32, i32) {
    %c0_i32 = arith.constant 0 : i32
    %c0_i32_0 = arith.constant 0 : i32
    return %arg0, %c0_i32 : i32, i32
  }
  func.func @transform_2(%arg0: i32, %arg1: i32) -> (i32, i32) {
    %c0_i32 = arith.constant 0 : i32
    %c0_i32_0 = arith.constant 0 : i32
    %c0_i32_1 = arith.constant 0 : i32
    return %c0_i32, %c0_i32_0 : i32, i32
  }
  func.func @transform_3(%arg0: i32, %arg1: i32) -> (i32, i32) {
    %c0_i32 = arith.constant 0 : i32
    %c0_i32_0 = arith.constant 0 : i32
    %c0_i32_1 = arith.constant 0 : i32
    return %c0_i32, %c0_i32_0 : i32, i32
  }
  func.func @transform_4(%arg0: i32, %arg1: i32) -> (i32, i32, i32) {
    %c0_i32 = arith.constant 0 : i32
    %c0_i32_0 = arith.constant 0 : i32
    %c0_i32_1 = arith.constant 0 : i32
    %c0_i32_2 = arith.constant 0 : i32
    return %c0_i32, %c0_i32_0, %c0_i32_1 : i32, i32, i32
  }
  func.func @transform_5(%arg0: i32, %arg1: i32) -> (i32, i32, i32) {
    %c0_i32 = arith.constant 0 : i32
    %c0_i32_0 = arith.constant 0 : i32
    %c0_i32_1 = arith.constant 0 : i32
    %c0_i32_2 = arith.constant 0 : i32
    return %c0_i32, %c0_i32_0, %c0_i32_1 : i32, i32, i32
  }
  func.func @transform_6(%arg0: i32, %arg1: i32) -> (i32, i32, i32) {
    %c0_i32 = arith.constant 0 : i32
    %c0_i32_0 = arith.constant 0 : i32
    return %arg0, %arg1, %c0_i32 : i32, i32, i32
  }
  func.func @transform_7(%arg0: i32, %arg1: i32) -> (i32, i32, i32) {
    %c0_i32 = arith.constant 0 : i32
    %c0_i32_0 = arith.constant 0 : i32
    return %arg1, %arg0, %c0_i32 : i32, i32, i32
  }
}

</mosaic_0001>

<bundles_post_ra>
// kernel: tpu_custom_call.1
= control target key start
LH: loop header
LB: loop body
LE: loop exit
PB: predicated region body
PF: predicated region fallthrough
CT: control target
= control target key end

     0   :  { %13 = vsyncpa [#allocation5], 0  ;;  %s9745_s0 = inlined_call_operand.vmem [shape: bf16[72,640], index: 0, kind: input, shape index: {}]   ;;  %s9746_s1 = inlined_call_operand.vmem [shape: bf16[72,640], index: 1, kind: input, shape index: {}]   ;;  %s9747_s2 = inlined_call_operand.vmem [shape: f32[640,64], index: 2, kind: input, shape index: {}]   ;;  %s9748_s3 = inlined_call_operand.vmem [shape: f32[64,640], index: 3, kind: input, shape index: {}]   ;;  %s9749_s4 = inlined_call_operand.vmem [shape: bf16[2,72,72], index: 4, kind: input, shape index: {}]   ;;  %s9750_s5 = inlined_call_operand.vmem [shape: bf16[2,72,72], index: 5, kind: input, shape index: {}]   ;;  %s9751_s6 = inlined_call_operand.hbm [shape: bf16[2,72,640], index: 6, kind: output, shape index: {0}]   ;;  %s9752_s7 = inlined_call_operand.hbm [shape: bf16[2,72,640], index: 7, kind: output, shape index: {1}]  }
   0x1   :  { %v48_v0 = vld [vmem:[%s9745_s0 + $0x78] sm:$0xff]  ;;  %v49_v1 = vld [vmem:[%s9745_s0 + $0x80] sm:$0xff]  ;;  %v42_v7 = vld [vmem:[%s9745_s0 + $0x50] sm:$0xff] }
   0x2   :  { %v50_v2 = vld [vmem:[%s9745_s0 + $0x60] ss:$40 sps:$4 sm:$0xff]   ;;  %v6938_v3 = vunpack.c.l.bf16 %v48_v0  ;;  %v6940_v4 = vunpack.c.h.bf16 %v48_v0  ;;  %v6942_v5 = vunpack.c.l.bf16 %v49_v1  ;;  %v6944_v6 = vunpack.c.h.bf16 %v49_v1  ;;  %v43_v8 = vld [vmem:[%s9745_s0 + $0x58] sm:$0xff]  ;;  %v51_v13 = vld [vmem:[%s9745_s0 + $0x8c] sm:$0xff] }
   0x3   :  { %v6952_v9 = vunpack.c.h.bf16 %v50_v2  ;;  %v6954_v10 = vunpack.c.l.bf16 %v42_v7  ;;  %v6956_v11 = vunpack.c.h.bf16 %v42_v7  ;;  %v6958_v12 = vunpack.c.l.bf16 %v43_v8  ;;  %v52_v18 = vld [vmem:[%s9745_s0 + $0x94] sm:$0xff]  ;;  %v45_v28 = vld [vmem:[%s9745_s0 + $0x64] sm:$0xff]  ;;  %v46_v37 = vld [vmem:[%s9745_s0 + $0x6c] sm:$0xff] }
   0x4   :  { %v132_v14 = vmul.f32 %v6938_v3, %v6938_v3  ;;  %v133_v15 = vmul.f32 %v6940_v4, %v6940_v4  ;;  %v134_v16 = vmul.f32 %v6942_v5, %v6942_v5  ;;  %v135_v17 = vmul.f32 %v6944_v6, %v6944_v6  ;;  %v53_v23 = vld [vmem:[%s9745_s0 + $0x74] ss:$40 sps:$4 sm:$0xff]   ;;  %v459_v50 = vld [vmem:[%s9746_s1 + $0x64] sm:$0xff]  ;;  %v460_v55 = vld [vmem:[%s9746_s1 + $0x6c] sm:$0xff] }
   0x5   :  { %9883 = vst [vmem:[#allocation10_spill] sm:$0xff] %v6952_v9  ;;  %v136_v19 = vmul.f32 %v6952_v9, %v6952_v9  ;;  %v6976_v20 = vunpack.c.h.bf16 %v43_v8  ;;  %v6978_v21 = vunpack.c.l.bf16 %v50_v2  ;;  %v122_v22 = vmul.f32 %v6954_v10, %v6954_v10  ;;  %v461_v60 = vld [vmem:[%s9746_s1 + $0x60] ss:$20 sps:$4 sm:$0xff]  }
   0x6   :  { %v183_v24 = vadd.f32 %v133_v15, %v132_v14  ;;  %v123_v25 = vmul.f32 %v6956_v11, %v6956_v11  ;;  %v124_v26 = vmul.f32 %v6958_v12, %v6958_v12  ;;  %v6989_v27 = vunpack.c.l.bf16 %v51_v13  ;;  %v456_v61 = vld [vmem:[%s9746_s1 + $0x50] sm:$0xff]  ;;  %v457_v14 = vld [vmem:[%s9746_s1 + $0x58] sm:$0xff] }
   0x7   :  { %9884 = vst [vmem:[#allocation11_spill] sm:$0xff] %v6978_v21  ;;  %v125_v29 = vmul.f32 %v6976_v20, %v6976_v20  ;;  %v126_v30 = vmul.f32 %v6978_v21, %v6978_v21  ;;  %v6998_v31 = vunpack.c.h.bf16 %v51_v13  ;;  %v7000_v32 = vunpack.c.l.bf16 %v52_v18 }
   0x8   :  { %v184_v33 = vadd.f32 %v183_v24, %v134_v16  ;;  %v171_v34 = vadd.f32 %v123_v25, %v122_v22  ;;  %v7002_v35 = vunpack.c.h.bf16 %v52_v18  ;;  %v7004_v36 = vunpack.c.h.bf16 %v53_v23 }
   0x9   :  { %v137_v38 = vmul.f32 %v6989_v27, %v6989_v27  ;;  %v138_v39 = vmul.f32 %v6998_v31, %v6998_v31  ;;  %v139_v40 = vmul.f32 %v7000_v32, %v7000_v32  ;;  %v7015_v41 = vunpack.c.l.bf16 %v45_v28 }
   0xa   :  { %9885 = vst [vmem:[#allocation12_spill] sm:$0xff] %v7004_v36  ;;  %v185_v42 = vadd.f32 %v184_v33, %v135_v17  ;;  %v172_v43 = vadd.f32 %v171_v34, %v124_v26  ;;  %v140_v44 = vmul.f32 %v7002_v35, %v7002_v35  ;;  %v141_v45 = vmul.f32 %v7004_v36, %v7004_v36  ;;  %v463_v26 = vld [vmem:[%s9746_s1 + $0x80] sm:$0xff]  ;;  %v7089_v34 = vld [vmem:[%s9746_s1 + $0x10] ss:$120 sps:$4 sm:$0xff]  }
   0xb   :  { %v189_v46 = vadd.f32 %v138_v39, %v137_v38  ;;  %v7021_v47 = vunpack.c.h.bf16 %v45_v28  ;;  %v7023_v48 = vunpack.c.l.bf16 %v46_v37  ;;  %v7025_v49 = vunpack.c.h.bf16 %v46_v37  ;;  %v30_v37 = vld [vmem:[%s9745_s0] sm:$0xff] }
   0xc   :  { %v186_v51 = vadd.f32 %v185_v42, %v136_v19  ;;  %v173_v52 = vadd.f32 %v172_v43, %v125_v29  ;;  %v7030_v53 = vunpack.c.l.bf16 %v53_v23  ;;  %v127_v54 = vmul.f32 %v7015_v41, %v7015_v41  ;;  %v462_v19 = vld [vmem:[%s9746_s1 + $0x78] sm:$0xff] }
   0xd   :  { %v190_v56 = vadd.f32 %v189_v46, %v139_v40  ;;  %v128_v57 = vmul.f32 %v7021_v47, %v7021_v47  ;;  %v129_v58 = vmul.f32 %v7023_v48, %v7023_v48  ;;  %v130_v59 = vmul.f32 %v7025_v49, %v7025_v49 }
   0xe   :  { %9886 = vst [vmem:[#allocation13_spill] sm:$0xff] %v7030_v53  ;;  %187 = vadd.xlane.f32.xlu1 %v186_v51  ;;  %v174_v62 = vadd.f32 %v173_v52, %v126_v30  ;;  %v131_v63 = vmul.f32 %v7030_v53, %v7030_v53  ;;  %v7051_v0 = vunpack.c.l.bf16 %v459_v50  ;;  %v7053_v1 = vunpack.c.h.bf16 %v459_v50  ;;  %v31_v50 = vld [vmem:[%s9745_s0 + $0x8] sm:$0xff] }
   0xf   :  { %v191_v2 = vadd.f32 %v190_v56, %v140_v44  ;;  %v177_v7 = vadd.f32 %v128_v57, %v127_v54  ;;  %v7055_v8 = vunpack.c.l.bf16 %v460_v55  ;;  %v7057_v13 = vunpack.c.h.bf16 %v460_v55  ;;  %v32_v56 = vld [vmem:[%s9745_s0 + $0x10] ss:$20 sps:$4 sm:$0xff]  }
  0x10   :  { %175 = vadd.xlane.f32.xlu0 %v174_v62  ;;  %v7062_v15 = vunpack.c.h.bf16 %v461_v60  ;;  %v541_v16 = vmul.f32 %v7051_v0, %v7051_v0  ;;  %v542_v17 = vmul.f32 %v7053_v1, %v7053_v1  ;;  %v7068_v18 = vunpack.c.l.bf16 %v456_v61 }
  0x11   :  { %v192_v22 = vadd.f32 %v191_v2, %v141_v45  ;;  %v178_v23 = vadd.f32 %v177_v7, %v129_v58  ;;  %v543_v24 = vmul.f32 %v7055_v8, %v7055_v8  ;;  %v544_v25 = vmul.f32 %v7057_v13, %v7057_v13 }
  0x12   :  { %9887 = vst [vmem:[#allocation14_spill] sm:$0xff] %v7062_v15  ;;  %v545_v28 = vmul.f32 %v7062_v15, %v7062_v15  ;;  %v591_v29 = vadd.f32 %v542_v17, %v541_v16  ;;  %v7082_v30 = vunpack.c.h.bf16 %v456_v61  ;;  %v7084_v33 = vunpack.c.l.bf16 %v457_v14  ;;  %v33_v61 = vld [vmem:[%s9745_s0 + $0x14] sm:$0xff] }
  0x13   :  { %193 = vadd.xlane.f32.xlu1 %v192_v22  ;;  %v179_v38 = vadd.f32 %v178_v23, %v130_v59  ;;  %v7094_v39 = vunpack.c.h.bf16 %v457_v14  ;;  %v7096_v40 = vunpack.c.l.bf16 %v461_v60  ;;  %v536_v42 = vmul.f32 %v7068_v18, %v7068_v18  ;;  %v34_v22 = vld [vmem:[%s9745_s0 + $0x1c] sm:$0xff] }
  0x14   :  { %v592_v43 = vadd.f32 %v591_v29, %v543_v24  ;;  %v537_v44 = vmul.f32 %v7082_v30, %v7082_v30  ;;  %v538_v45 = vmul.f32 %v7084_v33, %v7084_v33  ;;  %v7104_v46 = vunpack.c.l.bf16 %v462_v19 }
  0x15   :  { %9888 = vst [vmem:[#allocation15_spill] sm:$0xff] %v7096_v40  ;;  %v180_v51 = vadd.f32 %v179_v38, %v131_v63  ;;  %v539_v52 = vmul.f32 %v7094_v39, %v7094_v39  ;;  %v540_v54 = vmul.f32 %v7096_v40, %v7096_v40  ;;  %v7113_v55 = vunpack.c.h.bf16 %v462_v19 }
  0x16   :  { %v593_v57 = vadd.f32 %v592_v43, %v544_v25  ;;  %v585_v58 = vadd.f32 %v537_v44, %v536_v42  ;;  %v7118_v59 = vunpack.c.l.bf16 %v463_v26  ;;  %v7120_v60 = vunpack.c.h.bf16 %v463_v26 }
  0x17   :  { %181 = vadd.xlane.f32.xlu0 %v180_v51  ;;  %v7126_v62 = vunpack.c.h.bf16 %v7089_v34  ;;  %v546_v63 = vmul.f32 %v7104_v46, %v7104_v46  ;;  %v547_v2 = vmul.f32 %v7113_v55, %v7113_v55  ;;  %v7132_v7 = vunpack.c.l.bf16 %v30_v37 }
  0x18   :  { %v594_v14 = vadd.f32 %v593_v57, %v545_v28  ;;  %v586_v16 = vadd.f32 %v585_v58, %v538_v45  ;;  %v548_v17 = vmul.f32 %v7118_v59, %v7118_v59  ;;  %v549_v19 = vmul.f32 %v7120_v60, %v7120_v60  ;;  %v54_v28 = vld [vmem:[%s9745_s0 + $0xa0] sm:$0xff] }
  0x19   :  { %9889 = vst [vmem:[#allocation16_spill] sm:$0xff] %v7126_v62  ;;  %v550_v23 = vmul.f32 %v7126_v62, %v7126_v62  ;;  %v597_v24 = vadd.f32 %v547_v2, %v546_v63  ;;  %v7143_v25 = vunpack.c.h.bf16 %v30_v37  ;;  %v7145_v26 = vunpack.c.l.bf16 %v31_v50 }
  0x1a   :  { %595 = vadd.xlane.f32.xlu1 %v594_v14  ;;  %v587_v29 = vadd.f32 %v586_v16, %v539_v52  ;;  %v7150_v38 = vunpack.c.h.bf16 %v31_v50  ;;  %v7152_v42 = vunpack.c.l.bf16 %v32_v56  ;;  %v102_v43 = vmul.f32 %v7132_v7, %v7132_v7 }
  0x1b   :  { %v598_v44 = vadd.f32 %v597_v24, %v548_v17  ;;  %v103_v37 = vmul.f32 %v7143_v25, %v7143_v25  ;;  %v104_v45 = vmul.f32 %v7145_v26, %v7145_v26  ;;  %v7160_v51 = vunpack.c.l.bf16 %v33_v61 }
  0x1c   :  { %9890 = vst [vmem:[#allocation17_spill] sm:$0xff] %v7152_v42  ;;  %v588_v57 = vadd.f32 %v587_v29, %v540_v54  ;;  %v105_v52 = vmul.f32 %v7150_v38, %v7150_v38  ;;  %v106_v50 = vmul.f32 %v7152_v42, %v7152_v42  ;;  %v7166_v58 = vunpack.c.h.bf16 %v33_v61 }
  0x1d   :  { %14 = vsyncpa [#allocation7], 0  ;;  %v599_v63 = vadd.f32 %v598_v44, %v549_v19  ;;  %v147_v2 = vadd.f32 %v103_v37, %v102_v43  ;;  %v7168_v14 = vunpack.c.l.bf16 %v34_v22  ;;  %v7170_v16 = vunpack.c.h.bf16 %v34_v22  ;;  %v55_v17 = vld [vmem:[%s9745_s0 + $0xa8] sm:$0xff]  ;;  %v7184_v19 = vld [vmem:[%s9745_s0 + $0x38] ss:$120 sps:$4 sm:$0xff]  }
  0x1e   :  { %589 = vadd.xlane.f32.xlu0 %v588_v57  ;;  %v7175_v54 = vunpack.c.h.bf16 %v32_v56  ;;  %v107_v24 = vmul.f32 %v7160_v51, %v7160_v51  ;;  %v108_v61 = vmul.f32 %v7166_v58, %v7166_v58  ;;  %v7186_v22 = vunpack.c.l.bf16 %v54_v28  ;;  %v444_v37 = vld [vmem:[%s9746_s1] sm:$0xff]  ;;  %v445_v36 = vld [vmem:[%s9746_s1 + $0x8] sm:$0xff] }
  0x1f   :  { %v600_v29 = vadd.f32 %v599_v63, %v550_v23  ;;  %v148_v43 = vadd.f32 %v147_v2, %v104_v45  ;;  %v109_v44 = vmul.f32 %v7168_v14, %v7168_v14  ;;  %v110_v56 = vmul.f32 %v7170_v16, %v7170_v16  ;;  %v448_v42 = vld [vmem:[%s9746_s1 + $0x1c] sm:$0xff] }
  0x20   :  { %9891 = vst [vmem:[#allocation18_spill] sm:$0xff] %v7175_v54  ;;  %v111_v57 = vmul.f32 %v7175_v54, %v7175_v54  ;;  %v153_v62 = vadd.f32 %v108_v61, %v107_v24  ;;  %v7197_v15 = vunpack.c.h.bf16 %v54_v28  ;;  %v7199_v40 = vunpack.c.l.bf16 %v55_v17  ;;  %v447_v24 = vld [vmem:[%s9746_s1 + $0x14] sm:$0xff] }
  0x21   :  { %v149_v23 = vadd.f32 %v148_v43, %v105_v52  ;;  %v7201_v45 = vunpack.c.h.bf16 %v55_v17  ;;  %v7204_v63 = vunpack.c.h.bf16 %v7184_v19  ;;  %v142_v2 = vmul.f32 %v7186_v22, %v7186_v22 }
  0x22   :  { %9892 = vst [vmem:[#allocation19_spill] sm:$0xff] %v7199_v40  ;;  %601 = vadd.xlane.f32.xlu0 %v600_v29  ;;  %v154_v9 = vadd.f32 %v153_v62, %v109_v44  ;;  %v143_v28 = vmul.f32 %v7197_v15, %v7197_v15  ;;  %v144_v52 = vmul.f32 %v7199_v40, %v7199_v40  ;;  %v7215_v17 = vunpack.c.l.bf16 %v444_v37 }
  0x23   :  { %9893 = vst [vmem:[#allocation20_spill] sm:$0xff] %v7201_v45  ;;  %9894 = vst [vmem:[#allocation21_spill] sm:$0xff] %v7204_v63  ;;  %v150_v61 = vadd.f32 %v149_v23, %v106_v50  ;;  %v145_v43 = vmul.f32 %v7201_v45, %v7201_v45  ;;  %v146_v29 = vmul.f32 %v7204_v63, %v7204_v63  ;;  %v7224_v62 = vunpack.c.h.bf16 %v444_v37 }
  0x24   :  { %v155_v44 = vadd.f32 %v154_v9, %v110_v56  ;;  %v195_v53 = vadd.f32 %v143_v28, %v142_v2  ;;  %v7226_v21 = vunpack.c.l.bf16 %v445_v36  ;;  %v7228_v54 = vunpack.c.h.bf16 %v445_v36  ;;  %v449_v9 = vld [vmem:[%s9746_s1 + $0x24] ss:$120 sps:$4 sm:$0xff]  }
  0x25   :  { %9895 = vst [vmem:[#allocation22_spill] sm:$0xff] %v7224_v62  ;;  %151 = vadd.xlane.f32.xlu1 %v150_v61  ;;  %v7234_v50 = vunpack.c.l.bf16 %v7089_v34  ;;  %v516_v23 = vmul.f32 %v7215_v17, %v7215_v17  ;;  %v517_v37 = vmul.f32 %v7224_v62, %v7224_v62  ;;  %v7243_v36 = vunpack.c.l.bf16 %v447_v24  ;;  %v465_v61 = vld [vmem:[%s9746_s1 + $0x8c] sm:$0xff] }
  0x26   :  { %9896 = vst [vmem:[#allocation23_spill] sm:$0xff] %v7226_v21  ;;  %9897 = vst [vmem:[#allocation24_spill] sm:$0xff] %v7228_v54  ;;  %v156_v56 = vadd.f32 %v155_v44, %v111_v57  ;;  %v196_v2 = vadd.f32 %v195_v53, %v144_v52  ;;  %v518_v28 = vmul.f32 %v7226_v21, %v7226_v21  ;;  %v7254_v40 = vunpack.c.h.bf16 %v447_v24 }
  0x27   :  { %9898 = vst [vmem:[#allocation25_spill] sm:$0xff] %v7234_v50  ;;  %9899 = vst [vmem:[#allocation26_spill] sm:$0xff] %v7243_v36  ;;  %v519_v34 = vmul.f32 %v7228_v54, %v7228_v54  ;;  %v520_v63 = vmul.f32 %v7234_v50, %v7234_v50  ;;  %v561_v45 = vadd.f32 %v517_v37, %v516_v23  ;;  %v7256_v62 = vunpack.c.l.bf16 %v448_v42  ;;  %v466_v54 = vld [vmem:[%s9746_s1 + $0x94] sm:$0xff] }
  0x28   :  { %9900 = vst [vmem:[#allocation27_spill] sm:$0xff] %v7254_v40  ;;  %157 = vadd.xlane.f32.xlu0 %v156_v56  ;;  %v197_v53 = vadd.f32 %v196_v2, %v145_v43  ;;  %v7258_v57 = vunpack.c.h.bf16 %v448_v42  ;;  %v7260_v52 = vunpack.c.l.bf16 %v449_v9  ;;  %v521_v44 = vmul.f32 %v7243_v36, %v7243_v36  ;;  %v36_v42 = vld [vmem:[%s9745_s0 + $0x28] sm:$0xff]  ;;  %v37_v36 = vld [vmem:[%s9745_s0 + $0x30] sm:$0xff] }
  0x29   :  { %9901 = vst [vmem:[#allocation28_spill] sm:$0xff] %v7256_v62  ;;  %v562_v21 = vadd.f32 %v561_v45, %v518_v28  ;;  %v522_v24 = vmul.f32 %v7254_v40, %v7254_v40  ;;  %v523_v23 = vmul.f32 %v7256_v62, %v7256_v62  ;;  %v7271_v37 = vunpack.c.l.bf16 %v465_v61 }
  0x2a   :  { %9902 = vst [vmem:[#allocation29_spill] sm:$0xff] %v7258_v57  ;;  %9903 = vst [vmem:[#allocation30_spill] sm:$0xff] %v7260_v52  ;;  %v198_v43 = vadd.f32 %v197_v53, %v146_v29  ;;  %v524_v56 = vmul.f32 %v7258_v57, %v7258_v57  ;;  %v525_v2 = vmul.f32 %v7260_v52, %v7260_v52  ;;  %v7280_v45 = vunpack.c.h.bf16 %v465_v61 }
  0x2b   :  { %v563_v28 = vadd.f32 %v562_v21, %v519_v34  ;;  %v567_v50 = vadd.f32 %v522_v24, %v521_v44  ;;  %v7282_v40 = vunpack.c.l.bf16 %v466_v54  ;;  %v7284_v62 = vunpack.c.h.bf16 %v466_v54 }
  0x2c   :  { %9904 = vst [vmem:[#allocation31_spill] sm:$0xff] %v7280_v45  ;;  %199 = vadd.xlane.f32.xlu1 %v198_v43  ;;  %v7289_v29 = vunpack.c.h.bf16 %v449_v9  ;;  %v551_v53 = vmul.f32 %v7271_v37, %v7271_v37  ;;  %v552_v61 = vmul.f32 %v7280_v45, %v7280_v45  ;;  %v7295_v52 = vunpack.c.l.bf16 %v36_v42  ;;  %v450_v9 = vld [vmem:[%s9746_s1 + $0x28] sm:$0xff] }
  0x2d   :  { %9905 = vst [vmem:[#allocation32_spill] sm:$0xff] %v7282_v40  ;;  %9906 = vst [vmem:[#allocation33_spill] sm:$0xff] %v7284_v62  ;;  %v564_v21 = vadd.f32 %v563_v28, %v520_v63  ;;  %v568_v34 = vadd.f32 %v567_v50, %v523_v23  ;;  %v553_v54 = vmul.f32 %v7282_v40, %v7282_v40  ;;  %v7306_v57 = vunpack.c.h.bf16 %v36_v42  ;;  %v469_v40 = vld [vmem:[%s9746_s1 + $0xa8] sm:$0xff] }
  0x2e   :  { %9907 = vst [vmem:[#allocation34_spill] sm:$0xff] %v7289_v29  ;;  %9908 = vst [vmem:[#allocation35_spill] sm:$0xff] %v7295_v52  ;;  %v554_v44 = vmul.f32 %v7284_v62, %v7284_v62  ;;  %v555_v24 = vmul.f32 %v7289_v29, %v7289_v29  ;;  %v603_v43 = vadd.f32 %v552_v61, %v551_v53  ;;  %v7308_v45 = vunpack.c.l.bf16 %v37_v36  ;;  %v451_v62 = vld [vmem:[%s9746_s1 + $0x30] sm:$0xff] }
  0x2f   :  { %9909 = vst [vmem:[#allocation36_spill] sm:$0xff] %v7306_v57  ;;  %565 = vadd.xlane.f32.xlu0 %v564_v21  ;;  %v569_v63 = vadd.f32 %v568_v34, %v524_v56  ;;  %v7310_v50 = vunpack.c.h.bf16 %v37_v36  ;;  %v7313_v23 = vunpack.c.l.bf16 %v7184_v19  ;;  %v112_v28 = vmul.f32 %v7295_v52, %v7295_v52  ;;  %v452_v36 = vld [vmem:[%s9746_s1 + $0x38] ss:$120 sps:$4 sm:$0xff]   ;;  %v468_v56 = vld [vmem:[%s9746_s1 + $0xa0] sm:$0xff] }
  0x30   :  { %9910 = vst [vmem:[#allocation37_spill] sm:$0xff] %v7308_v45  ;;  %v604_v29 = vadd.f32 %v603_v43, %v553_v54  ;;  %v113_v42 = vmul.f32 %v7306_v57, %v7306_v57  ;;  %v114_v53 = vmul.f32 %v7308_v45, %v7308_v45  ;;  %v7327_v19 = vunpack.c.l.bf16 %v450_v9 }
  0x31   :  { %9911 = vst [vmem:[#allocation38_spill] sm:$0xff] %v7310_v50  ;;  %9912 = vst [vmem:[#allocation39_spill] sm:$0xff] %v7313_v23  ;;  %v570_v61 = vadd.f32 %v569_v63, %v525_v2  ;;  %v115_v21 = vmul.f32 %v7310_v50, %v7310_v50  ;;  %v116_v34 = vmul.f32 %v7313_v23, %v7313_v23  ;;  %v7336_v54 = vunpack.c.h.bf16 %v450_v9 }
  0x32   :  { %9913 = vst [vmem:[#allocation40_spill] sm:$0xff] %v7327_v19  ;;  %v605_v43 = vadd.f32 %v604_v29, %v554_v44  ;;  %v159_v45 = vadd.f32 %v113_v42, %v112_v28  ;;  %v7338_v57 = vunpack.c.l.bf16 %v451_v62  ;;  %v7340_v52 = vunpack.c.h.bf16 %v451_v62  ;;  %v39_v42 = vld [vmem:[%s9745_s0 + $0x3c] sm:$0xff] }
  0x33   :  { %9914 = vst [vmem:[#allocation41_spill] sm:$0xff] %v7336_v54  ;;  %571 = vadd.xlane.f32.xlu1 %v570_v61  ;;  %v7345_v2 = vunpack.c.l.bf16 %v452_v36  ;;  %v526_v63 = vmul.f32 %v7327_v19, %v7327_v19  ;;  %v527_v9 = vmul.f32 %v7336_v54, %v7336_v54  ;;  %v7351_v23 = vunpack.c.l.bf16 %v468_v56 }
  0x34   :  { %9915 = vst [vmem:[#allocation42_spill] sm:$0xff] %v7338_v57  ;;  %9916 = vst [vmem:[#allocation43_spill] sm:$0xff] %v7340_v52  ;;  %v606_v29 = vadd.f32 %v605_v43, %v555_v24  ;;  %v160_v44 = vadd.f32 %v159_v45, %v114_v53  ;;  %v528_v62 = vmul.f32 %v7338_v57, %v7338_v57  ;;  %v7362_v50 = vunpack.c.h.bf16 %v468_v56 }
  0x35   :  { %9917 = vst [vmem:[#allocation44_spill] sm:$0xff] %v7345_v2  ;;  %9918 = vst [vmem:[#allocation45_spill] sm:$0xff] %v7351_v23  ;;  %v529_v28 = vmul.f32 %v7340_v52, %v7340_v52  ;;  %v530_v61 = vmul.f32 %v7345_v2, %v7345_v2  ;;  %v573_v19 = vadd.f32 %v527_v9, %v526_v63  ;;  %v7364_v54 = vunpack.c.l.bf16 %v469_v40  ;;  %v40_v52 = vld [vmem:[%s9745_s0 + $0x44] sm:$0xff] }
  0x36   :  { %9919 = vst [vmem:[#allocation46_spill] sm:$0xff] %v7362_v50  ;;  %607 = vadd.xlane.f32.xlu0 %v606_v29  ;;  %v161_v45 = vadd.f32 %v160_v44, %v115_v21  ;;  %v7366_v24 = vunpack.c.h.bf16 %v469_v40  ;;  %v7368_v53 = vunpack.c.h.bf16 %v452_v36  ;;  %v556_v43 = vmul.f32 %v7351_v23, %v7351_v23  ;;  %v41_v40 = vld [vmem:[%s9745_s0 + $0x4c] sm:$0xf]  ;;  %v453_v21 = vld [vmem:[%s9746_s1 + $0x3c] sm:$0xff] }
  0x37   :  { %9920 = vst [vmem:[#allocation47_spill] sm:$0xff] %v7364_v54  ;;  %v574_v57 = vadd.f32 %v573_v19, %v528_v62  ;;  %v557_v56 = vmul.f32 %v7362_v50, %v7362_v50  ;;  %v558_v63 = vmul.f32 %v7364_v54, %v7364_v54  ;;  %v7382_v36 = vunpack.c.l.bf16 %v39_v42  ;;  %v454_v50 = vld [vmem:[%s9746_s1 + $0x44] sm:$0xff] }
  0x38   :  { %9921 = vst [vmem:[#allocation48_spill] sm:$0xff] %v7368_v53  ;;  %v162_v9 = vadd.f32 %v161_v45, %v116_v34  ;;  %v559_v19 = vmul.f32 %v7366_v24, %v7366_v24  ;;  %v7389_v29 = vunpack.c.h.bf16 %v39_v42  ;;  %v7391_v2 = vunpack.c.l.bf16 %v40_v52 }
  0x39   :  { %9922 = vst [vmem:[#allocation49_spill] sm:$0xff] %v7382_v36  ;;  %v575_v44 = vadd.f32 %v574_v57, %v529_v28  ;;  %v609_v62 = vadd.f32 %v557_v56, %v556_v43  ;;  %v7393_v54 = vunpack.c.h.bf16 %v40_v52  ;;  %v7398_v23 = vunpack.c.l.bf16 %v41_v40  ;;  %v455_v56 = vld [vmem:[%s9746_s1 + $0x4c] sm:$0xf] }
  0x3a   :  { %9923 = vst [vmem:[#allocation50_spill] sm:$0xff] %v7389_v29  ;;  %9924 = vst [vmem:[#allocation51_spill] sm:$0xff] %v7391_v2  ;;  %163 = vadd.xlane.f32.xlu1 %v162_v9  ;;  %v117_v34 = vmul.f32 %v7382_v36, %v7382_v36  ;;  %v118_v42 = vmul.f32 %v7389_v29, %v7389_v29  ;;  %v7404_v45 = vunpack.c.l.bf16 %v453_v21  ;;  %v7415_v36 = vunpack.c.h.bf16 %v453_v21 }
  0x3b   :  { %9925 = vst [vmem:[#allocation52_spill] sm:$0xff] %v7398_v23  ;;  %v576_v57 = vadd.f32 %v575_v44, %v530_v61  ;;  %v560_v52 = vmul.f32 %v7368_v53, %v7368_v53  ;;  %v610_v28 = vadd.f32 %v609_v62, %v558_v63  ;;  %v119_v43 = vmul.f32 %v7391_v2, %v7391_v2 }
  0x3c   :  { %v120_v40 = vmul.f32 %v7393_v54, %v7393_v54  ;;  %v165_v9 = vadd.f32 %v118_v42, %v117_v34  ;;  %v7417_v29 = vunpack.c.l.bf16 %v454_v50  ;;  %v121_v63 = vmul.f32 %v7398_v23, %v7398_v23 }
  0x3d   :  { %577 = vadd.xlane.f32.xlu0 %v576_v57  ;;  %v611_v61 = vadd.f32 %v610_v28, %v559_v19  ;;  %v7421_v44 = vunpack.c.h.bf16 %v454_v50  ;;  %v531_v62 = vmul.f32 %v7404_v45, %v7404_v45  ;;  %v7425_v2 = vunpack.c.l.bf16 %v455_v56 }
  0x3e   :  { %9926 = vst [vmem:[#allocation53_spill] sm:$0xff] %v7417_v29  ;;  %v166_v53 = vadd.f32 %v165_v9, %v119_v43  ;;  %v532_v34 = vmul.f32 %v7415_v36, %v7415_v36  ;;  %v533_v21 = vmul.f32 %v7417_v29, %v7417_v29  ;;  %v1739_v29 = vld [vmem:[%s9747_s2 + $0xf8] sm:$0xff]  ;;  %vm897_vm0 = vcmask 1043456  }
  0x3f   :  { %9927 = vst [vmem:[#allocation54_spill] sm:$0xff] %v7425_v2  ;;  %v612_v42 = vadd.f32 %v611_v61, %v560_v52  ;;  %v534_v19 = vmul.f32 %v7421_v44, %v7421_v44  ;;  %v535_v23 = vmul.f32 %v7425_v2, %v7425_v2  ;;  %v1771_v52 = vld [vmem:[%s9747_s2 + $0x1f8] sm:$0xff]  ;;  %6215 = vmatprep.subr.mxu0 %v1739_v29  ;;  %v1722_v61 = vld [vmem:[%s9747_s2 + $0x70] sm:$0xff]  ;;  %v1737_v29 = vld [vmem:[%s9747_s2 + $0xe8] sm:$0xff]  ;;  %vm1206_vm1 = vcmask 1047556  }
  0x40   :  { %v167_v57 = vadd.f32 %v166_v53, %v120_v40  ;;  %v579_v28 = vadd.f32 %v532_v34, %v531_v62  ;;  %v1723_v53 = vld [vmem:[%s9747_s2 + $0x78] sm:$0xff]  ;;  %6250 = vmatprep.subr.mxu1 %v1771_v52  ;;  %v1738_v40 = vld [vmem:[%s9747_s2 + $0xf0] sm:$0xff]  ;;  %v1721_v34 = vld [vmem:[%s9747_s2 + $0x68] sm:$0xff]  ;;  %vm1667_vm2 = vcmask 1040384   ;;  %vm1673_vm3 = vcmask 1041408  }
  0x41   :  { %613 = vadd.xlane.f32.xlu1 %v612_v42  ;;  %6216 = vmatpush3.msra.mxu0 %v1723_v53  ;;  %v1754_v62 = vld [vmem:[%s9747_s2 + $0x170] sm:$0xff]  ;;  %v1736_v42 = vld [vmem:[%s9747_s2 + $0xe0] sm:$0xff]  ;;  %v1751_v53 = vld [vmem:[%s9747_s2 + $0x158] sm:$0xff]  ;;  %vm1679_vm4 = vcmask 1042432   ;;  %vm1690_vm5 = vcmask 1044480   ;;  %vm1696_vm6 = vcmask 1045504  }
  0x42   :  { %v168_v50 = vadd.f32 %v167_v57, %v121_v63  ;;  %v580_v43 = vadd.f32 %v579_v28, %v533_v21  ;;  %v1770_v63 = vld [vmem:[%s9747_s2 + $0x1f0] sm:$0xff]  ;;  %6217 = vmatprep.subr.mxu0 %v1738_v40  ;;  %v1769_v21 = vld [vmem:[%s9747_s2 + $0x1e8] sm:$0xff]  ;;  %v1720_v28 = vld [vmem:[%s9747_s2 + $0x60] sm:$0xff]  ;;  %vm1702_vm7 = vcmask 1046528   ;;  %vm6882_vm8 = vmmov 0  }
  0x43   :  { %6218 = vmatpush3.msra.mxu0 %v1722_v61  ;;  %v1753_v57 = vld [vmem:[%s9747_s2 + $0x168] sm:$0xff]  ;;  %v1734_v52 = vld [vmem:[%s9747_s2 + $0xd0] sm:$0xff]  ;;  %vm2039_vm9 = vcmask 523264   ;;  %vm3168_vm10 = vcmask 7168   ;;  %vm3235_vm11 = vcmask 588800  }
  0x44   :  { %169 = vadd.xlane.f32.xlu0 %v168_v50  ;;  %v581_v56 = vadd.f32 %v580_v43, %v534_v19  ;;  %v1768_v19 = vld [vmem:[%s9747_s2 + $0x1e0] sm:$0xff]  ;;  %6219 = vmatprep.subr.mxu0 %v1737_v29  ;;  %v1735_v43 = vld [vmem:[%s9747_s2 + $0xd8] sm:$0xff]  ;;  %v1766_v40 = vld [vmem:[%s9747_s2 + $0x1d0] sm:$0xff] }
  0x45   :  { %v1752_v50 = vld [vmem:[%s9747_s2 + $0x160] sm:$0xff]  ;;  %6220 = vmatpush3.msra.mxu0 %v1721_v34  ;;  %v1750_v61 = vld [vmem:[%s9747_s2 + $0x150] sm:$0xff]  ;;  %v1765_v29 = vld [vmem:[%s9747_s2 + $0x1c8] sm:$0xff] }
  0x46   :  { %v582_v9 = vadd.f32 %v581_v56, %v535_v23  ;;  %v1755_v23 = vld [vmem:[%s9747_s2 + $0x178] sm:$0xff]  ;;  %6221 = vmatprep.subr.mxu0 %v1736_v42  ;;  %v1749_v34 = vld [vmem:[%s9747_s2 + $0x148] sm:$0xff]  ;;  %v1764_v42 = vld [vmem:[%s9747_s2 + $0x1c0] sm:$0xff] }
  0x47   :  { %6251 = vmatpush3.msra.mxu1 %v1755_v23  ;;  %v1767_v56 = vld [vmem:[%s9747_s2 + $0x1d8] sm:$0xff]  ;;  %6222 = vmatpush3.msra.mxu0 %v1720_v28  ;;  %v1718_v23 = vld [vmem:[%s9747_s2 + $0x50] sm:$0xff] }
  0x48   :  { %583 = vadd.xlane.f32.xlu1 %v582_v9  ;;  %6252 = vmatprep.subr.mxu1 %v1770_v63  ;;  %v1719_v9 = vld [vmem:[%s9747_s2 + $0x58] sm:$0xff]  ;;  %v1733_v63 = vld [vmem:[%s9747_s2 + $0xc8] sm:$0xff] }
  0x49   :  { %6253 = vmatpush3.msra.mxu1 %v1754_v62  ;;  %6223 = vmatprep.subr.mxu0 %v1735_v43  ;;  %v1717_v62 = vld [vmem:[%s9747_s2 + $0x48] sm:$0xff]  ;;  %v1731_v28 = vld [vmem:[%s9747_s2 + $0xb8] sm:$0xff] }
  0x4a   :  { %6254 = vmatprep.subr.mxu1 %v1769_v21  ;;  %6224 = vmatpush3.msra.mxu0 %v1719_v9  ;;  %v1732_v21 = vld [vmem:[%s9747_s2 + $0xc0] sm:$0xff]  ;;  %v1715_v43 = vld [vmem:[%s9747_s2 + $0x38] sm:$0xff]  ;;  %v1730_v9 = vld [vmem:[%s9747_s2 + $0xb0] sm:$0xff] }
  0x4b   :  { %6255 = vmatpush3.msra.mxu1 %v1753_v57  ;;  %6225 = vmatprep.subr.mxu0 %v1734_v52  ;;  %v1716_v57 = vld [vmem:[%s9747_s2 + $0x40] sm:$0xff]  ;;  %v1714_v52 = vld [vmem:[%s9747_s2 + $0x30] sm:$0xff] }
  0x4c   :  { %6256 = vmatprep.subr.mxu1 %v1768_v19  ;;  %6226 = vmatpush3.msra.mxu0 %v1718_v23  ;;  %v1748_v19 = vld [vmem:[%s9747_s2 + $0x140] sm:$0xff]  ;;  %v1729_v23 = vld [vmem:[%s9747_s2 + $0xa8] sm:$0xff] }
  0x4d   :  { %6257 = vmatpush3.msra.mxu1 %v1752_v50  ;;  %6227 = vmatprep.subr.mxu0 %v1733_v63  ;;  %v1763_v50 = vld [vmem:[%s9747_s2 + $0x1b8] sm:$0xff]  ;;  %v1713_v63 = vld [vmem:[%s9747_s2 + $0x28] sm:$0xff] }
  0x4e   :  { %6258 = vmatprep.subr.mxu1 %v1767_v56  ;;  %6228 = vmatpush3.msra.mxu0 %v1717_v62  ;;  %v1747_v56 = vld [vmem:[%s9747_s2 + $0x138] sm:$0xff]  ;;  %v1728_v62 = vld [vmem:[%s9747_s2 + $0xa0] sm:$0xff] }
  0x4f   :  { %6259 = vmatpush3.msra.mxu1 %v1751_v53  ;;  %6229 = vmatprep.subr.mxu0 %v1732_v21  ;;  %v1762_v53 = vld [vmem:[%s9747_s2 + $0x1b0] sm:$0xff]  ;;  %v1712_v21 = vld [vmem:[%s9747_s2 + $0x20] sm:$0xff] }
  0x50   :  { %6260 = vmatprep.subr.mxu1 %v1766_v40  ;;  %6230 = vmatpush3.msra.mxu0 %v1716_v57  ;;  %v1746_v40 = vld [vmem:[%s9747_s2 + $0x130] sm:$0xff]  ;;  %v1727_v57 = vld [vmem:[%s9747_s2 + $0x98] sm:$0xff] }
  0x51   :  { %6261 = vmatpush3.msra.mxu1 %v1750_v61  ;;  %6231 = vmatprep.subr.mxu0 %v1731_v28  ;;  %v1761_v61 = vld [vmem:[%s9747_s2 + $0x1a8] sm:$0xff]  ;;  %v1711_v28 = vld [vmem:[%s9747_s2 + $0x18] sm:$0xff] }
  0x52   :  { %6262 = vmatprep.subr.mxu1 %v1765_v29  ;;  %6232 = vmatpush3.msra.mxu0 %v1715_v43  ;;  %v1745_v29 = vld [vmem:[%s9747_s2 + $0x128] sm:$0xff]  ;;  %v1726_v43 = vld [vmem:[%s9747_s2 + $0x90] sm:$0xff] }
  0x53   :  { %6263 = vmatpush3.msra.mxu1 %v1749_v34  ;;  %6233 = vmatprep.subr.mxu0 %v1730_v9  ;;  %v1760_v34 = vld [vmem:[%s9747_s2 + $0x1a0] sm:$0xff]  ;;  %v1710_v9 = vld [vmem:[%s9747_s2 + $0x10] sm:$0xff] }
  0x54   :  { %6264 = vmatprep.subr.mxu1 %v1764_v42  ;;  %6234 = vmatpush3.msra.mxu0 %v1714_v52  ;;  %v1744_v42 = vld [vmem:[%s9747_s2 + $0x120] sm:$0xff]  ;;  %v1725_v52 = vld [vmem:[%s9747_s2 + $0x88] sm:$0xff] }
  0x55   :  { %6265 = vmatpush3.msra.mxu1 %v1748_v19  ;;  %6235 = vmatprep.subr.mxu0 %v1729_v23  ;;  %v1759_v19 = vld [vmem:[%s9747_s2 + $0x198] sm:$0xff]  ;;  %v1709_v23 = vld [vmem:[%s9747_s2 + $0x8] sm:$0xff] }
  0x56   :  { %6266 = vmatprep.subr.mxu1 %v1763_v50  ;;  %6236 = vmatpush3.msra.mxu0 %v1713_v63  ;;  %v1743_v50 = vld [vmem:[%s9747_s2 + $0x118] sm:$0xff]  ;;  %v1724_v63 = vld [vmem:[%s9747_s2 + $0x80] sm:$0xff] }
  0x57   :  { %6267 = vmatpush3.msra.mxu1 %v1747_v56  ;;  %6237 = vmatprep.subr.mxu0 %v1728_v62  ;;  %v1758_v56 = vld [vmem:[%s9747_s2 + $0x190] sm:$0xff]  ;;  %v1708_v62 = vld [vmem:[%s9747_s2] sm:$0xff] }
  0x58   :  { %6268 = vmatprep.subr.mxu1 %v1762_v53  ;;  %6238 = vmatpush3.msra.mxu0 %v1712_v21  ;;  %v1742_v53 = vld [vmem:[%s9747_s2 + $0x110] sm:$0xff] }
  0x59   :  { %6269 = vmatpush3.msra.mxu1 %v1746_v40  ;;  %6239 = vmatprep.subr.mxu0 %v1727_v57  ;;  %v1757_v40 = vld [vmem:[%s9747_s2 + $0x188] sm:$0xff] }
  0x5a   :  { %6270 = vmatprep.subr.mxu1 %v1761_v61  ;;  %6240 = vmatpush3.msra.mxu0 %v1711_v28  ;;  %v1741_v61 = vld [vmem:[%s9747_s2 + $0x108] sm:$0xff] }
  0x5b   :  { %6271 = vmatpush3.msra.mxu1 %v1745_v29  ;;  %6241 = vmatprep.subr.mxu0 %v1726_v43  ;;  %v1756_v29 = vld [vmem:[%s9747_s2 + $0x180] sm:$0xff] }
  0x5c   :  { %6272 = vmatprep.subr.mxu1 %v1760_v34  ;;  %6242 = vmatpush3.msra.mxu0 %v1710_v9  ;;  %v1740_v34 = vld [vmem:[%s9747_s2 + $0x100] sm:$0xff]  ;;  %v9797_v9 = vmov 0.0  }
  0x5d   :  { %6273 = vmatpush3.msra.mxu1 %v1744_v42  ;;  %6243 = vmatprep.subr.mxu0 %v1725_v52 }
  0x5e   :  { %6274 = vmatprep.subr.mxu1 %v1759_v19  ;;  %6244 = vmatpush3.msra.mxu0 %v1709_v23 }
  0x5f   :  { %6275 = vmatpush3.msra.mxu1 %v1743_v50  ;;  %6245 = vmatprep.subr.mxu0 %v1724_v63 }
  0x60   :  { %6276 = vmatprep.subr.mxu1 %v1758_v56  ;;  %6246 = vmatpush3.msra.mxu0 %v1708_v62 }
  0x61   :  { %6277 = vmatpush3.msra.mxu1 %v1742_v53  ;;  %6363 = vmatprep.subr.mxu0 %v9797_v9 }
  0x62   :  { %6278 = vmatprep.subr.mxu1 %v1757_v40 }
  0x63   :  { %6279 = vmatpush3.msra.mxu1 %v1741_v61 }
  0x64   :  { %6280 = vmatprep.subr.mxu1 %v1756_v29 }
  0x65   :  { %6281 = vmatpush3.msra.mxu1 %v1740_v34 }
  0x97   :  { %v188_v21 = vpop.xlane.xlu1 %187 }
  0x98   :  { %v207_v42 = vmax.f32 %v188_v21, 1e-16 }
  0x99   :  { %v176_v57 = vpop.xlane.xlu0 %175 }
  0x9a   :  { %6654 = vrsqrt.f32 %v207_v42  ;;  %v205_v19 = vmax.f32 %v176_v57, 1e-16 }
  0x9c   :  { %6656 = vrsqrt.f32 %v205_v19  ;;  %v194_v28 = vpop.xlane.xlu1 %193 }
  0x9d   :  { %v208_v50 = vmax.f32 %v194_v28, 1e-16 }
  0x9f   :  { %6658 = vrsqrt.f32 %v208_v50 }
  0xa0   :  { %v182_v43 = vpop.xlane.xlu0 %181 }
  0xa1   :  { %v206_v56 = vmax.f32 %v182_v43, 1e-16 }
  0xa3   :  { %6660 = vrsqrt.f32 %v206_v56  ;;  %v596_v53 = vpop.xlane.xlu1 %595 }
  0xa4   :  { %v620_v52 = vmax.f32 %v596_v53, 1e-16 }
  0xa6   :  { %6662 = vrsqrt.f32 %v620_v52 }
  0xa7   :  { %v7628_v40 = vpop.eup %6654  ;;  %v590_v23 = vpop.xlane.xlu0 %589 }
  0xa8   :  { %9928 = vst [vmem:[#allocation55_spill] sm:$0xff] %v7628_v40  ;;  %v619_v61 = vmax.f32 %v590_v23, 1e-16  ;;  %v249_v63 = vmul.f32 %v7628_v40, %v6938_v3  ;;  %v250_v29 = vmul.f32 %v7628_v40, %v6940_v4  ;;  %v251_v62 = vmul.f32 %v7628_v40, %v6942_v5 }
  0xa9   :  { %v7636_v34 = vpop.eup %6656  ;;  %v252_v21 = vmul.f32 %v7628_v40, %v6944_v6 }
  0xaa   :  { %9929 = vst [vmem:[#allocation56_spill] sm:$0xff] %v7636_v34  ;;  %6664 = vrsqrt.f32 %v619_v61  ;;  %v239_v42 = vmul.f32 %v7636_v34, %v6954_v10  ;;  %v240_v57 = vmul.f32 %v7636_v34, %v6956_v11  ;;  %v7644_v19 = vpack.c.bf16 %v250_v29, %v249_v63 }
  0xab   :  { %v602_v3 = vpop.xlane.xlu0 %601  ;;  %v241_v4 = vmul.f32 %v7636_v34, %v6958_v12  ;;  %v242_v5 = vmul.f32 %v7636_v34, %v6976_v20  ;;  %v7650_v28 = vpack.c.bf16 %v252_v21, %v251_v62 }
  0xac   :  { %9930 = vst [vmem:[#allocation57_spill] sm:$0xff] %v7644_v19  ;;  %v7652_v50 = vpop.eup %6658  ;;  %v621_v6 = vmax.f32 %v602_v3, 1e-16  ;;  %v6173_v43 = vpack.c.bf16 %v240_v57, %v239_v42  ;;  %431 = vst [vmem:[#allocation2 + $0x78] sm:$0xff] %v7644_v19  ;;  %v9802_v53 = vunpack.c.h.bf16 %v7644_v19  ;;  %v9799_v23 = vunpack.c.l.bf16 %v7644_v19 }
  0xad   :  { %9931 = vst [vmem:[#allocation58_spill] sm:$0xff] %v7652_v50  ;;  %v254_v10 = vmul.f32 %v7652_v50, %v6989_v27  ;;  %v255_v11 = vmul.f32 %v7652_v50, %v6998_v31  ;;  %v256_v12 = vmul.f32 %v7652_v50, %v7000_v32  ;;  %v257_v20 = vmul.f32 %v7652_v50, %v7002_v35 }
  0xae   :  { %432 = vst [vmem:[#allocation2 + $0x80] sm:$0xff] %v7650_v28  ;;  %6666 = vrsqrt.f32 %v621_v6  ;;  %v152_v56 = vpop.xlane.xlu1 %151  ;;  %425 = vst [vmem:[#allocation2 + $0x50] sm:$0xff] %v6173_v43  ;;  %v6174_v52 = vpack.c.bf16 %v242_v5, %v241_v4  ;;  %v9800_v32 = vunpack.c.h.bf16 %v7650_v28  ;;  %v1093_v57 = vrot.slane %v9802_v53, 4 }
  0xaf   :  { %v201_v27 = vmax.f32 %v152_v56, 1e-16  ;;  %v7666_v61 = vpack.c.bf16 %v255_v11, %v254_v10  ;;  %v7668_v31 = vpack.c.bf16 %v257_v20, %v256_v12  ;;  %v7700_v43 = vrot.slane %v9799_v23, 4 }
  0xb0   :  { %v7671_v63 = vpop.eup %6660  ;;  %426 = vst [vmem:[#allocation2 + $0x58] sm:$0xff] %v6174_v52  ;;  %v7696_v6 = vrot.slane %v9800_v32, 4 }
  0xb1   :  { %9932 = vst [vmem:[#allocation59_spill] sm:$0xff] %v7666_v61  ;;  %9933 = vst [vmem:[#allocation60_spill] sm:$0xff] %v7671_v63  ;;  %6668 = vrsqrt.f32 %v201_v27  ;;  %v158_v35 = vpop.xlane.xlu0 %157  ;;  %v244_v29 = vmul.f32 %v7671_v63, %v7015_v41  ;;  %v245_v62 = vmul.f32 %v7671_v63, %v7021_v47  ;;  %v9801_v21 = vunpack.c.h.bf16 %v7666_v61 }
  0xb2   :  { %434 = vst [vmem:[#allocation2 + $0x8c] sm:$0xff] %v7666_v61  ;;  %435 = vst [vmem:[#allocation2 + $0x94] sm:$0xff] %v7668_v31  ;;  %v202_v42 = vmax.f32 %v158_v35, 1e-16  ;;  %v246_v3 = vmul.f32 %v7671_v63, %v7023_v48  ;;  %v247_v4 = vmul.f32 %v7671_v63, %v7025_v49  ;;  %v9803_v27 = vunpack.c.h.bf16 %v7668_v31  ;;  %v9953_v63 = vld [vmem:[#allocation20_spill] sm:$0xff] }
  0xb3   :  { %v7686_v41 = vpop.eup %6662  ;;  %v7688_v5 = vpack.c.bf16 %v245_v62, %v244_v29  ;;  %v7692_v47 = vrot.slane %v9801_v21, 4  ;;  %9935 = vst [vmem:[#allocation62_spill] sm:$0xff] %v7700_v43 }
  0xb4   :  { %9934 = vst [vmem:[#allocation61_spill] sm:$0xff] %v7686_v41  ;;  %6670 = vrsqrt.f32 %v202_v42  ;;  %v658_v48 = vmul.f32 %v7686_v41, %v7051_v0  ;;  %v659_v49 = vmul.f32 %v7686_v41, %v7053_v1  ;;  %v7706_v10 = vpack.c.bf16 %v247_v4, %v246_v3 }
  0xb5   :  { %v200_v11 = vpop.xlane.xlu1 %199  ;;  %428 = vst [vmem:[#allocation2 + $0x64] sm:$0xff] %v7688_v5  ;;  %v7709_v12 = vld [vmem:[#allocation2 + $0x50] sm:$0x33]  ;;  %v7711_v20 = vld [vmem:[#allocation2 + $0x50] sm:$0xcc]  ;;  %v1032_v56 = vunpack.c.h.bf16 %v7688_v5  ;;  %v660_v52 = vmul.f32 %v7686_v41, %v7055_v8  ;;  %v661_v0 = vmul.f32 %v7686_v41, %v7057_v13  ;;  %v1104_v8 = vsel %vm897_vm0, %v1093_v57, %v7692_v47 }
  0xb6   :  { %v209_v1 = vmax.f32 %v200_v11, 1e-16  ;;  %v7719_v35 = vpack.c.bf16 %v659_v49, %v658_v48  ;;  %v1027_v29 = vunpack.c.h.bf16 %v7711_v20  ;;  %429 = vst [vmem:[#allocation2 + $0x6c] sm:$0xff] %v7706_v10  ;;  %v890_v3 = vunpack.c.h.bf16 %v7709_v12 }
  0xb7   :  { %v7724_v42 = vpop.eup %6664  ;;  %v7729_v4 = vpack.c.bf16 %v661_v0, %v660_v52  ;;  %v1080_v9 = vrot.slane %v1032_v56, 4  ;;  %v7741_v0 = vrot.slane %v9803_v27, 4 }
  0xb8   :  { %9936 = vst [vmem:[#allocation63_spill] sm:$0xff] %v7719_v35  ;;  %9937 = vst [vmem:[#allocation64_spill] sm:$0xff] %v7724_v42  ;;  %6672 = vrsqrt.f32 %v209_v1  ;;  %v566_v48 = vpop.xlane.xlu0 %565  ;;  %v653_v49 = vmul.f32 %v7724_v42, %v7068_v18  ;;  %v654_v11 = vmul.f32 %v7724_v42, %v7082_v30  ;;  %v1079_v23 = vrot.slane %v1027_v29, 4 }
  0xb9   :  { %842 = vst [vmem:[#allocation3 + $0x64] sm:$0xff] %v7719_v35  ;;  %v615_v62 = vmax.f32 %v566_v48, 1e-16  ;;  %843 = vst [vmem:[#allocation3 + $0x6c] sm:$0xff] %v7729_v4  ;;  %v1218_v13 = vsel %vm1206_vm1, %v1027_v29, -inf  ;;  %v655_v30 = vmul.f32 %v7724_v42, %v7084_v33  ;;  %v656_v52 = vmul.f32 %v7724_v42, %v7094_v39  ;;  %v9950_v42 = vld [vmem:[#allocation22_spill] sm:$0xff] }
  0xba   :  { %v6200_v1 = vpack.c.bf16 %v654_v11, %v653_v49  ;;  %v1081_v48 = vsel %vm897_vm0, %v1079_v23, %v1080_v9  ;;  %v1219_v21 = vmax.f32 %v1218_v13, %v1032_v56  ;;  %v7757_v11 = vsel %vm897_vm0, %v890_v3, 0.0 }
  0xbb   :  { %v7747_v32 = vpop.eup %6666  ;;  %6674 = vrsqrt.f32 %v615_v62  ;;  %v1094_v33 = vsel %vm897_vm0, %v1080_v9, %v1093_v57  ;;  %v9941_v13 = vunpack.c.h.bf16 %v7644_v19  ;;  %v6201_v18 = vpack.c.bf16 %v656_v52, %v655_v30  ;;  %v7773_v9 = vld [vmem:[#allocation2 + $0x58] sm:$0x33] }
  0xbc   :  { %9938 = vst [vmem:[#allocation65_spill] sm:$0xff] %v7747_v32  ;;  %v572_v53 = vpop.xlane.xlu1 %571  ;;  %v663_v49 = vmul.f32 %v7747_v32, %v7104_v46  ;;  %v664_v29 = vmul.f32 %v7747_v32, %v7113_v55  ;;  %839 = vst [vmem:[#allocation3 + $0x50] sm:$0xff] %v6200_v1  ;;  %v1157_v27 = vadd.f32 %v1094_v33, %v1081_v48  ;;  %v7769_v55 = vsel %vm897_vm0, %v890_v3, -inf  ;;  %v9972_v19 = vld [vmem:[#allocation38_spill] sm:$0xff] }
  0xbd   :  { %v616_v62 = vmax.f32 %v572_v53, 1e-16  ;;  %v665_v23 = vmul.f32 %v7747_v32, %v7118_v59  ;;  %v666_v39 = vmul.f32 %v7747_v32, %v7120_v60  ;;  %v1220_v1 = vmax.f32 %v1219_v21, %v9941_v13  ;;  %9942 = vst [vmem:[#allocation68_spill] sm:$0xff] %v7773_v9  ;;  %840 = vst [vmem:[#allocation3 + $0x58] sm:$0xff] %v6201_v18 }
  0xbe   :  { %v7764_v56 = vpop.eup %6668  ;;  %v7766_v46 = vpack.c.bf16 %v664_v29, %v663_v49  ;;  %v9943_v57 = vunpack.c.h.bf16 %v7719_v35  ;;  %v892_v33 = vunpack.c.h.bf16 %v7773_v9 }
  0xbf   :  { %9939 = vst [vmem:[#allocation66_spill] sm:$0xff] %v7764_v56  ;;  %6676 = vrsqrt.f32 %v616_v62  ;;  %v608_v53 = vpop.xlane.xlu0 %607  ;;  %v219_v59 = vmul.f32 %v7764_v56, %v7132_v7  ;;  %v220_v60 = vmul.f32 %v7764_v56, %v7143_v25  ;;  %v221_v21 = vmul.f32 %v7764_v56, %v7145_v26 }
  0xc0   :  { %9940 = vst [vmem:[#allocation67_spill] sm:$0xff] %v7766_v46  ;;  %v1486_v48 = vrot.slane %v9943_v57, 4  ;;  %v622_v49 = vmax.f32 %v608_v53, 1e-16  ;;  %845 = vst [vmem:[#allocation3 + $0x78] sm:$0xff] %v7766_v46  ;;  %v9804_v3 = vunpack.c.h.bf16 %v7766_v46  ;;  %v222_v52 = vmul.f32 %v7764_v56, %v7150_v38 }
  0xc1   :  { %v7787_v30 = vpop.eup %6670  ;;  %v7789_v7 = vpack.c.bf16 %v220_v60, %v219_v59  ;;  %v7791_v25 = vadd.f32 %v1157_v27, %v1104_v8  ;;  %v7793_v29 = vpack.c.bf16 %v666_v39, %v665_v23  ;;  %v9945_v38 = vunpack.c.h.bf16 %v7666_v61  ;;  %v9988_v61 = vld [vmem:[#allocation51_spill] sm:$0xff] }
  0xc2   :  { %9944 = vst [vmem:[#allocation69_spill] sm:$0xff] %v7787_v30  ;;  %6678 = vrsqrt.f32 %v622_v49  ;;  %v224_v62 = vmul.f32 %v7787_v30, %v7160_v51  ;;  %v225_v26 = vmul.f32 %v7787_v30, %v7166_v58  ;;  %v7809_v8 = vrot.slane %v9804_v3, 4 }
  0xc3   :  { %v1221_v18 = vmax.f32 %v1220_v1, %v9945_v38  ;;  %v164_v13 = vpop.xlane.xlu1 %163  ;;  %413 = vst [vmem:[#allocation2] sm:$0xff] %v7789_v7  ;;  %v7803_v53 = vld [vmem:[#allocation3 + $0x50] sm:$0x33]  ;;  %v7805_v27 = vld [vmem:[#allocation3 + $0x50] sm:$0xcc]  ;;  %v226_v51 = vmul.f32 %v7787_v30, %v7168_v14  ;;  %v227_v58 = vmul.f32 %v7787_v30, %v7170_v16  ;;  %v7815_v23 = vpack.c.bf16 %v222_v52, %v221_v21 }
  0xc4   :  { %9946 = vst [vmem:[#allocation70_spill] sm:$0xff] %v7803_v53  ;;  %9947 = vst [vmem:[#allocation71_spill] sm:$0xff] %v7805_v27  ;;  %v203_v39 = vmax.f32 %v164_v13, 1e-16  ;;  %v7818_v1 = vpack.c.bf16 %v225_v26, %v224_v62  ;;  %v1298_v59 = vunpack.c.h.bf16 %v7803_v53  ;;  %v1433_v60 = vunpack.c.h.bf16 %v7805_v27  ;;  %v7834_v21 = vld [vmem:[#allocation2 + $0x58] sm:$0xcc] }
  0xc5   :  { %846 = vst [vmem:[#allocation3 + $0x80] sm:$0xff] %v7793_v29  ;;  %v7822_v57 = vpop.eup %6672  ;;  %v870_v49 = vunpack.c.h.bf16 %v7789_v7  ;;  %v7825_v38 = vpack.c.bf16 %v227_v58, %v226_v51  ;;  %414 = vst [vmem:[#allocation2 + $0x8] sm:$0xff] %v7815_v23  ;;  %v7829_v14 = vsel %vm897_vm0, %v892_v33, 0.0  ;;  %v7832_v16 = vsel %vm897_vm0, %v892_v33, -inf }
  0xc6   :  { %9948 = vst [vmem:[#allocation72_spill] sm:$0xff] %v7822_v57  ;;  %6680 = vrsqrt.f32 %v203_v39  ;;  %v578_v52 = vpop.xlane.xlu0 %577  ;;  %v259_v62 = vmul.f32 %v7822_v57, %v7186_v22  ;;  %v260_v26 = vmul.f32 %v7822_v57, %v7197_v15  ;;  %416 = vst [vmem:[#allocation2 + $0x14] sm:$0xff] %v7818_v1  ;;  %v875_v13 = vunpack.c.h.bf16 %v7818_v1 }
  0xc7   :  { %v617_v51 = vmax.f32 %v578_v52, 1e-16  ;;  %v1485_v58 = vrot.slane %v1433_v60, 4  ;;  %v1500_v33 = vsel %vm897_vm0, %v1486_v48, %v7809_v8  ;;  %417 = vst [vmem:[#allocation2 + $0x1c] sm:$0xff] %v7825_v38  ;;  %v7851_v22 = vsel %vm897_vm0, %v1298_v59, 0.0 }
  0xc8   :  { %v7846_v3 = vpop.eup %6674  ;;  %v7848_v32 = vpack.c.bf16 %v260_v26, %v259_v62  ;;  %v1623_v15 = vsel %vm1206_vm1, %v1433_v60, -inf  ;;  %v7861_v62 = vadd.f32 %v875_v13, %v870_v49  ;;  %v7863_v26 = vmax.f32 %v870_v49, %v875_v13 }
  0xc9   :  { %9949 = vst [vmem:[#allocation73_spill] sm:$0xff] %v7846_v3  ;;  %6682 = vrsqrt.f32 %v617_v51  ;;  %v633_v52 = vmul.f32 %v7846_v3, %v7215_v17  ;;  %v634_v2 = vmul.f32 %v7846_v3, %v9950_v42  ;;  %v1487_v39 = vsel %vm897_vm0, %v1485_v58, %v1486_v48  ;;  %v9952_v17 = vld [vmem:[#allocation19_spill] sm:$0xff] }
  0xca   :  { %v614_v50 = vpop.xlane.xlu1 %613  ;;  %437 = vst [vmem:[#allocation2 + $0xa0] sm:$0xff] %v7848_v32  ;;  %v1047_v60 = vunpack.c.h.bf16 %v7848_v32  ;;  %v7867_v41 = vsel %vm897_vm0, %v1298_v59, -inf  ;;  %v261_v42 = vmul.f32 %v7822_v57, %v9952_v17  ;;  %v262_v48 = vmul.f32 %v7822_v57, %v9953_v63  ;;  %v9958_v63 = vld [vmem:[#allocation23_spill] sm:$0xff] }
  0xcb   :  { %v623_v51 = vmax.f32 %v614_v50, 1e-16  ;;  %v7869_v40 = vpack.c.bf16 %v634_v2, %v633_v52  ;;  %v7877_v49 = vadd.f32 %v1500_v33, %v1487_v39  ;;  %v9955_v13 = vunpack.c.h.bf16 %v7719_v35  ;;  %v9956_v50 = vld [vmem:[#allocation26_spill] sm:$0xff]  ;;  %v9957_v52 = vld [vmem:[#allocation27_spill] sm:$0xff] }
  0xcc   :  { %v7875_v58 = vpop.eup %6676  ;;  %v1113_v34 = vrot.slane %v1047_v60, 4  ;;  %v1222_v30 = vmax.f32 %v1221_v18, %v1047_v60  ;;  %v635_v57 = vmul.f32 %v7846_v3, %v9958_v63  ;;  %v9962_v63 = vld [vmem:[#allocation31_spill] sm:$0xff] }
  0xcd   :  { %9951 = vst [vmem:[#allocation22_spill] sm:$0xff] %v7869_v40  ;;  %9954 = vst [vmem:[#allocation19_spill] sm:$0xff] %v7875_v58  ;;  %v1624_v56 = vmax.f32 %v1623_v15, %v9955_v13  ;;  %6684 = vrsqrt.f32 %v623_v51  ;;  %v170_v59 = vpop.xlane.xlu0 %169  ;;  %v638_v2 = vmul.f32 %v7875_v58, %v9956_v50  ;;  %v639_v17 = vmul.f32 %v7875_v58, %v9957_v52  ;;  %v9961_v50 = vld [vmem:[#allocation24_spill] sm:$0xff] }
  0xce   :  { %827 = vst [vmem:[#allocation3] sm:$0xff] %v7869_v40  ;;  %v204_v9 = vmax.f32 %v170_v59, 1e-16  ;;  %v1114_v18 = vsel %vm897_vm0, %v7692_v47, %v1113_v34  ;;  %v1160_v33 = vsel %vm897_vm0, %v1113_v34, 0.0  ;;  %v1223_v39 = vrot.slane %v1222_v30, 4 }
  0xcf   :  { %v7891_v15 = vpop.eup %6678  ;;  %v7893_v60 = vpack.c.bf16 %v639_v17, %v638_v2  ;;  %v1159_v51 = vadd.f32 %v7791_v25, %v1114_v18  ;;  %v7896_v13 = vpack.c.bf16 %v262_v48, %v261_v42  ;;  %v636_v52 = vmul.f32 %v7846_v3, %v9961_v50  ;;  %v9963_v25 = vld [vmem:[#allocation28_spill] sm:$0xff]  ;;  %v9964_v48 = vld [vmem:[#allocation29_spill] sm:$0xff] }
  0xd0   :  { %9959 = vst [vmem:[#allocation20_spill] sm:$0xff] %v7891_v15  ;;  %6686 = vrsqrt.f32 %v204_v9  ;;  %v668_v59 = vmul.f32 %v7891_v15, %v7271_v37  ;;  %v669_v47 = vmul.f32 %v7891_v15, %v9962_v63  ;;  %v1224_v34 = vmax.f32 %v1222_v30, %v1223_v39  ;;  %v9965_v9 = vld [vmem:[#allocation32_spill] sm:$0xff]  ;;  %v9967_v30 = vld [vmem:[#allocation33_spill] sm:$0xff] }
  0xd1   :  { %9960 = vst [vmem:[#allocation26_spill] sm:$0xff] %v7893_v60  ;;  %v584_v35 = vpop.xlane.xlu1 %583  ;;  %830 = vst [vmem:[#allocation3 + $0x14] sm:$0xff] %v7893_v60  ;;  %v1161_v2 = vadd.f32 %v1160_v33, %v1159_v51  ;;  %v640_v42 = vmul.f32 %v7875_v58, %v9963_v25  ;;  %v641_v17 = vmul.f32 %v7875_v58, %v9964_v48  ;;  %v1278_v51 = vunpack.c.h.bf16 %v7869_v40  ;;  %v9969_v48 = vld [vmem:[#allocation35_spill] sm:$0xff]  ;;  %v9971_v58 = vld [vmem:[#allocation37_spill] sm:$0xff] }
  0xd2   :  { %438 = vst [vmem:[#allocation2 + $0xa8] sm:$0xff] %v7896_v13  ;;  %v670_v18 = vmul.f32 %v7891_v15, %v9965_v9  ;;  %v618_v37 = vmax.f32 %v584_v35, 1e-16  ;;  %v7912_v50 = vpack.c.bf16 %v669_v47, %v668_v59  ;;  %v1225_v63 = vrot.slane %v1224_v34, 2  ;;  %v9970_v35 = vld [vmem:[#allocation36_spill] sm:$0xff] }
  0xd3   :  { %v671_v39 = vmul.f32 %v7891_v15, %v9967_v30  ;;  %v7916_v3 = vpop.eup %6680  ;;  %v1162_v33 = vrot.slane %v1161_v2, 4  ;;  %v1283_v25 = vunpack.c.h.bf16 %v7893_v60  ;;  %v7920_v27 = vpack.c.bf16 %v636_v52, %v635_v57 }
  0xd4   :  { %9966 = vst [vmem:[#allocation27_spill] sm:$0xff] %v7912_v50  ;;  %9968 = vst [vmem:[#allocation23_spill] sm:$0xff] %v7916_v3  ;;  %6688 = vrsqrt.f32 %v618_v37  ;;  %v229_v9 = vmul.f32 %v7916_v3, %v9969_v48  ;;  %v230_v59 = vmul.f32 %v7916_v3, %v9970_v35  ;;  %v1226_v47 = vmax.f32 %v1224_v34, %v1225_v63  ;;  %v9974_v34 = vld [vmem:[#allocation40_spill] sm:$0xff]  ;;  %v9975_v63 = vld [vmem:[#allocation41_spill] sm:$0xff] }
  0xd5   :  { %848 = vst [vmem:[#allocation3 + $0x8c] sm:$0xff] %v7912_v50  ;;  %v1163_v30 = vadd.f32 %v1162_v33, %v1161_v2  ;;  %v1448_v15 = vunpack.c.h.bf16 %v7912_v50  ;;  %v231_v53 = vmul.f32 %v7916_v3, %v9971_v58  ;;  %v232_v57 = vmul.f32 %v7916_v3, %v9972_v19  ;;  %828 = vst [vmem:[#allocation3 + $0x8] sm:$0xff] %v7920_v27 }
  0xd6   :  { %v7933_v52 = vpop.eup %6682  ;;  %v7935_v37 = vpack.c.bf16 %v230_v59, %v229_v9  ;;  %v1227_v48 = vrot.slane %v1226_v47, 1  ;;  %v7937_v35 = vpack.c.bf16 %v641_v17, %v640_v42  ;;  %v7939_v60 = vpack.c.bf16 %v671_v39, %v670_v18 }
  0xd7   :  { %9973 = vst [vmem:[#allocation24_spill] sm:$0xff] %v7933_v52  ;;  %v643_v2 = vmul.f32 %v7933_v52, %v9974_v34  ;;  %v644_v58 = vmul.f32 %v7933_v52, %v9975_v63  ;;  %v1164_v33 = vrot.slane %v1163_v30, 2  ;;  %v1509_v50 = vrot.slane %v1448_v15, 4  ;;  %v9979_v34 = vld [vmem:[#allocation42_spill] sm:$0xff] }
  0xd8   :  { %419 = vst [vmem:[#allocation2 + $0x28] sm:$0xff] %v7935_v37  ;;  %v880_v19 = vunpack.c.h.bf16 %v7935_v37  ;;  %v1313_v3 = vadd.f32 %v1283_v25, %v1278_v51  ;;  %v9976_v9 = vunpack.c.h.bf16 %v7766_v46  ;;  %v7949_v42 = vpack.c.bf16 %v232_v57, %v231_v53  ;;  %831 = vst [vmem:[#allocation3 + $0x1c] sm:$0xff] %v7937_v35  ;;  %v9981_v57 = vld [vmem:[#allocation43_spill] sm:$0xff]  ;;  %v9986_v46 = vld [vmem:[#allocation49_spill] sm:$0xff] }
  0xd9   :  { %849 = vst [vmem:[#allocation3 + $0x94] sm:$0xff] %v7939_v60  ;;  %v7953_v17 = vpack.c.bf16 %v644_v58, %v643_v2  ;;  %v1165_v18 = vadd.f32 %v1164_v33, %v1163_v30  ;;  %v1373_v39 = vmax.f32 %v1278_v51, %v1283_v25  ;;  %v645_v63 = vmul.f32 %v7933_v52, %v9979_v34  ;;  %v9982_v2 = vld [vmem:[#allocation45_spill] sm:$0xff]  ;;  %v9983_v51 = vld [vmem:[#allocation46_spill] sm:$0xff] }
  0xda   :  { %v1625_v59 = vmax.f32 %v1624_v56, %v9976_v9  ;;  %9977 = vst [vmem:[#allocation31_spill] sm:$0xff] %v7949_v42  ;;  %v7957_v40 = vpop.eup %6684  ;;  %v7959_v43 = vmax.f32 %v1226_v47, %v1227_v48  ;;  %v1510_v56 = vsel %vm897_vm0, %v7809_v8, %v1509_v50  ;;  %420 = vst [vmem:[#allocation2 + $0x30] sm:$0xff] %v7949_v42  ;;  %v9984_v8 = vld [vmem:[#allocation47_spill] sm:$0xff] }
  0xdb   :  { %9978 = vst [vmem:[#allocation28_spill] sm:$0xff] %v7953_v17  ;;  %9980 = vst [vmem:[#allocation29_spill] sm:$0xff] %v7957_v40  ;;  %v646_v9 = vmul.f32 %v7933_v52, %v9981_v57  ;;  %v673_v30 = vmul.f32 %v7957_v40, %v9982_v2  ;;  %v674_v25 = vmul.f32 %v7957_v40, %v9983_v51  ;;  %v1166_v58 = vrot.slane %v1165_v18, 1 }
  0xdc   :  { %v1626_v53 = vmax.f32 %v1625_v59, %v1448_v15  ;;  %833 = vst [vmem:[#allocation3 + $0x28] sm:$0xff] %v7953_v17  ;;  %v1288_v47 = vunpack.c.h.bf16 %v7953_v17  ;;  %v907_v48 = vadd.f32 %v7861_v62, %v880_v19  ;;  %v675_v15 = vmul.f32 %v7957_v40, %v9984_v8  ;;  %v9987_v17 = vld [vmem:[#allocation50_spill] sm:$0xff] }
  0xdd   :  { %v676_v33 = vmul.f32 %v7957_v40, %v7366_v24  ;;  %v7977_v59 = vpack.c.bf16 %v646_v9, %v645_v63  ;;  %v7979_v34 = vpop.eup %6686  ;;  %v7981_v57 = vpack.c.bf16 %v674_v25, %v673_v30  ;;  %v968_v2 = vmax.f32 %v7863_v26, %v880_v19 }
  0xde   :  { %9985 = vst [vmem:[#allocation32_spill] sm:$0xff] %v7979_v34  ;;  %v1564_v51 = vadd.f32 %v7877_v49, %v1510_v56  ;;  %v877_v52 = vunpack.c.h.bf16 %v7825_v38  ;;  %v234_v62 = vmul.f32 %v7979_v34, %v9986_v46  ;;  %v235_v8 = vmul.f32 %v7979_v34, %v9987_v17 }
  0xdf   :  { %v236_v24 = vmul.f32 %v7979_v34, %v9988_v61  ;;  %v237_v63 = vmul.f32 %v7979_v34, %v7393_v54  ;;  %834 = vst [vmem:[#allocation3 + $0x30] sm:$0xff] %v7977_v59  ;;  %851 = vst [vmem:[#allocation3 + $0xa0] sm:$0xff] %v7981_v57  ;;  %v1167_v26 = vadd.f32 %v1166_v58, %v1165_v18  ;;  %v1453_v19 = vunpack.c.h.bf16 %v7981_v57 }
  0xe0   :  { %v1314_v49 = vadd.f32 %v1313_v3, %v1288_v47  ;;  %v7997_v56 = vpack.c.bf16 %v676_v33, %v675_v15  ;;  %v7999_v46 = vpack.c.bf16 %v235_v8, %v234_v62  ;;  %v1374_v9 = vmax.f32 %v1373_v39, %v1288_v47 }
  0xe1   :  { %v8001_v17 = vpack.c.bf16 %v237_v63, %v236_v24  ;;  %v882_v61 = vunpack.c.h.bf16 %v7949_v42  ;;  %v8004_v30 = vpop.eup %6688  ;;  %v1519_v54 = vrot.slane %v1453_v19, 4  ;;  %v1627_v25 = vmax.f32 %v1626_v53, %v1453_v19  ;;  %v9991_v53 = vld [vmem:[#allocation53_spill] sm:$0xff] }
  0xe2   :  { %852 = vst [vmem:[#allocation3 + $0xa8] sm:$0xff] %v7997_v56  ;;  %v9989_v18 = vunpack.c.h.bf16 %v7815_v23  ;;  %422 = vst [vmem:[#allocation2 + $0x3c] sm:$0xff] %v7999_v46  ;;  %v648_v39 = vmul.f32 %v8004_v30, %v7404_v45  ;;  %v649_v47 = vmul.f32 %v8004_v30, %v7415_v36  ;;  %v885_v33 = vunpack.c.h.bf16 %v7999_v46 }
  0xe3   :  { %423 = vst [vmem:[#allocation2 + $0x44] sm:$0xff] %v8001_v17  ;;  %v650_v62 = vmul.f32 %v8004_v30, %v9991_v53  ;;  %v1520_v8 = vsel %vm897_vm0, %v1509_v50, %v1519_v54  ;;  %v1566_v24 = vsel %vm897_vm0, %v1519_v54, 0.0  ;;  %v651_v63 = vmul.f32 %v8004_v30, %v7421_v44 }
  0xe4   :  { %v928_v3 = vadd.f32 %v877_v52, %v9989_v18  ;;  %v9990_v58 = vmov %v9989_v18  ;;  %v8024_v19 = vpack.c.bf16 %v649_v47, %v648_v39  ;;  %v908_v45 = vadd.f32 %v907_v48, %v885_v33 }
  0xe5   :  { %v989_v15 = vmax.f32 %v9990_v58, %v877_v52  ;;  %v1628_v52 = vrot.slane %v1627_v25, 4  ;;  %v969_v18 = vmax.f32 %v968_v2, %v885_v33  ;;  %v1565_v36 = vadd.f32 %v1564_v51, %v1520_v8 }
  0xe6   :  { %v8026_v40 = vpack.c.bf16 %v651_v63, %v650_v62  ;;  %v887_v34 = vunpack.c.h.bf16 %v8001_v17  ;;  %v929_v42 = vadd.f32 %v928_v3, %v882_v61  ;;  %836 = vst [vmem:[#allocation3 + $0x3c] sm:$0xff] %v8024_v19  ;;  %v910_v50 = vadd.f32 %v7757_v11, %v908_v45 }
  0xe7   :  { %v1629_v58 = vmax.f32 %v1627_v25, %v1628_v52  ;;  %v971_v54 = vmax.f32 %v969_v18, %v7769_v55  ;;  %v1293_v53 = vunpack.c.h.bf16 %v8024_v19  ;;  %v1567_v44 = vadd.f32 %v1566_v24, %v1565_v36 }
  0xe8   :  { %v8033_v39 = vmul.f32 0.027777778, %v1167_v26  ;;  %837 = vst [vmem:[#allocation3 + $0x44] sm:$0xff] %v8026_v40  ;;  %v930_v2 = vadd.f32 %v929_v42, %v887_v34  ;;  %v990_v51 = vmax.f32 %v989_v15, %v882_v61  ;;  %v911_v25 = vrot.slane %v910_v50, 4 }
  0xe9   :  { %v1630_v48 = vrot.slane %v1629_v58, 2  ;;  %v972_v47 = vrot.slane %v971_v54, 4  ;;  %v1315_v33 = vadd.f32 %v1314_v49, %v1293_v53  ;;  %v1375_v3 = vmax.f32 %v1374_v9, %v1293_v53 }
  0xea   :  { %v1568_v62 = vrot.slane %v1567_v44, 4  ;;  %v932_v8 = vadd.f32 %v7829_v14, %v930_v2  ;;  %v991_v11 = vmax.f32 %v990_v51, %v887_v34  ;;  %v9992_v55 = vunpack.c.h.bf16 %v7834_v21 }
  0xeb   :  { %v912_v63 = vadd.f32 %v911_v25, %v910_v50  ;;  %v973_v24 = vmax.f32 %v971_v54, %v972_v47  ;;  %v1317_v26 = vadd.f32 %v7851_v22, %v1315_v33  ;;  %v1377_v45 = vmax.f32 %v1375_v3, %v7867_v41 }
  0xec   :  { %v1085_v52 = vrot.slane %v9992_v55, 4  ;;  %v1569_v18 = vadd.f32 %v1568_v62, %v1567_v44  ;;  %v1631_v42 = vmax.f32 %v1629_v58, %v1630_v48  ;;  %v933_v61 = vrot.slane %v932_v8, 4 }
  0xed   :  { %v993_v15 = vmax.f32 %v991_v11, %v7832_v16  ;;  %v913_v49 = vrot.slane %v912_v63, 2  ;;  %v974_v9 = vrot.slane %v973_v24, 2  ;;  %v1318_v36 = vrot.slane %v1317_v26, 4 }
  0xee   :  { %v1378_v53 = vrot.slane %v1377_v45, 4  ;;  %v1570_v14 = vrot.slane %v1569_v18, 2  ;;  %v934_v34 = vadd.f32 %v933_v61, %v932_v8  ;;  %v9993_v50 = vunpack.c.h.bf16 %v7706_v10 }
  0xef   :  { %v994_v2 = vrot.slane %v993_v15, 4  ;;  %v914_v51 = vadd.f32 %v913_v49, %v912_v63  ;;  %v975_v22 = vmax.f32 %v973_v24, %v974_v9  ;;  %v1319_v25 = vadd.f32 %v1318_v36, %v1317_v26 }
  0xf0   :  { %v1086_v54 = vrot.slane %v9993_v50, 4  ;;  %v1379_v41 = vmax.f32 %v1377_v45, %v1378_v53  ;;  %v1571_v44 = vadd.f32 %v1570_v14, %v1569_v18  ;;  %v1632_v58 = vrot.slane %v1631_v42, 1 }
  0xf1   :  { %v935_v48 = vrot.slane %v934_v34, 2  ;;  %v995_v16 = vmax.f32 %v993_v15, %v994_v2  ;;  %v915_v47 = vrot.slane %v914_v51, 1  ;;  %v1320_v33 = vrot.slane %v1319_v25, 2 }
  0xf2   :  { %v1380_v3 = vrot.slane %v1379_v41, 2  ;;  %v1049_v62 = vunpack.c.h.bf16 %v7896_v13  ;;  %v976_v8 = vrot.slane %v975_v22, 1  ;;  %v1572_v11 = vrot.slane %v1571_v44, 1 }
  0xf3   :  { %v936_v55 = vadd.f32 %v935_v48, %v934_v34  ;;  %v996_v61 = vrot.slane %v995_v16, 2  ;;  %v916_v50 = vadd.f32 %v915_v47, %v914_v51  ;;  %v1321_v63 = vadd.f32 %v1320_v33, %v1319_v25 }
  0xf4   :  { %v1381_v24 = vmax.f32 %v1379_v41, %v1380_v3  ;;  %v1087_v26 = vsel %vm897_vm0, %v1085_v52, %v1086_v54  ;;  %v1573_v45 = vadd.f32 %v1572_v11, %v1571_v44  ;;  %v1633_v18 = vmax.f32 %v1631_v42, %v1632_v58  ;;  %v8069_v11 = vld [vmem:[#allocation3 + $0x58] sm:$0xcc] }
  0xf5   :  { %v937_v15 = vrot.slane %v936_v55, 1  ;;  %v1098_v49 = vsel %vm897_vm0, %v1086_v54, %v7696_v6  ;;  %v952_v9 = vmul.f32 0.027777778, %v916_v50  ;;  %v1322_v36 = vrot.slane %v1321_v63, 1 }
  0xf6   :  { %v1382_v53 = vrot.slane %v1381_v24, 1  ;;  %v1117_v14 = vrot.slane %v1049_v62, 4  ;;  %v977_v34 = vmax.f32 %v975_v22, %v976_v8  ;;  %v8050_v2 = vmax.f32 %v995_v16, %v996_v61  ;;  %v8062_v16 = vld [vmem:[#allocation3 + $0x58] sm:$0x33] }
  0xf7   :  { %v1108_v52 = vsel %vm897_vm0, %v7696_v6, %v7741_v0  ;;  %v1179_v42 = vadd.f32 %v1098_v49, %v1087_v26  ;;  %v1323_v51 = vadd.f32 %v1322_v36, %v1321_v63  ;;  %v1608_v25 = vmul.f32 0.027777778, %v1573_v45 }
  0xf8   :  { %v8055_v41 = vadd.f32 %v937_v15, %v936_v55  ;;  %v1118_v54 = vsel %vm897_vm0, %v7741_v0, %v1117_v14  ;;  %v1383_v44 = vmax.f32 %v1381_v24, %v1382_v53  ;;  %v1669_v58 = vsel %vm1667_vm2, %v952_v9, %v8033_v39 }
  0xf9   :  { %v1180_v48 = vadd.f32 %v1179_v42, %v1108_v52  ;;  %v1182_v22 = vsel %vm897_vm0, %v1117_v14, 0.0  ;;  %v1358_v47 = vmul.f32 0.027777778, %v1323_v51  ;;  %v9994_v6 = vunpack.c.h.bf16 %v7834_v21 }
  0xfa   :  { %v1280_v3 = vunpack.c.h.bf16 %v7920_v27  ;;  %v1285_v8 = vunpack.c.h.bf16 %v7937_v35  ;;  %v9995_v55 = vunpack.c.h.bf16 %v7706_v10  ;;  %v1290_v61 = vunpack.c.h.bf16 %v7977_v59 }
  0xfb   :  { %v1240_v33 = vsel %vm1206_vm1, %v9994_v6, -inf  ;;  %v1181_v0 = vadd.f32 %v1180_v48, %v1118_v54  ;;  %v1295_v50 = vunpack.c.h.bf16 %v8026_v40  ;;  %v1675_v63 = vsel %vm1673_vm3, %v1669_v58, %v1358_v47 }
  0xfc   :  { %v1241_v39 = vmax.f32 %v1240_v33, %v9995_v55  ;;  %v1300_v24 = vunpack.c.h.bf16 %v8062_v16  ;;  %v1335_v26 = vadd.f32 %v1285_v8, %v1280_v3  ;;  %v1395_v45 = vmax.f32 %v1280_v3, %v1285_v8 }
  0xfd   :  { %v1681_v15 = vsel %vm1679_vm4, %v1675_v63, %v1608_v25  ;;  %v1183_v49 = vadd.f32 %v1182_v22, %v1181_v0  ;;  %v9996_v9 = vunpack.c.h.bf16 %v7650_v28  ;;  %v1435_v53 = vunpack.c.h.bf16 %v8069_v11 }
  0xfe   :  { %v1686_v10 = vsel %vm897_vm0, %v1681_v15, %v977_v34  ;;  %v1336_v14 = vadd.f32 %v1335_v26, %v1290_v61  ;;  %v1338_v52 = vsel %vm897_vm0, %v1300_v24, 0.0  ;;  %v1396_v42 = vmax.f32 %v1395_v45, %v1290_v61 }
  0xff   :  { %v1242_v36 = vmax.f32 %v1241_v39, %v9996_v9  ;;  %v1692_v51 = vsel %vm1690_vm5, %v1686_v10, %v7959_v43  ;;  %v1184_v54 = vrot.slane %v1183_v49, 4  ;;  %v9997_v58 = vunpack.c.h.bf16 %v7668_v31 }
 0x100   :  { %v1398_v25 = vsel %vm897_vm0, %v1300_v24, -inf  ;;  %v1698_v22 = vsel %vm1696_vm6, %v1692_v51, %v1383_v44  ;;  %v1337_v47 = vadd.f32 %v1336_v14, %v1295_v50  ;;  %v1397_v6 = vmax.f32 %v1396_v42, %v1295_v50 }
 0x101   :  { %v1243_v48 = vmax.f32 %v1242_v36, %v9997_v58  ;;  %v1440_v33 = vunpack.c.h.bf16 %v7729_v4  ;;  %v1704_v34 = vsel %vm1702_vm7, %v1698_v22, %v1633_v18  ;;  %v1185_v3 = vadd.f32 %v1184_v54, %v1183_v49 }
 0x102   :  { %v1445_v43 = vunpack.c.h.bf16 %v7793_v29  ;;  %1852 = vmatprep.mubr.f32.mxu0 %v1704_v34  ;;  %v1339_v0 = vadd.f32 %v1338_v52, %v1337_v47  ;;  %v1399_v31 = vmax.f32 %v1397_v6, %v1398_v25  ;;  %v1450_v55 = vunpack.c.h.bf16 %v7939_v60 }
 0x103   :  { %v1244_v8 = vmax.f32 %v1243_v48, %v1049_v62  ;;  %v1455_v39 = vunpack.c.h.bf16 %v7997_v56  ;;  %v1186_v44 = vrot.slane %v1185_v3, 2  ;;  %v1491_v50 = vrot.slane %v1435_v53, 4 }
 0x104   :  { %v1492_v63 = vrot.slane %v1440_v33, 4  ;;  %v1340_v4 = vrot.slane %v1339_v0, 4  ;;  %v1400_v24 = vrot.slane %v1399_v31, 4  ;;  %v1503_v18 = vrot.slane %v1445_v43, 4 }
 0x105   :  { %v1245_v61 = vrot.slane %v1244_v8, 4  ;;  %v1513_v26 = vrot.slane %v1450_v55, 4  ;;  %v1187_v45 = vadd.f32 %v1186_v44, %v1185_v3  ;;  %v1523_v29 = vrot.slane %v1455_v39, 4 }
 0x106   :  { %v1493_v62 = vsel %vm897_vm0, %v1491_v50, %v1492_v63  ;;  %v1341_v49 = vadd.f32 %v1340_v4, %v1339_v0  ;;  %v1401_v9 = vmax.f32 %v1399_v31, %v1400_v24  ;;  %v1504_v36 = vsel %vm897_vm0, %v1492_v63, %v1503_v18 }
 0x107   :  { %v1246_v15 = vmax.f32 %v1244_v8, %v1245_v61  ;;  %v1514_v10 = vsel %vm897_vm0, %v1503_v18, %v1513_v26  ;;  %v998_v14 = vrot.slane %v8050_v2, 1  ;;  %v1188_v52 = vrot.slane %v1187_v45, 1 }
 0x108   :  { %v1585_v51 = vadd.f32 %v1504_v36, %v1493_v62  ;;  %v1342_v54 = vrot.slane %v1341_v49, 2  ;;  %v1402_v58 = vrot.slane %v1401_v9, 2  ;;  %v1524_v48 = vsel %vm897_vm0, %v1513_v26, %v1523_v29 }
 0x109   :  { %v1247_v42 = vrot.slane %v1246_v15, 2  ;;  %v1645_v25 = vsel %vm1206_vm1, %v1435_v53, -inf  ;;  %v1189_v22 = vadd.f32 %v1188_v52, %v1187_v45  ;;  %v1588_v0 = vsel %vm897_vm0, %v1523_v29, 0.0 }
 0x10a   :  { %v1586_v6 = vadd.f32 %v1585_v51, %v1514_v10  ;;  %v1646_v34 = vmax.f32 %v1645_v25, %v1440_v33  ;;  %v1343_v3 = vadd.f32 %v1342_v54, %v1341_v49  ;;  %v8102_v8 = vmax.f32 %v1401_v9, %v1402_v58 }
 0x10b   :  { %v1248_v47 = vmax.f32 %v1246_v15, %v1247_v42  ;;  %v874_v31 = vunpack.c.l.bf16 %v7818_v1  ;;  %v954_v44 = vmul.f32 0.027777778, %v8055_v41  ;;  %v8108_v61 = vmax.f32 %v8050_v2, %v998_v14 }
 0x10c   :  { %v1587_v50 = vadd.f32 %v1586_v6, %v1524_v48  ;;  %v1647_v63 = vmax.f32 %v1646_v34, %v1445_v43  ;;  %v1204_v4 = vmul.f32 0.027777778, %v1189_v22  ;;  %v1344_v53 = vrot.slane %v1343_v3, 1  ;;  %v9998_v22 = vld [vmem:[#allocation59_spill] sm:$0xff] }
 0x10d   :  { %v869_v24 = vunpack.c.l.bf16 %v7789_v7  ;;  %v879_v33 = vunpack.c.l.bf16 %v7935_v37  ;;  %v1249_v18 = vrot.slane %v1248_v47, 1  ;;  %v1404_v26 = vrot.slane %v8102_v8, 1 }
 0x10e   :  { %v1589_v45 = vadd.f32 %v1588_v0, %v1587_v50  ;;  %v1648_v15 = vmax.f32 %v1647_v63, %v1450_v55  ;;  %v1345_v62 = vadd.f32 %v1344_v53, %v1343_v3  ;;  %v884_v1 = vunpack.c.l.bf16 %v7999_v46  ;;  %v10000_v53 = vld [vmem:[#allocation62_spill] sm:$0xff] }
 0x10f   :  { %v889_v41 = vunpack.c.l.bf16 %v7709_v12  ;;  %v894_v2 = vadd.f32 %v874_v31, %v869_v24  ;;  %v956_v43 = vmax.f32 %v869_v24, %v874_v31  ;;  %v1026_v9 = vunpack.c.l.bf16 %v7711_v20 }
 0x110   :  { %v1590_v29 = vrot.slane %v1589_v45, 4  ;;  %v1649_v49 = vmax.f32 %v1648_v15, %v1455_v39  ;;  %v1360_v36 = vmul.f32 0.027777778, %v1345_v62  ;;  %v1671_v7 = vsel %vm1667_vm2, %v954_v44, %v1204_v4 }
 0x111   :  { %v895_v37 = vadd.f32 %v894_v2, %v879_v33  ;;  %v898_v10 = vsel %vm897_vm0, %v889_v41, 0.0  ;;  %v957_v55 = vmax.f32 %v956_v43, %v879_v33  ;;  %v1031_v42 = vunpack.c.l.bf16 %v7688_v5 }
 0x112   :  { %v1591_v14 = vadd.f32 %v1590_v29, %v1589_v45  ;;  %v1650_v52 = vrot.slane %v1649_v49, 4  ;;  %v959_v12 = vsel %vm897_vm0, %v889_v41, -inf  ;;  %v1046_v51 = vunpack.c.l.bf16 %v7848_v32 }
 0x113   :  { %v896_v46 = vadd.f32 %v895_v37, %v884_v1  ;;  %v1076_v39 = vrot.slane %v1026_v9, 4  ;;  %v958_v20 = vmax.f32 %v957_v55, %v884_v1  ;;  %v1077_v48 = vrot.slane %v1031_v42, 4  ;;  %v10002_v37 = vld [vmem:[#allocation57_spill] sm:$0xff] }
 0x114   :  { %v1592_v54 = vrot.slane %v1591_v14, 2  ;;  %v1651_v58 = vmax.f32 %v1649_v49, %v1650_v52  ;;  %v9999_v6 = vunpack.c.l.bf16 %v9998_v22  ;;  %v1111_v3 = vrot.slane %v1046_v51, 4  ;;  %v10004_v52 = vld [vmem:[#allocation26_spill] sm:$0xff] }
 0x115   :  { %v899_v25 = vadd.f32 %v898_v10, %v896_v46  ;;  %v1207_v0 = vsel %vm1206_vm1, %v1026_v9, -inf  ;;  %v960_v5 = vmax.f32 %v958_v20, %v959_v12  ;;  %v1078_v50 = vsel %vm897_vm0, %v1076_v39, %v1077_v48 }
 0x116   :  { %v1101_v34 = vrot.slane %v9999_v6, 4  ;;  %v1593_v31 = vadd.f32 %v1592_v54, %v1591_v14  ;;  %v1652_v44 = vrot.slane %v1651_v58, 2  ;;  %v1250_v63 = vmax.f32 %v1248_v47, %v1249_v18  ;;  %v10001_v18 = vld [vmem:[#allocation22_spill] sm:$0xff]  ;;  %v10005_v54 = vld [vmem:[#allocation28_spill] sm:$0xff] }
 0x117   :  { %v1677_v32 = vsel %vm1673_vm3, %v1671_v7, %v1360_v36  ;;  %v900_v4 = vrot.slane %v899_v25, 4  ;;  %v1092_v24 = vsel %vm897_vm0, %v1077_v48, %v10000_v53  ;;  %v961_v15 = vrot.slane %v960_v5, 4 }
 0x118   :  { %v1594_v33 = vrot.slane %v1593_v31, 1  ;;  %v1653_v45 = vmax.f32 %v1651_v58, %v1652_v44  ;;  %v1146_v62 = vadd.f32 %v1092_v24, %v1078_v50  ;;  %v1102_v41 = vsel %vm897_vm0, %v10000_v53, %v1101_v34 }
 0x119   :  { %v901_v1 = vadd.f32 %v900_v4, %v899_v25  ;;  %v1112_v2 = vsel %vm897_vm0, %v1101_v34, %v1111_v3  ;;  %v1208_v29 = vmax.f32 %v1207_v0, %v1031_v42  ;;  %v962_v43 = vmax.f32 %v960_v5, %v961_v15  ;;  %v10007_v0 = vld [vmem:[#allocation70_spill] sm:$0xff] }
 0x11a   :  { %v1595_v49 = vadd.f32 %v1594_v33, %v1593_v31  ;;  %v1147_v47 = vadd.f32 %v1146_v62, %v1102_v41  ;;  %v1277_v9 = vunpack.c.l.bf16 %v10001_v18  ;;  %v1149_v7 = vsel %vm897_vm0, %v1111_v3, 0.0 }
 0x11b   :  { %v902_v36 = vrot.slane %v901_v1, 2  ;;  %v10003_v10 = vunpack.c.l.bf16 %v10002_v37  ;;  %v1282_v55 = vunpack.c.l.bf16 %v10004_v52  ;;  %v1654_v12 = vrot.slane %v1653_v45, 1  ;;  %v10010_v37 = vld [vmem:[#allocation67_spill] sm:$0xff] }
 0x11c   :  { %v1610_v46 = vmul.f32 0.027777778, %v1595_v49  ;;  %v1148_v39 = vadd.f32 %v1147_v47, %v1112_v2  ;;  %v1287_v58 = vunpack.c.l.bf16 %v10005_v54  ;;  %v963_v42 = vrot.slane %v962_v43, 2  ;;  %v10008_v47 = vld [vmem:[#allocation71_spill] sm:$0xff] }
 0x11d   :  { %v1209_v14 = vmax.f32 %v1208_v29, %v10003_v10  ;;  %v903_v20 = vadd.f32 %v902_v36, %v901_v1  ;;  %v10006_v48 = vmov %v9999_v6  ;;  %v1292_v6 = vunpack.c.l.bf16 %v8024_v19 }
 0x11e   :  { %v1683_v34 = vsel %vm1679_vm4, %v1677_v32, %v1610_v46  ;;  %v1150_v3 = vadd.f32 %v1149_v7, %v1148_v39  ;;  %v1297_v31 = vunpack.c.l.bf16 %v10007_v0  ;;  %v1302_v44 = vadd.f32 %v1282_v55, %v1277_v9 }
 0x11f   :  { %v1210_v25 = vmax.f32 %v1209_v14, %v10006_v48  ;;  %v1405_v5 = vmax.f32 %v8102_v8, %v1404_v26  ;;  %v1688_v50 = vsel %vm897_vm0, %v1683_v34, %v8108_v61  ;;  %v904_v4 = vrot.slane %v903_v20, 1  ;;  %v10011_v14 = vld [vmem:[#allocation27_spill] sm:$0xff] }
 0x120   :  { %v1655_v24 = vmax.f32 %v1653_v45, %v1654_v12  ;;  %v1694_v22 = vsel %vm1690_vm5, %v1688_v50, %v1250_v63  ;;  %v1151_v33 = vrot.slane %v1150_v3, 4  ;;  %v1303_v19 = vadd.f32 %v1302_v44, %v1287_v58  ;;  %v8163_v44 = vld [vmem:[#allocation2 + $0x94] sm:$0xff] }
 0x121   :  { %v1211_v53 = vmax.f32 %v1210_v25, %v1046_v51  ;;  %v1700_v32 = vsel %vm1696_vm6, %v1694_v22, %v1405_v5  ;;  %v8149_v15 = vmax.f32 %v962_v43, %v963_v42  ;;  %v1362_v1 = vmax.f32 %v1277_v9, %v1282_v55  ;;  %v10009_v43 = vld [vmem:[#allocation63_spill] sm:$0xff] }
 0x122   :  { %v1706_v41 = vsel %vm1702_vm7, %v1700_v32, %v1655_v24  ;;  %v1152_v2 = vadd.f32 %v1151_v33, %v1150_v3  ;;  %v1304_v8 = vadd.f32 %v1303_v19, %v1292_v6  ;;  %v1305_v26 = vsel %vm897_vm0, %v1297_v31, 0.0 }
 0x123   :  { %v1212_v62 = vrot.slane %v1211_v53, 4  ;;  %1922 = vmatprep.mubr.f32.mxu1 %v1706_v41  ;;  %v905_v61 = vadd.f32 %v904_v4, %v903_v20  ;;  %v1363_v45 = vmax.f32 %v1362_v1, %v1287_v58  ;;  %v1365_v63 = vsel %vm897_vm0, %v1297_v31, -inf }
 0x124   :  { %v1153_v29 = vrot.slane %v1152_v2, 2  ;;  %v1306_v49 = vadd.f32 %v1305_v26, %v1304_v8  ;;  %v1432_v18 = vunpack.c.l.bf16 %v10008_v47  ;;  %v1437_v36 = vunpack.c.l.bf16 %v10009_v43 }
 0x125   :  { %v1213_v51 = vmax.f32 %v1211_v53, %v1212_v62  ;;  %v1364_v9 = vmax.f32 %v1363_v45, %v1292_v6  ;;  %v1442_v10 = vunpack.c.l.bf16 %v10010_v37  ;;  %v1447_v52 = vunpack.c.l.bf16 %v10011_v14 }
 0x126   :  { %v1154_v55 = vadd.f32 %v1153_v29, %v1152_v2  ;;  %v1307_v46 = vrot.slane %v1306_v49, 4  ;;  %v1452_v12 = vunpack.c.l.bf16 %v7981_v57  ;;  %v1482_v39 = vrot.slane %v1432_v18, 4  ;;  %v10012_v29 = vld [vmem:[#allocation31_spill] sm:$0xff] }
 0x127   :  { %v1214_v7 = vrot.slane %v1213_v51, 2  ;;  %v1366_v58 = vmax.f32 %v1364_v9, %v1365_v63  ;;  %v1483_v20 = vrot.slane %v1437_v36, 4  ;;  %v1497_v42 = vrot.slane %v1442_v10, 4  ;;  %v10013_v9 = vld [vmem:[#allocation68_spill] sm:$0xff] }
 0x128   :  { %v1155_v48 = vrot.slane %v1154_v55, 1  ;;  %v1308_v25 = vadd.f32 %v1307_v46, %v1306_v49  ;;  %v1507_v34 = vrot.slane %v1447_v52, 4  ;;  %v1517_v3 = vrot.slane %v1452_v12, 4 }
 0x129   :  { %v8159_v54 = vmax.f32 %v1213_v51, %v1214_v7  ;;  %v965_v6 = vrot.slane %v8149_v15, 1  ;;  %v1367_v0 = vrot.slane %v1366_v58, 4  ;;  %v1484_v31 = vsel %vm897_vm0, %v1482_v39, %v1483_v20 }
 0x12a   :  { %v1043_v5 = vunpack.c.l.bf16 %v8163_v44  ;;  %v1156_v57 = vadd.f32 %v1155_v48, %v1154_v55  ;;  %v1309_v50 = vrot.slane %v1308_v25, 2  ;;  %v1498_v4 = vsel %vm897_vm0, %v1483_v20, %v1497_v42 }
 0x12b   :  { %v1508_v53 = vsel %vm897_vm0, %v1497_v42, %v1507_v34  ;;  %v951_v24 = vmul.f32 0.027777778, %v905_v61  ;;  %v1216_v22 = vrot.slane %v8159_v54, 1  ;;  %v1368_v33 = vmax.f32 %v1366_v58, %v1367_v0 }
 0x12c   :  { %v1552_v19 = vadd.f32 %v1498_v4, %v1484_v31  ;;  %v1201_v32 = vmul.f32 0.027777778, %v1156_v57  ;;  %v1310_v62 = vadd.f32 %v1309_v50, %v1308_v25  ;;  %v1518_v1 = vsel %vm897_vm0, %v1507_v34, %v1517_v3 }
 0x12d   :  { %v1612_v41 = vsel %vm1206_vm1, %v1432_v18, -inf  ;;  %v1369_v2 = vrot.slane %v1368_v33, 2  ;;  %v876_v51 = vunpack.c.l.bf16 %v7825_v38  ;;  %v1555_v63 = vsel %vm897_vm0, %v1517_v3, 0.0  ;;  %v6783_v3 = vld [vmem:[#allocation2 + $0x6c] sm:$0xff] }
 0x12e   :  { %v1553_v8 = vadd.f32 %v1552_v19, %v1508_v53  ;;  %v1613_v26 = vmax.f32 %v1612_v41, %v1437_v36  ;;  %v1311_v45 = vrot.slane %v1310_v62, 1  ;;  %v871_v61 = vunpack.c.l.bf16 %v7815_v23 }
 0x12f   :  { %v881_v49 = vunpack.c.l.bf16 %v10012_v29  ;;  %v1668_v7 = vsel %vm1667_vm2, %v951_v24, %v1201_v32  ;;  %v891_v37 = vunpack.c.l.bf16 %v10013_v9  ;;  %v886_v18 = vunpack.c.l.bf16 %v8001_v17 }
 0x130   :  { %v1554_v47 = vadd.f32 %v1553_v8, %v1518_v1  ;;  %v1614_v43 = vmax.f32 %v1613_v26, %v1442_v10  ;;  %v1312_v14 = vadd.f32 %v1311_v45, %v1310_v62  ;;  %v917_v55 = vadd.f32 %v876_v51, %v871_v61 }
 0x131   :  { %v978_v36 = vmax.f32 %v871_v61, %v876_v51  ;;  %v1370_v46 = vmax.f32 %v1368_v33, %v1369_v2  ;;  %v1028_v58 = vunpack.c.l.bf16 %v7834_v21  ;;  %v920_v42 = vsel %vm897_vm0, %v891_v37, 0.0 }
 0x132   :  { %v1556_v38 = vadd.f32 %v1555_v63, %v1554_v47  ;;  %v1615_v39 = vmax.f32 %v1614_v43, %v1447_v52  ;;  %v1357_v20 = vmul.f32 0.027777778, %v1312_v14  ;;  %v918_v23 = vadd.f32 %v917_v55, %v881_v49 }
 0x133   :  { %v979_v48 = vmax.f32 %v978_v36, %v881_v49  ;;  %v981_v34 = vsel %vm897_vm0, %v891_v37, -inf  ;;  %v1033_v0 = vunpack.c.l.bf16 %v6783_v3  ;;  %v1048_v50 = vunpack.c.l.bf16 %v7896_v13 }
 0x134   :  { %v1557_v10 = vrot.slane %v1556_v38, 4  ;;  %v1616_v25 = vmax.f32 %v1615_v39, %v1452_v12  ;;  %v1674_v17 = vsel %vm1673_vm3, %v1668_v7, %v1357_v20  ;;  %v919_v31 = vadd.f32 %v918_v23, %v886_v18 }
 0x135   :  { %v980_v57 = vmax.f32 %v979_v48, %v886_v18  ;;  %v1082_v21 = vrot.slane %v1028_v58, 4  ;;  %v1083_v53 = vrot.slane %v1033_v0, 4  ;;  %v10014_v19 = vunpack.c.l.bf16 %v7650_v28 }
 0x136   :  { %v1558_v52 = vadd.f32 %v1557_v10, %v1556_v38  ;;  %v1617_v4 = vrot.slane %v1616_v25, 4  ;;  %v921_v24 = vadd.f32 %v920_v42, %v919_v31  ;;  %v1105_v12 = vrot.slane %v1043_v5, 4 }
 0x137   :  { %v982_v33 = vmax.f32 %v980_v57, %v981_v34  ;;  %v1095_v32 = vrot.slane %v10014_v19, 4  ;;  %v1084_v41 = vsel %vm897_vm0, %v1082_v21, %v1083_v53  ;;  %v1115_v2 = vrot.slane %v1048_v50, 4 }
 0x138   :  { %v1559_v62 = vrot.slane %v1558_v52, 2  ;;  %v1618_v1 = vmax.f32 %v1616_v25, %v1617_v4  ;;  %v1371_v8 = vrot.slane %v1370_v46, 1  ;;  %v922_v26 = vrot.slane %v921_v24, 4 }
 0x139   :  { %v983_v13 = vrot.slane %v982_v33, 4  ;;  %v1096_v51 = vsel %vm897_vm0, %v1083_v53, %v1095_v32  ;;  %v1106_v61 = vsel %vm897_vm0, %v1095_v32, %v1105_v12  ;;  %v1116_v43 = vsel %vm897_vm0, %v1105_v12, %v1115_v2 }
 0x13a   :  { %v1560_v45 = vadd.f32 %v1559_v62, %v1558_v52  ;;  %v1619_v63 = vrot.slane %v1618_v1, 2  ;;  %v1168_v29 = vadd.f32 %v1096_v51, %v1084_v41  ;;  %v923_v49 = vadd.f32 %v922_v26, %v921_v24  ;;  %v6784_v26 = vld [vmem:[#allocation3 + $0x6c] sm:$0xff]  ;;  %v1786_v51 = vld [vmem:[%s9747_s2 + $0x270] sm:$0xff] }
 0x13b   :  { %v984_v47 = vmax.f32 %v982_v33, %v983_v13  ;;  %v1229_v7 = vsel %vm1206_vm1, %v1028_v58, -inf  ;;  %v1171_v36 = vsel %vm897_vm0, %v1115_v2, 0.0  ;;  %v1279_v38 = vunpack.c.l.bf16 %v7920_v27 }
 0x13c   :  { %v1561_v9 = vrot.slane %v1560_v45, 1  ;;  %v1620_v37 = vmax.f32 %v1618_v1, %v1619_v63  ;;  %v1169_v14 = vadd.f32 %v1168_v29, %v1106_v61  ;;  %v1230_v18 = vmax.f32 %v1229_v7, %v1033_v0  ;;  %v6785_v61 = vld [vmem:[#allocation3 + $0x80] sm:$0xff] }
 0x13d   :  { %v924_v55 = vrot.slane %v923_v49, 2  ;;  %v1284_v39 = vunpack.c.l.bf16 %v7937_v35  ;;  %v985_v23 = vrot.slane %v984_v47, 2  ;;  %v10015_v48 = vmov %v10014_v19 }
 0x13e   :  { %v1562_v20 = vadd.f32 %v1561_v9, %v1560_v45  ;;  %v1170_v42 = vadd.f32 %v1169_v14, %v1116_v43  ;;  %v1231_v10 = vmax.f32 %v1230_v18, %v10015_v48  ;;  %v966_v58 = vmax.f32 %v8149_v15, %v965_v6 }
 0x13f   :  { %v1217_v25 = vmax.f32 %v8159_v54, %v1216_v22  ;;  %v1621_v34 = vrot.slane %v1620_v37, 1  ;;  %v1289_v3 = vunpack.c.l.bf16 %v7977_v59  ;;  %v925_v0 = vadd.f32 %v924_v55, %v923_v49 }
 0x140   :  { %v1607_v27 = vmul.f32 0.027777778, %v1562_v20  ;;  %v1172_v35 = vadd.f32 %v1171_v36, %v1170_v42  ;;  %v1232_v31 = vmax.f32 %v1231_v10, %v1043_v5  ;;  %v1372_v57 = vmax.f32 %v1370_v46, %v1371_v8  ;;  %v1784_v42 = vld [vmem:[%s9747_s2 + $0x260] sm:$0xff] }
 0x141   :  { %v1294_v28 = vunpack.c.l.bf16 %v8026_v40  ;;  %v1299_v52 = vunpack.c.l.bf16 %v8062_v16  ;;  %v1324_v4 = vadd.f32 %v1284_v39, %v1279_v38  ;;  %v8209_v6 = vmax.f32 %v984_v47, %v985_v23 }
 0x142   :  { %v1680_v15 = vsel %vm1679_vm4, %v1674_v17, %v1607_v27  ;;  %v1173_v54 = vrot.slane %v1172_v35, 4  ;;  %v1233_v22 = vmax.f32 %v1232_v31, %v1048_v50  ;;  %v1622_v21 = vmax.f32 %v1620_v37, %v1621_v34  ;;  %v1787_v50 = vld [vmem:[%s9747_s2 + $0x278] sm:$0xff] }
 0x143   :  { %v1685_v59 = vsel %vm897_vm0, %v1680_v15, %v966_v58  ;;  %v1325_v53 = vadd.f32 %v1324_v4, %v1289_v3  ;;  %v1384_v24 = vmax.f32 %v1279_v38, %v1284_v39  ;;  %v926_v5 = vrot.slane %v925_v0, 1  ;;  %v1782_v15 = vld [vmem:[%s9747_s2 + $0x250] sm:$0xff] }
 0x144   :  { %v1691_v44 = vsel %vm1690_vm5, %v1685_v59, %v1217_v25  ;;  %v1174_v46 = vadd.f32 %v1173_v54, %v1172_v35  ;;  %v1234_v33 = vrot.slane %v1233_v22, 4  ;;  %v1327_v19 = vsel %vm897_vm0, %v1299_v52, 0.0 }
 0x145   :  { %v1697_v40 = vsel %vm1696_vm6, %v1691_v44, %v1372_v57  ;;  %v1326_v16 = vadd.f32 %v1325_v53, %v1294_v28  ;;  %v1385_v17 = vmax.f32 %v1384_v24, %v1289_v3  ;;  %v1387_v1 = vsel %vm897_vm0, %v1299_v52, -inf }
 0x146   :  { %v1703_v32 = vsel %vm1702_vm7, %v1697_v40, %v1622_v21  ;;  %v1175_v12 = vrot.slane %v1174_v46, 2  ;;  %v1235_v62 = vmax.f32 %v1233_v22, %v1234_v33  ;;  %v1434_v8 = vunpack.c.l.bf16 %v8069_v11  ;;  %v1785_v11 = vld [vmem:[%s9747_s2 + $0x268] sm:$0xff]  ;;  %v10018_v33 = vld [vmem:[#allocation66_spill] sm:$0xff] }
 0x147   :  { %1853 = vmatmul.mubr.f32.vlgmr.msra.gmra.mxu0 %v1703_v32  ;;  %v1328_v41 = vadd.f32 %v1327_v19, %v1326_v16  ;;  %v1386_v2 = vmax.f32 %v1385_v17, %v1294_v28  ;;  %v1439_v13 = vunpack.c.l.bf16 %v6784_v26  ;;  %v1444_v29 = vunpack.c.l.bf16 %v6785_v61  ;;  %v10019_v17 = vld [vmem:[#allocation18_spill] sm:$0xff]  ;;  %v10024_v26 = vld [vmem:[#allocation32_spill] sm:$0xff]  ;;  %v10027_v61 = vld [vmem:[#allocation13_spill] sm:$0xff] }
 0x148   :  { %v1176_v45 = vadd.f32 %v1175_v12, %v1174_v46  ;;  %v1236_v63 = vrot.slane %v1235_v62, 2  ;;  %v1449_v49 = vunpack.c.l.bf16 %v7939_v60  ;;  %6364 = vmatpush3.msra.mxu0 %v1787_v50  ;;  %v1454_v7 = vunpack.c.l.bf16 %v7997_v56  ;;  %v10017_v46 = vld [vmem:[#allocation17_spill] sm:$0xff]  ;;  %v10021_v12 = vld [vmem:[#allocation39_spill] sm:$0xff] }
 0x149   :  { %v1329_v47 = vrot.slane %v1328_v41, 4  ;;  %v1388_v43 = vmax.f32 %v1386_v2, %v1387_v1  ;;  %v1488_v9 = vrot.slane %v1434_v8, 4  ;;  %v10016_v37 = vmov 0.0   ;;  %v10020_v50 = vld [vmem:[#allocation69_spill] sm:$0xff]  ;;  %v1780_v2 = vld [vmem:[%s9747_s2 + $0x240] sm:$0xff] }
 0x14a   :  { %6365 = vmatprep.subr.mxu0 %v10016_v37  ;;  %v927_v14 = vadd.f32 %v926_v5, %v925_v0  ;;  %v1177_v18 = vrot.slane %v1176_v45, 1  ;;  %v1489_v55 = vrot.slane %v1439_v13, 4  ;;  %v1501_v36 = vrot.slane %v1444_v29, 4  ;;  %v1783_v0 = vld [vmem:[%s9747_s2 + $0x258] sm:$0xff]  ;;  %6395 = vmatprep.mubr.msk.f32.mxu0 %vm6882_vm8, %v10016_v37  ;;  %v1781_v5 = vld [vmem:[%s9747_s2 + $0x248] sm:$0xff]  ;;  %v10033_v60 = vld [vmem:[#allocation21_spill] sm:$0xff] }
 0x14b   :  { %6366 = vmatpush3.msra.mxu0 %v1786_v51  ;;  %v1330_v38 = vadd.f32 %v1329_v47, %v1328_v41  ;;  %v1389_v39 = vrot.slane %v1388_v43, 4  ;;  %v1511_v20 = vrot.slane %v1449_v49, 4  ;;  %v1521_v23 = vrot.slane %v1454_v7, 4  ;;  %v10025_v51 = vld [vmem:[#allocation11_spill] sm:$0xff] }
 0x14c   :  { %6367 = vmatprep.subr.mxu0 %v10016_v37  ;;  %v1178_v48 = vadd.f32 %v1177_v18, %v1176_v45  ;;  %v8238_v10 = vmax.f32 %v1235_v62, %v1236_v63  ;;  %v1490_v58 = vsel %vm897_vm0, %v1488_v9, %v1489_v55  ;;  %v1502_v3 = vsel %vm897_vm0, %v1489_v55, %v1501_v36  ;;  %v10022_v62 = vld [vmem:[#allocation23_spill] sm:$0xff]  ;;  %v10026_v45 = vld [vmem:[#allocation56_spill] sm:$0xff] }
 0x14d   :  { %6368 = vmatpush3.msra.mxu0 %v1785_v11  ;;  %v1331_v25 = vrot.slane %v1330_v38, 2  ;;  %v1390_v34 = vmax.f32 %v1388_v43, %v1389_v39  ;;  %v1512_v27 = vsel %vm897_vm0, %v1501_v36, %v1511_v20  ;;  %v953_v35 = vmul.f32 0.027777778, %v927_v14  ;;  %v10029_v11 = vld [vmem:[#allocation10_spill] sm:$0xff]  ;;  %v10030_v14 = vld [vmem:[#allocation55_spill] sm:$0xff]  ;;  %v10031_v55 = vld [vmem:[#allocation12_spill] sm:$0xff] }
 0x14e   :  { %6369 = vmatprep.subr.mxu0 %v10016_v37  ;;  %v987_v31 = vrot.slane %v8209_v6, 1  ;;  %v1574_v57 = vadd.f32 %v1502_v3, %v1490_v58  ;;  %v1522_v52 = vsel %vm897_vm0, %v1511_v20, %v1521_v23  ;;  %v1634_v4 = vsel %vm1206_vm1, %v1434_v8, -inf  ;;  %v10023_v8 = vld [vmem:[#allocation52_spill] sm:$0xff]  ;;  %v10032_v36 = vld [vmem:[#allocation58_spill] sm:$0xff] }
 0x14f   :  { %6370 = vmatpush3.msra.mxu0 %v1784_v42  ;;  %v1332_v28 = vadd.f32 %v1331_v25, %v1330_v38  ;;  %v1203_v54 = vmul.f32 0.027777778, %v1178_v48  ;;  %v1238_v22 = vrot.slane %v8238_v10, 1  ;;  %v1635_v59 = vmax.f32 %v1634_v4, %v1439_v13 }
 0x150   :  { %6371 = vmatprep.subr.mxu0 %v10016_v37  ;;  %v1575_v21 = vadd.f32 %v1574_v57, %v1512_v27  ;;  %v1391_v24 = vrot.slane %v1390_v34, 2  ;;  %v1577_v44 = vsel %vm897_vm0, %v1521_v23, 0.0  ;;  %v223_v40 = vmul.f32 %v10018_v33, %v10017_v46  ;;  %v1779_v23 = vld [vmem:[%s9747_s2 + $0x238] sm:$0xff]  ;;  %v10039_v46 = vld [vmem:[#allocation44_spill] sm:$0xff] }
 0x151   :  { %6372 = vmatpush3.msra.mxu0 %v1783_v0  ;;  %v1333_v53 = vrot.slane %v1332_v28, 1  ;;  %v1636_v19 = vmax.f32 %v1635_v59, %v1444_v29  ;;  %v228_v32 = vmul.f32 %v10020_v50, %v10019_v17  ;;  %v233_v1 = vmul.f32 %v10022_v62, %v10021_v12  ;;  %v10028_v29 = vld [vmem:[#allocation60_spill] sm:$0xff]  ;;  %v1778_v0 = vld [vmem:[%s9747_s2 + $0x230] sm:$0xff]  ;;  %v10041_v17 = vld [vmem:[#allocation54_spill] sm:$0xff] }
 0x152   :  { %6373 = vmatprep.subr.mxu0 %v10016_v37  ;;  %v1576_v16 = vadd.f32 %v1575_v21, %v1522_v52  ;;  %v238_v13 = vmul.f32 %v10024_v26, %v10023_v8  ;;  %v243_v63 = vmul.f32 %v10026_v45, %v10025_v51  ;;  %v248_v47 = vmul.f32 %v10028_v29, %v10027_v61  ;;  %v10035_v21 = vld [vmem:[#allocation25_spill] sm:$0xff]  ;;  %v10040_v33 = vld [vmem:[#allocation24_spill] sm:$0xff]  ;;  %v10048_v45 = vld [vmem:[#allocation34_spill] sm:$0xff] }
 0x153   :  { %6374 = vmatpush3.msra.mxu0 %v1782_v15  ;;  %v1334_v41 = vadd.f32 %v1333_v53, %v1332_v28  ;;  %v1637_v9 = vmax.f32 %v1636_v19, %v1449_v49  ;;  %v253_v18 = vmul.f32 %v10030_v14, %v10029_v11  ;;  %v258_v38 = vmul.f32 %v10032_v36, %v10031_v55  ;;  %v10034_v49 = vld [vmem:[#allocation72_spill] sm:$0xff]  ;;  %v10036_v59 = vld [vmem:[#allocation73_spill] sm:$0xff] }
 0x154   :  { %6375 = vmatprep.subr.mxu0 %v10016_v37  ;;  %v1578_v43 = vadd.f32 %v1577_v44, %v1576_v16  ;;  %v8284_v39 = vmax.f32 %v1390_v34, %v1391_v24  ;;  %v8287_v20 = vsel %vm1667_vm2, %v953_v35, %v1203_v54  ;;  %v263_v42 = vmul.f32 %v10034_v49, %v10033_v60  ;;  %v1777_v15 = vld [vmem:[%s9747_s2 + $0x228] sm:$0xff]  ;;  %v10037_v24 = vld [vmem:[#allocation30_spill] sm:$0xff]  ;;  %v10038_v44 = vld [vmem:[#allocation19_spill] sm:$0xff] }
 0x155   :  { %6376 = vmatpush3.msra.mxu0 %v1781_v5  ;;  %v6163_v48 = vpack.c.bf16 %v223_v40, %v223_v40  ;;  %v1638_v25 = vmax.f32 %v1637_v9, %v1454_v7  ;;  %v6166_v34 = vpack.c.bf16 %v228_v32, %v228_v32  ;;  %v6169_v3 = vpack.c.bf16 %v233_v1, %v233_v1  ;;  %v10042_v32 = vld [vmem:[#allocation15_spill] sm:$0xff]  ;;  %v10043_v12 = vld [vmem:[#allocation64_spill] sm:$0xff]  ;;  %v10051_v29 = vld [vmem:[#allocation29_spill] sm:$0xff] }
 0x156   :  { %6377 = vmatprep.subr.mxu0 %v10016_v37  ;;  %v1579_v58 = vrot.slane %v1578_v43, 4  ;;  %v8297_v27 = vmul.f32 0.027777778, %v1334_v41  ;;  %v6172_v35 = vpack.c.bf16 %v238_v13, %v238_v13  ;;  %v6175_v57 = vpack.c.bf16 %v243_v63, %v243_v63  ;;  %v1776_v1 = vld [vmem:[%s9747_s2 + $0x220] sm:$0xff]  ;;  %v10044_v41 = vld [vmem:[#allocation14_spill] sm:$0xff]  ;;  %v10046_v26 = vld [vmem:[#allocation16_spill] sm:$0xff] }
 0x157   :  { %6378 = vmatpush3.msra.mxu0 %v1780_v2  ;;  %v6178_v28 = vpack.c.bf16 %v248_v47, %v248_v47  ;;  %415 = vst [vmem:[#allocation2 + $0x10] sm:$0xf] %v6163_v48  ;;  %v1639_v4 = vrot.slane %v1638_v25, 4  ;;  %v6181_v56 = vpack.c.bf16 %v253_v18, %v253_v18  ;;  %v6184_v7 = vpack.c.bf16 %v258_v38, %v258_v38  ;;  %v10045_v2 = vld [vmem:[#allocation61_spill] sm:$0xff]  ;;  %v10049_v63 = vld [vmem:[#allocation20_spill] sm:$0xff]  ;;  %v1775_v18 = vld [vmem:[%s9747_s2 + $0x218] sm:$0xff] }
 0x158   :  { %6379 = vmatprep.subr.mxu0 %v10016_v37  ;;  %v1580_v52 = vadd.f32 %v1579_v58, %v1578_v43  ;;  %418 = vst [vmem:[#allocation2 + $0x24] sm:$0xf] %v6166_v34  ;;  %421 = vst [vmem:[#allocation2 + $0x38] sm:$0xf] %v6169_v3  ;;  %v6187_v54 = vpack.c.bf16 %v263_v42, %v263_v42  ;;  %v637_v53 = vmul.f32 %v10036_v59, %v10035_v21  ;;  %v10047_v13 = vld [vmem:[#allocation65_spill] sm:$0xff] }
 0x159   :  { %6380 = vmatpush3.msra.mxu0 %v1779_v23  ;;  %424 = vst [vmem:[#allocation2 + $0x4c] sm:$0xf] %v6172_v35  ;;  %427 = vst [vmem:[#allocation2 + $0x60] sm:$0xf] %v6175_v57  ;;  %v642_v5 = vmul.f32 %v10038_v44, %v10037_v24  ;;  %v647_v40 = vmul.f32 %v10040_v33, %v10039_v46  ;;  %v1640_v19 = vmax.f32 %v1638_v25, %v1639_v4  ;;  %v1774_v25 = vld [vmem:[%s9747_s2 + $0x210] sm:$0xff]  ;;  %v1773_v57 = vld [vmem:[%s9747_s2 + $0x208] sm:$0xff] }
 0x15a   :  { %6381 = vmatprep.subr.mxu0 %v10016_v37  ;;  %430 = vst [vmem:[#allocation2 + $0x74] sm:$0xf] %v6178_v28  ;;  %v1581_v16 = vrot.slane %v1580_v52, 2  ;;  %433 = vst [vmem:[#allocation2 + $0x88] sm:$0xf] %v6181_v56  ;;  %v652_v50 = vmul.f32 %v8004_v30, %v10041_v17  ;;  %v657_v62 = vmul.f32 %v10043_v12, %v10042_v32  ;;  %v10050_v30 = vld [vmem:[#allocation48_spill] sm:$0xff] }
 0x15b   :  { %6382 = vmatpush3.msra.mxu0 %v1778_v0  ;;  %436 = vst [vmem:[#allocation2 + $0x9c] sm:$0xf] %v6184_v7  ;;  %439 = vst [vmem:[#allocation2 + $0xb0] sm:$0xf] %v6187_v54  ;;  %v662_v8 = vmul.f32 %v10045_v2, %v10044_v41  ;;  %v667_v51 = vmul.f32 %v10047_v13, %v10046_v26  ;;  %v672_v61 = vmul.f32 %v10049_v63, %v10048_v45 }
 0x15c   :  { %6383 = vmatprep.subr.mxu0 %v10016_v37  ;;  %v677_v47 = vmul.f32 %v10051_v29, %v10050_v30  ;;  %v1582_v43 = vadd.f32 %v1581_v16, %v1580_v52  ;;  %v1641_v9 = vrot.slane %v1640_v19, 2  ;;  %v6190_v11 = vpack.c.bf16 %v637_v53, %v637_v53 }
 0x15d   :  { %6384 = vmatpush3.msra.mxu0 %v1777_v15  ;;  %v6193_v14 = vpack.c.bf16 %v642_v5, %v642_v5  ;;  %v6196_v55 = vpack.c.bf16 %v647_v40, %v647_v40  ;;  %v6199_v36 = vpack.c.bf16 %v652_v50, %v652_v50  ;;  %v6202_v38 = vpack.c.bf16 %v657_v62, %v657_v62  ;;  %v1772_v40 = vld [vmem:[%s9747_s2 + $0x200] sm:$0xff] }
 0x15e   :  { %6385 = vmatprep.subr.mxu0 %v10016_v37  ;;  %v6205_v23 = vpack.c.bf16 %v662_v8, %v662_v8  ;;  %v1583_v60 = vrot.slane %v1582_v43, 1  ;;  %v1642_v49 = vmax.f32 %v1640_v19, %v1641_v9  ;;  %v6208_v42 = vpack.c.bf16 %v667_v51, %v667_v51  ;;  %829 = vst [vmem:[#allocation3 + $0x10] sm:$0xf] %v6190_v11 }
 0x15f   :  { %6386 = vmatpush3.msra.mxu0 %v1776_v1  ;;  %v6211_v48 = vpack.c.bf16 %v672_v61, %v672_v61  ;;  %832 = vst [vmem:[#allocation3 + $0x24] sm:$0xf] %v6193_v14  ;;  %v1393_v58 = vrot.slane %v8284_v39, 1  ;;  %v6214_v34 = vpack.c.bf16 %v677_v47, %v677_v47  ;;  %835 = vst [vmem:[#allocation3 + $0x38] sm:$0xf] %v6196_v55 }
 0x160   :  { %6387 = vmatprep.subr.mxu0 %v10016_v37  ;;  %838 = vst [vmem:[#allocation3 + $0x4c] sm:$0xf] %v6199_v36  ;;  %841 = vst [vmem:[#allocation3 + $0x60] sm:$0xf] %v6202_v38  ;;  %v8338_v3 = vld [vmem:[#allocation2 + $0x10] ss:$20 sps:$4 sm:$0xff]   ;;  %v1584_v0 = vadd.f32 %v1583_v60, %v1582_v43  ;;  %v1676_v7 = vsel %vm1673_vm3, %v8287_v20, %v8297_v27  ;;  %v988_v24 = vmax.f32 %v8209_v6, %v987_v31 }
 0x161   :  { %844 = vst [vmem:[#allocation3 + $0x74] sm:$0xf] %v6205_v23  ;;  %v1643_v35 = vrot.slane %v1642_v49, 1  ;;  %6388 = vmatpush3.msra.mxu0 %v1775_v18  ;;  %847 = vst [vmem:[#allocation3 + $0x88] sm:$0xf] %v6208_v42  ;;  %v873_v4 = vunpack.c.l.bf16 %v8338_v3  ;;  %v878_v56 = vunpack.c.h.bf16 %v8338_v3  ;;  %v1239_v20 = vmax.f32 %v8238_v10, %v1238_v22 }
 0x162   :  { %850 = vst [vmem:[#allocation3 + $0x9c] sm:$0xf] %v6211_v48  ;;  %v8343_v28 = vld [vmem:[#allocation2 + $0x38] ss:$20 sps:$4 sm:$0xff]   ;;  %v8345_v52 = vld [vmem:[#allocation2 + $0x60] sm:$0x3]  ;;  %6389 = vmatprep.subr.mxu0 %v10016_v37  ;;  %v1394_v33 = vmax.f32 %v8284_v39, %v1393_v58 }
 0x163   :  { %853 = vst [vmem:[#allocation3 + $0xb0] sm:$0xf] %v6214_v34  ;;  %v883_v15 = vunpack.c.l.bf16 %v8343_v28  ;;  %v893_v54 = vunpack.c.l.bf16 %v8345_v52  ;;  %v1013_v21 = vld [vmem:[#allocation2 + $0x60] sm:$0xc]  ;;  %v8355_v59 = vld [vmem:[#allocation2 + $0x74] sm:$0xf]  ;;  %6390 = vmatpush3.msra.mxu0 %v1774_v25  ;;  %v939_v44 = vadd.f32 %v878_v56, %v873_v4  ;;  %v888_v6 = vunpack.c.h.bf16 %v8343_v28 }
 0x164   :  { %v8357_v53 = vld [vmem:[#allocation2 + $0x88] sm:$0xf]  ;;  %v1609_v27 = vmul.f32 0.027777778, %v1584_v0  ;;  %v8365_v5 = vld [vmem:[#allocation2 + $0x9c] sm:$0xf]  ;;  %6391 = vmatprep.subr.mxu0 %v10016_v37  ;;  %v1030_v31 = vunpack.c.l.bf16 %v1013_v21  ;;  %v1035_v10 = vunpack.c.l.bf16 %v8355_v59  ;;  %v1644_v22 = vmax.f32 %v1642_v49, %v1643_v35 }
 0x165   :  { %v8367_v46 = vld [vmem:[#allocation2 + $0xb0] sm:$0xf]  ;;  %6392 = vmatpush3.msra.mxu0 %v1773_v57  ;;  %v940_v19 = vadd.f32 %v939_v44, %v883_v15  ;;  %v1040_v39 = vunpack.c.l.bf16 %v8357_v53  ;;  %v942_v50 = vsel %vm897_vm0, %v893_v54, 0.0  ;;  %v1045_v32 = vunpack.c.l.bf16 %v8365_v5 }
 0x166   :  { %v1682_v16 = vsel %vm1679_vm4, %v1676_v7, %v1609_v27  ;;  %6393 = vmatprep.subr.mxu0 %v10016_v37  ;;  %v1050_v12 = vunpack.c.l.bf16 %v8367_v46  ;;  %v1088_v41 = vrot.slane %v1030_v31, 4  ;;  %v1089_v2 = vrot.slane %v1035_v10, 4  ;;  %v1264_v30 = vld [vmem:[#allocation3 + $0x10] ss:$20 sps:$4 sm:$0xff]  }
 0x167   :  { %v1687_v17 = vsel %vm897_vm0, %v1682_v16, %v988_v24  ;;  %6394 = vmatpush3.msra.mxu0 %v1772_v40  ;;  %v941_v1 = vadd.f32 %v940_v19, %v888_v6  ;;  %v1099_v26 = vrot.slane %v1040_v39, 4  ;;  %v1109_v13 = vrot.slane %v1045_v32, 4  ;;  %v1270_v29 = vld [vmem:[#allocation3 + $0x38] ss:$20 sps:$4 sm:$0xff]   ;;  %v1276_v14 = vld [vmem:[#allocation3 + $0x60] sm:$0x3] }
 0x168   :  { %v1693_v62 = vsel %vm1690_vm5, %v1687_v17, %v1239_v20  ;;  %v1119_v51 = vrot.slane %v1050_v12, 4  ;;  %6398 = vmatprep.subr.mxu0 %v10016_v37  ;;  %v1090_v61 = vsel %vm897_vm0, %v1088_v41, %v1089_v2  ;;  %v1281_v18 = vunpack.c.l.bf16 %v1264_v30  ;;  %v1419_v3 = vld [vmem:[#allocation3 + $0x60] sm:$0xc]  ;;  %v1422_v21 = vld [vmem:[#allocation3 + $0x74] sm:$0xf] }
 0x169   :  { %v1699_v8 = vsel %vm1696_vm6, %v1693_v62, %v1394_v33  ;;  %v943_v63 = vadd.f32 %v942_v50, %v941_v1  ;;  %v1100_v47 = vsel %vm897_vm0, %v1089_v2, %v1099_v26  ;;  %v1110_v43 = vsel %vm897_vm0, %v1099_v26, %v1109_v13  ;;  %v1425_v24 = vld [vmem:[#allocation3 + $0x88] sm:$0xf]  ;;  %v1428_v44 = vld [vmem:[#allocation3 + $0x9c] sm:$0xf] }
 0x16a   :  { %v1705_v45 = vsel %vm1702_vm7, %v1699_v8, %v1644_v22  ;;  %v1190_v9 = vadd.f32 %v1100_v47, %v1090_v61  ;;  %v1120_v11 = vsel %vm897_vm0, %v1109_v13, %v1119_v51  ;;  %v1286_v55 = vunpack.c.h.bf16 %v1264_v30  ;;  %v1431_v40 = vld [vmem:[#allocation3 + $0xb0] sm:$0xf] }
 0x16b   :  { %1923 = vmatmul.mubr.f32.vlgmr.msra.gmra.mxu1 %v1705_v45  ;;  %v1291_v36 = vunpack.c.l.bf16 %v1270_v29  ;;  %v944_v38 = vrot.slane %v943_v63, 4  ;;  %v1251_v60 = vsel %vm1206_vm1, %v1030_v31, -inf  ;;  %v1000_v49 = vmax.f32 %v873_v4, %v878_v56 }
 0x16c   :  { %2107 = vmatprep.mubr.f32.mxu1 %v10016_v37  ;;  %v1191_v23 = vadd.f32 %v1190_v9, %v1110_v43  ;;  %v1193_v42 = vsel %vm897_vm0, %v1119_v51, 0.0  ;;  %v1252_v48 = vmax.f32 %v1251_v60, %v1035_v10  ;;  %v1346_v58 = vadd.f32 %v1286_v55, %v1281_v18 }
 0x16d   :  { %v1301_v34 = vunpack.c.l.bf16 %v1276_v14  ;;  %v1001_v0 = vmax.f32 %v1000_v49, %v883_v15  ;;  %v1296_v35 = vunpack.c.h.bf16 %v1270_v29  ;;  %v1406_v7 = vmax.f32 %v1281_v18, %v1286_v55 }
 0x16e   :  { %v1192_v25 = vadd.f32 %v1191_v23, %v1120_v11  ;;  %v1347_v57 = vadd.f32 %v1346_v58, %v1291_v36  ;;  %v945_v20 = vadd.f32 %v944_v38, %v943_v63  ;;  %v1253_v33 = vmax.f32 %v1252_v48, %v1040_v39 }
 0x16f   :  { %v1407_v56 = vmax.f32 %v1406_v7, %v1291_v36  ;;  %v1436_v31 = vunpack.c.l.bf16 %v1419_v3  ;;  %v1349_v22 = vsel %vm897_vm0, %v1301_v34, 0.0  ;;  %v1441_v16 = vunpack.c.l.bf16 %v1422_v21 }
 0x170   :  { %v1194_v27 = vadd.f32 %v1193_v42, %v1192_v25  ;;  %v1348_v4 = vadd.f32 %v1347_v57, %v1296_v35  ;;  %v1446_v19 = vunpack.c.l.bf16 %v1425_v24  ;;  %v1002_v15 = vmax.f32 %v1001_v0, %v888_v6 }
 0x171   :  { %v1451_v50 = vunpack.c.l.bf16 %v1428_v44  ;;  %v1456_v1 = vunpack.c.l.bf16 %v1431_v40  ;;  %v1003_v39 = vsel %vm897_vm0, %v893_v54, -inf  ;;  %v1408_v2 = vmax.f32 %v1407_v56, %v1296_v35 }
 0x172   :  { %v1195_v10 = vrot.slane %v1194_v27, 4  ;;  %v1350_v17 = vadd.f32 %v1349_v22, %v1348_v4  ;;  %v1494_v8 = vrot.slane %v1436_v31, 4  ;;  %v946_v26 = vrot.slane %v945_v20, 2 }
 0x173   :  { %v1254_v13 = vmax.f32 %v1253_v33, %v1045_v32  ;;  %v1495_v51 = vrot.slane %v1441_v16, 4  ;;  %v1505_v45 = vrot.slane %v1446_v19, 4  ;;  %v1004_v63 = vmax.f32 %v1002_v15, %v1003_v39 }
 0x174   :  { %v1196_v62 = vadd.f32 %v1195_v10, %v1194_v27  ;;  %v1351_v41 = vrot.slane %v1350_v17, 4  ;;  %v1409_v6 = vsel %vm897_vm0, %v1301_v34, -inf  ;;  %v1515_v61 = vrot.slane %v1451_v50, 4 }
 0x175   :  { %v1255_v52 = vmax.f32 %v1254_v13, %v1050_v12  ;;  %v1506_v54 = vsel %vm897_vm0, %v1495_v51, %v1505_v45  ;;  %v1525_v29 = vrot.slane %v1456_v1, 4  ;;  %v1410_v43 = vmax.f32 %v1408_v2, %v1409_v6 }
 0x176   :  { %v1352_v28 = vadd.f32 %v1351_v41, %v1350_v17  ;;  %v1197_v30 = vrot.slane %v1196_v62, 2  ;;  %v1496_v9 = vsel %vm897_vm0, %v1494_v8, %v1495_v51  ;;  %v1516_v32 = vsel %vm897_vm0, %v1505_v45, %v1515_v61 }
 0x177   :  { %v947_v11 = vadd.f32 %v946_v26, %v945_v20  ;;  %v1596_v14 = vadd.f32 %v1506_v54, %v1496_v9  ;;  %v1005_v18 = vrot.slane %v1004_v63, 4  ;;  %v1526_v55 = vsel %vm897_vm0, %v1515_v61, %v1525_v29 }
 0x178   :  { %v1353_v47 = vrot.slane %v1352_v28, 2  ;;  %v1656_v36 = vsel %vm1206_vm1, %v1436_v31, -inf  ;;  %v1198_v38 = vadd.f32 %v1197_v30, %v1196_v62  ;;  %v1256_v23 = vrot.slane %v1255_v52, 4 }
 0x179   :  { %v1597_v60 = vadd.f32 %v1596_v14, %v1516_v32  ;;  %v1657_v12 = vmax.f32 %v1656_v36, %v1441_v16  ;;  %v1411_v42 = vrot.slane %v1410_v43, 4  ;;  %v1599_v48 = vsel %vm897_vm0, %v1525_v29, 0.0  ;;  %v2030_v36 = vld [vmem:[%s9748_s3 + $0xf8] sm:$0xff] }
 0x17a   :  { %v1354_v49 = vadd.f32 %v1353_v47, %v1352_v28  ;;  %v948_v58 = vrot.slane %v947_v11, 1  ;;  %v1006_v3 = vmax.f32 %v1004_v63, %v1005_v18  ;;  %v1199_v0 = vrot.slane %v1198_v38, 1  ;;  %v2035_v18 = vld [vmem:[%s9748_s3 + $0x120] sm:$0xff] }
 0x17b   :  { %v1598_v25 = vadd.f32 %v1597_v60, %v1526_v55  ;;  %v1658_v34 = vmax.f32 %v1657_v12, %v1446_v19  ;;  %v1257_v35 = vmax.f32 %v1255_v52, %v1256_v23  ;;  %v1412_v24 = vmax.f32 %v1410_v43, %v1411_v42  ;;  %v2034_v55 = vld [vmem:[%s9748_s3 + $0x118] sm:$0xff]  ;;  %2059 = vmatprep.subr.mxu1 %v2035_v18  ;;  %v2029_v23 = vld [vmem:[%s9748_s3 + $0xf0] sm:$0xff]  ;;  %v2028_v42 = vld [vmem:[%s9748_s3 + $0xe8] sm:$0xff] }
 0x17c   :  { %v1355_v21 = vrot.slane %v1354_v49, 1  ;;  %v949_v20 = vadd.f32 %v948_v58, %v947_v11  ;;  %v1007_v33 = vrot.slane %v1006_v3, 2  ;;  %v1200_v4 = vadd.f32 %v1199_v0, %v1198_v38  ;;  %v2038_v38 = vld [vmem:[%s9748_s3 + $0x138] sm:$0xff]  ;;  %2060 = vmatpush1.msra.mxu1 %v2034_v55  ;;  %v2025_v60 = vld [vmem:[%s9748_s3 + $0xd0] sm:$0xff]  ;;  %v2019_v58 = vld [vmem:[%s9748_s3 + $0xa0] sm:$0xff] }
 0x17d   :  { %v1600_v57 = vadd.f32 %v1599_v48, %v1598_v25  ;;  %v1659_v7 = vmax.f32 %v1658_v34, %v1451_v50  ;;  %v1258_v56 = vrot.slane %v1257_v35, 2  ;;  %v1413_v22 = vrot.slane %v1412_v24, 2  ;;  %v2033_v12 = vld [vmem:[%s9748_s3 + $0x110] sm:$0xff]  ;;  %2061 = vmatprep.subr.mxu1 %v2030_v36  ;;  %v2020_v48 = vld [vmem:[%s9748_s3 + $0xa8] sm:$0xff]  ;;  %v2023_v25 = vld [vmem:[%s9748_s3 + $0xc0] sm:$0xff] }
 0x17e   :  { %v1356_v10 = vadd.f32 %v1355_v21, %v1354_v49  ;;  %v955_v16 = vmul.f32 0.027777778, %v949_v20  ;;  %v1008_v17 = vmax.f32 %v1006_v3, %v1007_v33  ;;  %v1205_v62 = vmul.f32 0.027777778, %v1200_v4  ;;  %v2024_v49 = vld [vmem:[%s9748_s3 + $0xc8] sm:$0xff]  ;;  %2062 = vmatpush1.msra.mxu1 %v2029_v23  ;;  %v2015_v34 = vld [vmem:[%s9748_s3 + $0x80] sm:$0xff] }
 0x17f   :  { %v1601_v27 = vrot.slane %v1600_v57, 4  ;;  %v1660_v44 = vmax.f32 %v1659_v7, %v1456_v1  ;;  %v1259_v39 = vmax.f32 %v1257_v35, %v1258_v56  ;;  %v1414_v8 = vmax.f32 %v1412_v24, %v1413_v22  ;;  %2063 = vmatprep.subr.mxu1 %v2025_v60  ;;  %v2014_v3 = vld [vmem:[%s9748_s3 + $0x78] sm:$0xff]  ;;  %v2005_v7 = vld [vmem:[%s9748_s3 + $0x30] sm:$0xff]  ;;  %v2004_v24 = vld [vmem:[%s9748_s3 + $0x28] sm:$0xff] }
 0x180   :  { %v1361_v2 = vmul.f32 0.027777778, %v1356_v10  ;;  %v1672_v1 = vsel %vm1667_vm2, %v955_v16, %v1205_v62  ;;  %v1009_v51 = vrot.slane %v1008_v17, 1  ;;  %2064 = vmatpush1.msra.mxu1 %v2024_v49  ;;  %v2018_v0 = vld [vmem:[%s9748_s3 + $0x98] sm:$0xff]  ;;  %v2013_v21 = vld [vmem:[%s9748_s3 + $0x70] sm:$0xff]  ;;  %v2000_v20 = vld [vmem:[%s9748_s3 + $0x8] sm:$0xff] }
 0x181   :  { %v1602_v40 = vadd.f32 %v1601_v27, %v1600_v57  ;;  %v1661_v31 = vrot.slane %v1660_v44, 4  ;;  %v1260_v45 = vrot.slane %v1259_v39, 1  ;;  %v1415_v28 = vrot.slane %v1414_v8, 1  ;;  %2065 = vmatprep.subr.mxu1 %v2020_v48  ;;  %v2010_v35 = vld [vmem:[%s9748_s3 + $0x58] sm:$0xff]  ;;  %v2009_v57 = vld [vmem:[%s9748_s3 + $0x50] sm:$0xff]  ;;  %v2008_v27 = vld [vmem:[%s9748_s3 + $0x48] sm:$0xff] }
 0x182   :  { %v1678_v6 = vsel %vm1673_vm3, %v1672_v1, %v1361_v2  ;;  %v1010_v52 = vmax.f32 %v1008_v17, %v1009_v51  ;;  %2066 = vmatpush1.msra.mxu1 %v2019_v58  ;;  %v2037_v33 = vld [vmem:[%s9748_s3 + $0x130] sm:$0xff]  ;;  %v2003_v4 = vld [vmem:[%s9748_s3 + $0x20] sm:$0xff]  ;;  %v8519_v2 = vld [vmem:[#allocation2 + $0x8] sm:$0xff] }
 0x183   :  { %v1603_v15 = vrot.slane %v1602_v40, 2  ;;  %v1662_v19 = vmax.f32 %v1660_v44, %v1661_v31  ;;  %v1261_v54 = vmax.f32 %v1259_v39, %v1260_v45  ;;  %v1416_v47 = vmax.f32 %v1414_v8, %v1415_v28  ;;  %2067 = vmatprep.subr.mxu1 %v2015_v34  ;;  %v1999_v44 = vld [vmem:[%s9748_s3] sm:$0xff]  ;;  %v2032_v8 = vld [vmem:[%s9748_s3 + $0x108] sm:$0xff]  ;;  %v2026_v51 = vld [vmem:[%s9748_s3 + $0xd8] sm:$0xff] }
 0x184   :  { %2068 = vmatpush1.msra.mxu1 %v2014_v3  ;;  %v8514_v62 = vld [vmem:[#allocation2 + $0x1c] sm:$0xff]  ;;  %v2017_v28 = vld [vmem:[%s9748_s3 + $0x90] sm:$0xff] }
 0x185   :  { %v1604_v41 = vadd.f32 %v1603_v15, %v1602_v40  ;;  %v1663_v50 = vrot.slane %v1662_v19, 2  ;;  %2069 = vmatprep.subr.mxu1 %v2010_v35  ;;  %v2027_v1 = vld [vmem:[%s9748_s3 + $0xe0] sm:$0xff]  ;;  %v2022_v45 = vld [vmem:[%s9748_s3 + $0xb8] sm:$0xff] }
 0x186   :  { %2070 = vmatpush1.msra.mxu1 %v2009_v57 }
 0x187   :  { %v1605_v26 = vrot.slane %v1604_v41, 1  ;;  %v1664_v13 = vmax.f32 %v1662_v19, %v1663_v50  ;;  %2071 = vmatprep.subr.mxu1 %v2005_v7  ;;  %v2036_v50 = vld [vmem:[%s9748_s3 + $0x128] sm:$0xff] }
 0x188   :  { %2072 = vmatpush1.msra.mxu1 %v2004_v24 }
 0x189   :  { %v1606_v63 = vadd.f32 %v1605_v26, %v1604_v41  ;;  %v1665_v30 = vrot.slane %v1664_v13, 1  ;;  %2073 = vmatprep.subr.mxu1 %v2000_v20  ;;  %v5818_v26 = vcombine.high %v8519_v2, %v8514_v62 }
 0x18a   :  { %2074 = vmatpush1.msra.mxu1 %v1999_v44 }
 0x18b   :  { %v1611_v61 = vmul.f32 0.027777778, %v1606_v63  ;;  %v1666_v9 = vmax.f32 %v1664_v13, %v1665_v30  ;;  %2130 = vmatprep.subr.mxu1 %v2037_v33  ;;  %v2031_v13 = vld [vmem:[%s9748_s3 + $0x100] sm:$0xff]  ;;  %v2021_v63 = vld [vmem:[%s9748_s3 + $0xb0] sm:$0xff] }
 0x18c   :  { %v2011_v30 = vld [vmem:[%s9748_s3 + $0x60] sm:$0xff] }
 0x18d   :  { %v1684_v29 = vsel %vm1679_vm4, %v1678_v6, %v1611_v61  ;;  %v2016_v6 = vld [vmem:[%s9748_s3 + $0x88] sm:$0xff] }
 0x18e   :  { %v1689_v43 = vsel %vm897_vm0, %v1684_v29, %v1010_v52  ;;  %v2012_v61 = vld [vmem:[%s9748_s3 + $0x68] sm:$0xff]  ;;  %v2007_v52 = vld [vmem:[%s9748_s3 + $0x40] sm:$0xff]  ;;  %v2002_v29 = vld [vmem:[%s9748_s3 + $0x18] sm:$0xff] }
 0x18f   :  { %v1695_v32 = vsel %vm1690_vm5, %v1689_v43, %v1261_v54  ;;  %v2006_v54 = vld [vmem:[%s9748_s3 + $0x38] sm:$0xff] }
 0x190   :  { %v1701_v11 = vsel %vm1696_vm6, %v1695_v32, %v1416_v47  ;;  %v2001_v47 = vld [vmem:[%s9748_s3 + $0x10] sm:$0xff] }
 0x191   :  { %v1707_v14 = vsel %vm1702_vm7, %v1701_v11, %v1666_v9  ;;  %v8568_v43 = vld [vmem:[#allocation2 + $0x14] sm:$0xff]  ;;  %v8570_v9 = vld [vmem:[#allocation2] sm:$0xff] }
 0x192   :  { %6396 = vmatmul.mubr.f32.vlgmr.msra.gmra.mxu0 %v1707_v14  ;;  %v5816_v32 = vcombine.high %v8570_v9, %v8568_v43 }
 0x193   :  { %6414 = vmatprep.mubr.msk.f32.mxu0 %vm6882_vm8, %v10016_v37  ;;  %6399 = vmatpush3.msra.mxu0 %v2038_v38 }
 0x194   :  { %6400 = vmatprep.subr.mxu0 %v10016_v37 }
 0x195   :  { %6401 = vmatpush3.msra.mxu0 %v2033_v12 }
 0x196   :  { %6402 = vmatprep.subr.mxu0 %v10016_v37 }
 0x197   :  { %6403 = vmatpush3.msra.mxu0 %v2028_v42 }
 0x198   :  { %6404 = vmatprep.subr.mxu0 %v10016_v37 }
 0x199   :  { %6405 = vmatpush3.msra.mxu0 %v2023_v25 }
 0x19a   :  { %6406 = vmatprep.subr.mxu0 %v10016_v37 }
 0x19b   :  { %6407 = vmatpush3.msra.mxu0 %v2018_v0 }
 0x19c   :  { %6408 = vmatprep.subr.mxu0 %v10016_v37 }
 0x19d   :  { %6409 = vmatpush3.msra.mxu0 %v2013_v21 }
 0x19e   :  { %6410 = vmatprep.subr.mxu0 %v10016_v37 }
 0x19f   :  { %6411 = vmatpush3.msra.mxu0 %v2008_v27 }
 0x1a0   :  { %6412 = vmatprep.subr.mxu0 %v10016_v37 }
 0x1a1   :  { %6413 = vmatpush3.msra.mxu0 %v2003_v4 }
 0x207   :  { %v6247_v56 = vpop.f32.mrf.mxu0 }
 0x209   :  { %v6248_v31 = vpop.f32.mrf.mxu0 }
 0x20a   :  { %v6249_v22 = vadd.f32 %v6248_v31, %v6247_v56 }
 0x22b   :  { %v6282_v40 = vpop.f32.mrf.mxu1 }
 0x22d   :  { %v6283_v10 = vpop.f32.mrf.mxu1 }
 0x22e   :  { %v6284_v16 = vadd.f32 %v6283_v10, %v6282_v40  ;;  %v2690_v40 = vlaneseq }
 0x230   :  { %v1925_v15 = vadd.f32 %v6284_v16, %v6249_v22 }
 0x252   :  { %v1994_v19 = vpop.f32.mrf.mxu0 }
 0x253   :  { %v1995_v17 = vadd.f32 %v1994_v19, %v1925_v15 }
 0x254   :  { %v6397_v39 = vpop.f32.mrf.mxu0 }
 0x255   :  { %v1998_v41 = vmax.f32 %v1995_v17, 0.0  ;;  %v2691_v17 = vshrl.u32 %v2690_v40, 7  ;;  %v8676_v40 = vld [vmem:[#allocation2 + $0x24] sm:$0xf] }
 0x256   :  { %10059 = vst [vmem:[#allocation42_spill] sm:$0xff] %v8676_v40 }
 0x257   :  { %5807 = vmatmul.mubr.msk.f32.vlgmr.msra.gmra.mxu1 %vm2039_vm9, %v1998_v41  ;;  %6415 = vmatmul.mubr.msk.f32.vlgmr.msra.gmra.mxu0 %vm2039_vm9, %v1998_v41 }
 0x258   :  { %2131 = vmatpush1.msra.mxu1 %v2036_v50  ;;  %2566 = vmatprep.mubr.bf16.mxu0 %v5818_v26 }
 0x259   :  { %2132 = vmatprep.subr.mxu1 %v2032_v8  ;;  %2178 = vmatprep.mubr.f32.mxu1 %v10016_v37 }
 0x25a   :  { %2133 = vmatpush1.msra.mxu1 %v2031_v13 }
 0x25b   :  { %2134 = vmatprep.subr.mxu1 %v2027_v1  ;;  %v8591_v1 = vsub.s32 1, %v2691_v17 }
 0x25c   :  { %2135 = vmatpush1.msra.mxu1 %v2026_v51 }
 0x25d   :  { %2136 = vmatprep.subr.mxu1 %v2022_v45  ;;  %v8595_v45 = vld [vmem:[#allocation2 + $0x3c] sm:$0xff] }
 0x25e   :  { %2137 = vmatpush1.msra.mxu1 %v2021_v63 }
 0x25f   :  { %2138 = vmatprep.subr.mxu1 %v2017_v28 }
 0x260   :  { %2139 = vmatpush1.msra.mxu1 %v2016_v6 }
 0x261   :  { %2140 = vmatprep.subr.mxu1 %v2012_v61 }
 0x262   :  { %2141 = vmatpush1.msra.mxu1 %v2011_v30 }
 0x263   :  { %2142 = vmatprep.subr.mxu1 %v2007_v52  ;;  %v8605_v52 = vld [vmem:[#allocation2 + $0x28] sm:$0xff] }
 0x264   :  { %2143 = vmatpush1.msra.mxu1 %v2006_v54  ;;  %v8607_v54 = vld [vmem:[#allocation2 + $0x50] sm:$0xff] }
 0x265   :  { %2144 = vmatprep.subr.mxu1 %v2002_v29 }
 0x266   :  { %2145 = vmatpush1.msra.mxu1 %v2001_v47 }
 0x267   :  { %5808 = vmatmul.mubr.msk.f32.vlgmr.msra.gmra.mxu1 %vm2039_vm9, %v1998_v41 }
 0x268   :  { %2494 = vmatprep.mubr.bf16.mxu1 %v5816_v32  ;;  %v5815_v32 = vcombine.low %v8570_v9, %v8568_v43 }
 0x317   :  { %v2109_v11 = vpop.f32.mrf.mxu1  ;;  %v2251_v14 = vpop.f32.mrf.mxu0 }
 0x318   :  { %v2260_v18 = vrot.slane %v2109_v11, 4  ;;  %v2264_v55 = vrot.slane %v2251_v14, 4 }
 0x319   :  { %v2111_v36 = vpop.f32.mrf.mxu1  ;;  %v6416_v38 = vpop.f32.mrf.mxu0 }
 0x31a   :  { %v2270_v23 = vadd.f32 %v2260_v18, %v2109_v11  ;;  %v2274_v60 = vadd.f32 %v2264_v55, %v2251_v14  ;;  %v2261_v12 = vrot.slane %v2111_v36, 4  ;;  %v5821_v11 = vcombine.high %v8605_v52, %v8595_v45  ;;  %v8614_v14 = vld [vmem:[#allocation2 + $0x44] sm:$0xff] }
 0x31c   :  { %v5810_v49 = vmul.f32 -1.442695, %v2270_v23  ;;  %v5814_v42 = vmul.f32 -1.442695, %v2274_v60  ;;  %v2271_v48 = vadd.f32 %v2261_v12, %v2111_v36  ;;  %v8629_v60 = vld [vmem:[#allocation2 + $0x64] sm:$0xff] }
 0x31e   :  { %6690 = vpow2.f32 %v5810_v49  ;;  %v5811_v58 = vmul.f32 -1.442695, %v2271_v48  ;;  %v8637_v48 = vld [vmem:[#allocation2 + $0x58] sm:$0xff] }
 0x31f   :  { %6692 = vpow2.f32 %v5814_v42  ;;  %v8635_v42 = vld [vmem:[#allocation2 + $0x30] sm:$0xff] }
 0x320   :  { %6694 = vpow2.f32 %v5811_v58  ;;  %v8639_v58 = vsub.s32 0, %v2691_v17  ;;  %v8687_v17 = vld [vmem:[#allocation2 + $0x80] sm:$0xff] }
 0x327   :  { %v2180_v25 = vpop.f32.mrf.mxu1 }
 0x328   :  { %v2262_v34 = vrot.slane %v2180_v25, 4 }
 0x329   :  { %v2182_v3 = vpop.f32.mrf.mxu1 }
 0x32a   :  { %v2272_v0 = vadd.f32 %v2262_v34, %v2180_v25  ;;  %v2263_v35 = vrot.slane %v2182_v3, 4 }
 0x32b   :  { %v6691_v57 = vpop.eup %6690 }
 0x32c   :  { %v6693_v7 = vpop.eup %6692  ;;  %v2290_v21 = vadd.f32 1.0, %v6691_v57  ;;  %v5812_v27 = vmul.f32 -1.442695, %v2272_v0  ;;  %v2273_v44 = vadd.f32 %v2263_v35, %v2182_v3  ;;  %v8652_v35 = vld [vmem:[#allocation2 + $0x78] sm:$0xff]  ;;  %v8654_v57 = vld [vmem:[#allocation2 + $0x8c] sm:$0xff] }
 0x32d   :  { %v6695_v24 = vpop.eup %6694  ;;  %v2294_v20 = vadd.f32 1.0, %v6693_v7 }
 0x32e   :  { %6696 = vrcp.f32 %v2290_v21  ;;  %v2291_v33 = vadd.f32 1.0, %v6695_v24  ;;  %v5813_v4 = vmul.f32 -1.442695, %v2273_v44 }
 0x32f   :  { %6698 = vrcp.f32 %v2294_v20 }
 0x330   :  { %6700 = vrcp.f32 %v2291_v33  ;;  %v8670_v33 = vld [vmem:[#allocation2 + $0xa0] sm:$0xff] }
 0x331   :  { %6702 = vpow2.f32 %v5812_v27  ;;  %v8666_v27 = vld [vmem:[#allocation2 + $0x6c] sm:$0xff] }
 0x332   :  { %6704 = vpow2.f32 %v5813_v4 }
 0x33b   :  { %v6697_v56 = vpop.eup %6696 }
 0x33c   :  { %v6699_v31 = vpop.eup %6698  ;;  %v8579_v19 = vpack.c.bf16 %v6697_v56, %v6697_v56 }
 0x33d   :  { %v6701_v10 = vpop.eup %6700  ;;  %v8575_v22 = vpack.c.bf16 %v6699_v31, %v6699_v31 }
 0x33e   :  { %v6703_v16 = vpop.eup %6702  ;;  %v8577_v15 = vpack.c.bf16 %v6701_v10, %v6701_v10  ;;  %10053 = vst [vmem:[#allocation35_spill] sm:$0xff] %v8579_v19  ;;  %v8589_v13 = vpack.i.b16 %v8579_v19, %v8579_v19  ;;  %v2928_v63 = vshrl.u32 %v8579_v19, 16  ;;  %v2452_v47 = vrot.slane %v8579_v19, 1 }
 0x33f   :  { %v2956_v39 = vshrl.u32 %v8575_v22, 16  ;;  %v2292_v41 = vadd.f32 1.0, %v6703_v16  ;;  %v6705_v8 = vpop.eup %6704  ;;  %v2716_v51 = vpack.i.b16 %v8575_v22, %v8575_v22 }
 0x340   :  { %10052 = vst [vmem:[#allocation33_spill] sm:$0xff] %v8577_v15  ;;  %v8584_v50 = vpack.i.b16 %v8577_v15, %v8577_v15  ;;  %v2935_v26 = vshrl.u32 %v8577_v15, 16  ;;  %v2293_v61 = vadd.f32 1.0, %v6705_v8  ;;  %v2453_v30 = vrot.slane %v8577_v15, 1 }
 0x341   :  { %v8598_v28 = vpack.i.b16 %v2956_v39, %v2956_v39  ;;  %6706 = vrcp.f32 %v2292_v41  ;;  %v8618_v18 = vrot.slane %v8589_v13, %v8591_v1  ;;  %v8621_v55 = vrot.slane %v2716_v51, %v8591_v1  ;;  %v8689_v39 = vld [vmem:[#allocation2 + $0x94] sm:$0xff] }
 0x342   :  { %v8602_v6 = vrot.slane %v8584_v50, %v8591_v1  ;;  %v2936_v29 = vpack.i.b16 %v2935_v26, %v2935_v26  ;;  %6708 = vrcp.f32 %v2293_v61  ;;  %2476 = vmatprep.subr.bf16.mxu1 %v2453_v30  ;;  %v2929_v38 = vpack.i.b16 %v2928_v63, %v2928_v63  ;;  %v8700_v61 = vld [vmem:[#allocation2 + $0xa8] sm:$0xff] }
 0x343   :  { %10055 = vst [vmem:[#allocation37_spill] sm:$0xff] %v8618_v18  ;;  %10056 = vst [vmem:[#allocation38_spill] sm:$0xff] %v8621_v55  ;;  %v8627_v23 = vrot.slane %v8598_v28, %v8591_v1  ;;  %2477 = vmatpush1.bf16.xpose.msra.mxu1 %v2452_v47  ;;  %v8664_v20 = vcombine.low %v8621_v55, %v8621_v55  ;;  %v8694_v8 = vrot.slane %v2716_v51, %v8639_v58  ;;  %v8704_v47 = vld [vmem:[#allocation2 + $0x10] sm:$0xf] }
 0x344   :  { %10054 = vst [vmem:[#allocation36_spill] sm:$0xff] %v8602_v6  ;;  %v8643_v25 = vcombine.low %v8618_v18, %v8602_v6  ;;  %v8650_v0 = vrot.slane %v2936_v29, %v8591_v1  ;;  %v8679_v31 = vrot.slane %v2929_v38, %v8591_v1  ;;  %10062 = vst [vmem:[#allocation46_spill] sm:$0xff] %v8704_v47 }
 0x345   :  { %10057 = vst [vmem:[#allocation40_spill] sm:$0xff] %v8627_v23  ;;  %v8683_v10 = vcombine.low %v8627_v23, %v8627_v23  ;;  %10061 = vst [vmem:[#allocation45_spill] sm:$0xff] %v8694_v8  ;;  %v8718_v44 = vrot.slane %v8584_v50, %v8639_v58  ;;  %v8721_v30 = vrot.slane %v2936_v29, %v8639_v58 }
 0x346   :  { %10058 = vst [vmem:[#allocation41_spill] sm:$0xff] %v8650_v0  ;;  %10060 = vst [vmem:[#allocation43_spill] sm:$0xff] %v8679_v31  ;;  %v2756_v26 = vmul.bf16 %v8652_v35, %v8643_v25  ;;  %v2759_v63 = vmul.bf16 %v8654_v57, %v8643_v25  ;;  %v8708_v56 = vcombine.low %v8679_v31, %v8650_v0 }
 0x347   :  { %10063 = vst [vmem:[#allocation47_spill] sm:$0xff] %v8718_v44  ;;  %10064 = vst [vmem:[#allocation49_spill] sm:$0xff] %v8721_v30  ;;  %v2758_v21 = vmul.bf16 %v8664_v20, %v8357_v53  ;;  %v2761_v51 = vmul.bf16 %v8664_v20, %v8365_v5  ;;  %v8729_v41 = vrot.slane %v8589_v13, %v8639_v58 }
 0x348   :  { %v2999_v16 = vmul.bf16 %v8683_v10, %v8357_v53  ;;  %v3002_v50 = vmul.bf16 %v8683_v10, %v8365_v5  ;;  %v2762_v29 = vmul.bf16 %v8670_v33, %v8643_v25  ;;  %v8738_v4 = vrot.slane %v2929_v38, %v8639_v58 }
 0x349   :  { %10065 = vst [vmem:[#allocation50_spill] sm:$0xff] %v8729_v41  ;;  %v8742_v24 = vcombine.low %v8694_v8, %v8694_v8  ;;  %v5858_v13 = vcombine.low %v2756_v26, %v2759_v63  ;;  %v5859_v3 = vcombine.high %v2756_v26, %v2759_v63  ;;  %v2997_v53 = vmul.bf16 %v8652_v35, %v8708_v56 }
 0x34a   :  { %2495 = vmatmul.mubr.bf16.vlgmr.msra.gmra.mxu1 %v5815_v32  ;;  %10066 = vst [vmem:[#allocation51_spill] sm:$0xff] %v8738_v4  ;;  %v3000_v5 = vmul.bf16 %v8654_v57, %v8708_v56  ;;  %v3003_v49 = vmul.bf16 %v8670_v33, %v8708_v56  ;;  %v8754_v38 = vrot.slane %v8598_v28, %v8639_v58 }
 0x34b   :  { %2502 = vmatprep.mubr.bf16.mxu1 %v5821_v11  ;;  %10067 = vst [vmem:[#allocation53_spill] sm:$0xff] %v8742_v24  ;;  %v8758_v7 = vcombine.low %v8729_v41, %v8718_v44  ;;  %v8762_v26 = vcombine.low %v8738_v4, %v8721_v30  ;;  %v8764_v63 = vcombine.low %v2758_v21, %v2761_v51 }
 0x34c   :  { %10069 = vst [vmem:[#allocation62_spill] sm:$0xff] %v8754_v38  ;;  %v8767_v12 = vcombine.low %v2999_v16, %v3002_v50  ;;  %v8771_v36 = vmul.bf16 %v8664_v20, %v8367_v46  ;;  %v5863_v28 = vcombine.low %v2762_v29, %v2762_v29  ;;  %v2900_v41 = vmax.bf16 %v5859_v3, %v5858_v13 }
 0x34d   :  { %10070 = vst [vmem:[#allocation22_spill] sm:$0xff] %v8762_v26  ;;  %v5864_v30 = vcombine.high %v2762_v29, %v2762_v29  ;;  %v5886_v21 = vcombine.low %v2997_v53, %v3000_v5  ;;  %v5887_v51 = vcombine.high %v2997_v53, %v3000_v5  ;;  %v5891_v4 = vcombine.low %v3003_v49, %v3003_v49 }
 0x34e   :  { %v6707_v32 = vpop.eup %6706  ;;  %v5892_v55 = vcombine.high %v3003_v49, %v3003_v49  ;;  %v10073_v29 = vcombine.high %v8607_v54, %v8629_v60  ;;  %v8799_v13 = vmul.bf16 %v8683_v10, %v8367_v46  ;;  %v2750_v49 = vmul.bf16 %v8643_v25, %v8607_v54 }
 0x34f   :  { %v8744_v11 = vpack.c.bf16 %v6707_v32, %v6707_v32  ;;  %v6709_v32 = vpop.eup %6708  ;;  %v2753_v23 = vmul.bf16 %v8629_v60, %v8643_v25  ;;  %v10081_v15 = vcombine.low %v8519_v2, %v8514_v62  ;;  %v2996_v26 = vmul.bf16 %v8683_v10, %v8355_v59 }
 0x350   :  { %v8777_v44 = vpack.c.bf16 %v6709_v32, %v6709_v32  ;;  %v10072_v32 = vcombine.low %v8605_v52, %v8595_v45  ;;  %v8816_v46 = vsel %vm897_vm0, %v5892_v55, 4286644096  ;;  %v3141_v55 = vmax.bf16 %v5887_v51, %v5886_v21 }
 0x351   :  { %10068 = vst [vmem:[#allocation59_spill] sm:$0xff] %v8744_v11  ;;  %v2942_v34 = vshrl.u32 %v8744_v11, 16  ;;  %v8775_v8 = vpack.i.b16 %v8744_v11, %v8744_v11  ;;  %v2454_v3 = vrot.slane %v8744_v11, 1  ;;  %v5853_v0 = vcombine.low %v2750_v49, %v2753_v23 }
 0x352   :  { %10071 = vst [vmem:[#allocation57_spill] sm:$0xff] %v8777_v44  ;;  %v8783_v16 = vpack.i.b16 %v8777_v44, %v8777_v44  ;;  %v2949_v50 = vshrl.u32 %v8777_v44, 16  ;;  %v2455_v18 = vrot.slane %v8777_v44, 1  ;;  %2503 = vmatmul.mubr.bf16.gmra.mxu1 %v10072_v32  ;;  %v2991_v11 = vmul.bf16 %v8708_v56, %v8607_v54 }
 0x353   :  { %v8779_v6 = vpack.i.b16 %v2942_v34, %v2942_v34  ;;  %2510 = vmatprep.mubr.bf16.mxu1 %v10073_v29  ;;  %v2908_v34 = vsel %vm897_vm0, %v5863_v28, 4286644096  ;;  %v8803_v53 = vrot.slane %v8775_v8, %v8591_v1  ;;  %v2911_v29 = vsel %vm897_vm0, %v5864_v30, 4286644096  ;;  %v8834_v30 = vld [vmem:[#allocation2 + $0x60] sm:$0xf] }
 0x354   :  { %v8807_v5 = vrot.slane %v8783_v16, %v8591_v1  ;;  %v8809_v32 = vpack.i.b16 %v2949_v50, %v2949_v50  ;;  %2548 = vmatprep.subr.bf16.mxu0 %v2455_v18  ;;  %6581 = vmatprep.subr.bf16.mxu1 %v2455_v18  ;;  %v8813_v28 = vsel %vm897_vm0, %v5891_v4, 4286644096  ;;  %10078 = vst [vmem:[#allocation63_spill] sm:$0xff] %v8834_v30 }
 0x355   :  { %10074 = vst [vmem:[#allocation26_spill] sm:$0xff] %v8803_v53  ;;  %2549 = vmatpush1.bf16.xpose.msra.mxu0 %v2454_v3  ;;  %6582 = vmatpush1.bf16.xpose.msra.mxu1 %v2454_v3  ;;  %v8824_v50 = vrot.slane %v8779_v6, %v8591_v1  ;;  %v2913_v3 = vmax.bf16 %v2911_v29, %v2908_v34 }
 0x356   :  { %10075 = vst [vmem:[#allocation28_spill] sm:$0xff] %v8807_v5  ;;  %v8828_v18 = vcombine.low %v8803_v53, %v8807_v5  ;;  %v8832_v4 = vrot.slane %v8809_v32, %v8591_v1  ;;  %6417 = vmatprep.subr.bf16.mxu1 %v10016_v37  ;;  %v2752_v31 = vmul.bf16 %v8664_v20, %v8834_v30 }
 0x357   :  { %10076 = vst [vmem:[#allocation70_spill] sm:$0xff] %v8824_v50  ;;  %v2755_v5 = vmul.bf16 %v8664_v20, %v8355_v59  ;;  %6439 = vmatprep.subr.bf16.mxu0 %v10016_v37  ;;  %v3153_v34 = vmax.bf16 %v8816_v46, %v8813_v28  ;;  %v5854_v53 = vcombine.high %v2750_v49, %v2753_v23 }
 0x358   :  { %10077 = vst [vmem:[#allocation71_spill] sm:$0xff] %v8832_v4  ;;  %v8846_v1 = vcombine.low %v8824_v50, %v8832_v4  ;;  %v2757_v21 = vmul.bf16 %v8687_v17, %v8828_v18  ;;  %v2760_v51 = vmul.bf16 %v8689_v39, %v8828_v18  ;;  %v2763_v29 = vmul.bf16 %v8700_v61, %v8828_v18 }
 0x359   :  { %v10079_v4 = vcombine.low %v8607_v54, %v8629_v60  ;;  %v2993_v28 = vmul.bf16 %v8683_v10, %v8834_v30  ;;  %v10080_v23 = vcombine.high %v8652_v35, %v8654_v57  ;;  %v8872_v54 = vcombine.low %v2752_v31, %v2755_v5 }
 0x35a   :  { %v5860_v50 = vcombine.low %v2757_v21, %v2760_v51  ;;  %v2998_v44 = vmul.bf16 %v8687_v17, %v8846_v1  ;;  %v3001_v19 = vmul.bf16 %v8689_v39, %v8846_v1  ;;  %v5865_v49 = vcombine.low %v2763_v29, %v2763_v29 }
 0x35b   :  { %2511 = vmatmul.mubr.bf16.gmra.mxu1 %v10079_v4  ;;  %v3004_v46 = vmul.bf16 %v8700_v61, %v8846_v1  ;;  %v2994_v4 = vmul.bf16 %v8629_v60, %v8708_v56  ;;  %v5861_v38 = vcombine.high %v2757_v21, %v2760_v51  ;;  %v2894_v40 = vmax.bf16 %v5854_v53, %v5853_v0 }
 0x35c   :  { %2518 = vmatprep.mubr.bf16.mxu1 %v10080_v23  ;;  %2567 = vmatmul.mubr.bf16.vlgmr.msra.gmra.mxu0 %v10081_v15  ;;  %v2901_v24 = vmax.bf16 %v5860_v50, %v2900_v41  ;;  %v5888_v30 = vcombine.low %v2998_v44, %v3001_v19  ;;  %v10082_v23 = vcombine.high %v8635_v42, %v8614_v14  ;;  %v2915_v31 = vsel %vm897_vm0, %v5865_v49, 4286644096 }
 0x35d   :  { %v5893_v5 = vcombine.low %v3004_v46, %v3004_v46  ;;  %v8887_v60 = vmul.bf16 %v8643_v25, %v8605_v52  ;;  %v5889_v15 = vcombine.high %v2998_v44, %v3001_v19  ;;  %v2751_v41 = vmul.bf16 %v8828_v18, %v8637_v48 }
 0x35e   :  { %2574 = vmatprep.mubr.bf16.mxu0 %v10082_v23  ;;  %v2902_v47 = vmax.bf16 %v5861_v38, %v2901_v24  ;;  %v3142_v21 = vmax.bf16 %v5888_v30, %v3141_v55  ;;  %v5866_v50 = vcombine.high %v2763_v29, %v2763_v29  ;;  %v2917_v59 = vmax.bf16 %v2915_v31, %v2913_v3  ;;  %v8899_v24 = vld [vmem:[#allocation2 + $0x38] sm:$0xf] }
 0x35f   :  { %v3155_v51 = vsel %vm897_vm0, %v5893_v5, 4286644096  ;;  %v2754_v23 = vmul.bf16 %v8666_v27, %v8828_v18  ;;  %v2992_v53 = vmul.bf16 %v8846_v1, %v8637_v48  ;;  %v2995_v19 = vmul.bf16 %v8666_v27, %v8846_v1 }
 0x360   :  { %v2903_v49 = vmax.bf16 %v8764_v63, %v2902_v47  ;;  %v3143_v0 = vmax.bf16 %v5889_v15, %v3142_v21  ;;  %v5894_v44 = vcombine.high %v3004_v46, %v3004_v46  ;;  %v5881_v38 = vcombine.low %v2991_v11, %v2994_v4 }
 0x361   :  { %v5882_v55 = vcombine.high %v2991_v11, %v2994_v4  ;;  %v2746_v30 = vmul.bf16 %v8664_v20, %v8899_v24  ;;  %v10083_v47 = vcombine.low %v8652_v35, %v8654_v57  ;;  %v10084_v63 = vcombine.low %v8771_v36, %v8771_v36 }
 0x362   :  { %2904 = vmax.xlane.bf16.xlu0 %v2903_v49  ;;  %v3144_v3 = vmax.bf16 %v8767_v12, %v3143_v0  ;;  %v3157_v31 = vmax.bf16 %v3155_v51, %v3153_v34  ;;  %v2747_v46 = vmul.bf16 %v8643_v25, %v8595_v45  ;;  %v10085_v11 = vcombine.high %v8670_v33, %v8670_v33  ;;  %v8934_v49 = vld [vmem:[#allocation2 + $0x4c] sm:$0xf] }
 0x363   :  { %2519 = vmatmul.mubr.bf16.gmra.mxu1 %v10083_v47  ;;  %v2923_v29 = vsel %vm897_vm0, %v10084_v63, 4286644096  ;;  %v2919_v4 = vsel %vm897_vm0, %v5866_v50, 4286644096  ;;  %v5855_v12 = vcombine.low %v2751_v41, %v2754_v23  ;;  %v2985_v35 = vmul.bf16 %v8708_v56, %v8605_v52 }
 0x364   :  { %2526 = vmatprep.mubr.bf16.mxu1 %v10085_v11  ;;  %v2988_v57 = vmul.bf16 %v8708_v56, %v8595_v45  ;;  %3145 = vmax.xlane.bf16.xlu1 %v3144_v3  ;;  %v10086_v36 = vcombine.low %v8635_v42, %v8614_v14  ;;  %v2921_v34 = vmax.bf16 %v2919_v4, %v2917_v59  ;;  %v3159_v45 = vsel %vm897_vm0, %v5894_v44, 4286644096 }
 0x365   :  { %v10087_v5 = vcombine.low %v8799_v13, %v8799_v13  ;;  %v5883_v21 = vcombine.low %v2992_v53, %v2995_v19  ;;  %v8928_v50 = vcombine.low %v2993_v28, %v2996_v26  ;;  %v10088_v52 = vcombine.high %v8637_v48, %v8666_v27 }
 0x366   :  { %2575 = vmatmul.mubr.bf16.gmra.mxu0 %v10086_v36  ;;  %v3135_v51 = vmax.bf16 %v5882_v55, %v5881_v38  ;;  %v2745_v59 = vmul.bf16 %v8828_v18, %v8635_v42  ;;  %v2748_v13 = vmul.bf16 %v8828_v18, %v8614_v14  ;;  %v8942_v0 = vrot.slane %v8775_v8, %v8639_v58 }
 0x367   :  { %v3163_v15 = vsel %vm897_vm0, %v10087_v5, 4286644096  ;;  %2582 = vmatprep.mubr.bf16.mxu0 %v10088_v52  ;;  %v3161_v26 = vmax.bf16 %v3159_v45, %v3157_v31  ;;  %v2749_v28 = vmul.bf16 %v8664_v20, %v8934_v49  ;;  %v5848_v3 = vcombine.low %v8887_v60, %v2747_v46 }
 0x368   :  { %10089 = vst [vmem:[#allocation67_spill] sm:$0xff] %v8942_v0  ;;  %v8949_v44 = vrot.slane %v8783_v16, %v8639_v58  ;;  %v2895_v38 = vmax.bf16 %v5855_v12, %v2894_v40  ;;  %v5849_v55 = vcombine.high %v8887_v60, %v2747_v46  ;;  %v5876_v47 = vcombine.low %v2985_v35, %v2988_v57 }
 0x369   :  { %v2925_v63 = vmax.bf16 %v2923_v29, %v2921_v34  ;;  %v3136_v11 = vmax.bf16 %v5883_v21, %v3135_v51  ;;  %v2986_v8 = vmul.bf16 %v8846_v1, %v8635_v42  ;;  %v2989_v31 = vmul.bf16 %v8846_v1, %v8614_v14 }
 0x36a   :  { %10090 = vst [vmem:[#allocation27_spill] sm:$0xff] %v8949_v44  ;;  %v5856_v4 = vcombine.high %v2751_v41, %v2754_v23  ;;  %v5850_v36 = vcombine.low %v2745_v59, %v2748_v13  ;;  %v5877_v5 = vcombine.high %v2985_v35, %v2988_v57  ;;  %v2738_v52 = vmul.bf16 %v8643_v25, %v8570_v9 }
 0x36b   :  { %2926 = vmax.xlane.bf16.xlu0 %v2925_v63  ;;  %v3165_v16 = vmax.bf16 %v3163_v15, %v3161_v26  ;;  %v10091_v40 = vcombine.low %v8670_v33, %v8670_v33  ;;  %v5884_v60 = vcombine.high %v2992_v53, %v2995_v19  ;;  %v2741_v29 = vmul.bf16 %v8643_v25, %v8568_v43 }
 0x36c   :  { %v8965_v42 = vrot.slane %v8779_v6, %v8639_v58  ;;  %v10092_v14 = vcombine.high %v8700_v61, %v8700_v61  ;;  %v2896_v41 = vmax.bf16 %v5856_v4, %v2895_v38  ;;  %v2888_v23 = vmax.bf16 %v5849_v55, %v5848_v3  ;;  %v8998_v38 = vld [vmem:[#allocation3 + $0xa0] sm:$0xff] }
 0x36d   :  { %2527 = vmatmul.mubr.bf16.gmra.mxu1 %v10091_v40  ;;  %v2987_v46 = vmul.bf16 %v8683_v10, %v8899_v24  ;;  %v8974_v33 = vcombine.low %v8942_v0, %v8949_v44  ;;  %3166 = vmax.xlane.bf16.xlu1 %v3165_v16  ;;  %v10093_v25 = vcombine.low %v8637_v48, %v8666_v27  ;;  %v2456_v53 = vrot.slane %v8575_v22, 1 }
 0x36e   :  { %2598 = vmatprep.mubr.bf16.mxu1 %v10092_v14  ;;  %v3137_v6 = vmax.bf16 %v5884_v60, %v3136_v11  ;;  %v5878_v19 = vcombine.low %v2986_v8, %v2989_v31  ;;  %v10094_v12 = vcombine.high %v8687_v17, %v8689_v39  ;;  %v2889_v35 = vmax.bf16 %v5850_v36, %v2888_v23  ;;  %v10098_v60 = vld [vmem:[#allocation42_spill] sm:$0xff] }
 0x36f   :  { %2583 = vmatmul.mubr.bf16.gmra.mxu0 %v10093_v25  ;;  %v3129_v57 = vmax.bf16 %v5877_v5, %v5876_v47  ;;  %v2739_v34 = vmul.bf16 %v8828_v18, %v8519_v2  ;;  %v2742_v15 = vmul.bf16 %v8828_v18, %v8514_v62  ;;  %v5843_v21 = vcombine.low %v2738_v52, %v2741_v29 }
 0x370   :  { %2590 = vmatprep.mubr.bf16.mxu0 %v10094_v12  ;;  %v5844_v45 = vcombine.high %v2738_v52, %v2741_v29  ;;  %v2979_v48 = vmul.bf16 %v8708_v56, %v8570_v9  ;;  %v2982_v27 = vmul.bf16 %v8708_v56, %v8568_v43  ;;  %v8993_v51 = vrot.slane %v8809_v32, %v8639_v58  ;;  %v9009_v32 = vld [vmem:[#allocation3 + $0xa8] sm:$0xff] }
 0x371   :  { %v2897_v26 = vmax.bf16 %v8872_v54, %v2896_v41  ;;  %v2990_v3 = vmul.bf16 %v8683_v10, %v8934_v49  ;;  %v3919_v18 = vmul.bf16 %v8998_v38, %v8758_v7  ;;  %v3138_v55 = vmax.bf16 %v8928_v50, %v3137_v6  ;;  %v9049_v6 = vld [vmem:[#allocation3 + $0x78] sm:$0xff] }
 0x372   :  { %v5851_v9 = vcombine.high %v2745_v59, %v2748_v13  ;;  %v5879_v47 = vcombine.high %v2986_v8, %v2989_v31  ;;  %v3130_v63 = vmax.bf16 %v5878_v19, %v3129_v57  ;;  %v5845_v43 = vcombine.low %v2739_v34, %v2742_v15  ;;  %v9053_v19 = vld [vmem:[#allocation3 + $0x8c] sm:$0xff] }
 0x373   :  { %v9005_v58 = vmul.bf16 %v8846_v1, %v8519_v2  ;;  %v2983_v56 = vmul.bf16 %v8846_v1, %v8514_v62  ;;  %v9013_v54 = vmul.bf16 %v9009_v32, %v8974_v33  ;;  %2898 = vmax.xlane.bf16.xlu0 %v2897_v26  ;;  %v10095_v50 = vcombine.low %v8700_v61, %v8700_v61 }
 0x374   :  { %v2890_v59 = vmax.bf16 %v5851_v9, %v2889_v35  ;;  %v2882_v13 = vmax.bf16 %v5844_v45, %v5843_v21  ;;  %v5871_v11 = vcombine.low %v2979_v48, %v2982_v27  ;;  %v5872_v2 = vcombine.high %v2979_v48, %v2982_v27  ;;  %v9065_v27 = vld [vmem:[#allocation3 + $0x80] sm:$0xff] }
 0x375   :  { %2599 = vmatmul.mubr.bf16.vlgmr.msra.gmra.mxu1 %v10095_v50  ;;  %v5982_v62 = vcombine.low %v3919_v18, %v3919_v18  ;;  %v5983_v1 = vcombine.high %v3919_v18, %v3919_v18  ;;  %v9022_v8 = vcombine.low %v8965_v42, %v8993_v51  ;;  %3139 = vmax.xlane.bf16.xlu1 %v3138_v55  ;;  %v10102_v55 = vld [vmem:[#allocation62_spill] sm:$0xff] }
 0x376   :  { %6418 = vmatpush3.bf16.xpose.msra.mxu1 %v2456_v53  ;;  %6419 = vmatprep.mubr.msk.bf16.mxu1 %vm6882_vm8, %v10016_v37  ;;  %v10096_v31 = vcombine.low %v8687_v17, %v8689_v39  ;;  %v5852_v61 = vcombine.low %v2746_v30, %v2749_v28  ;;  %v3131_v4 = vmax.bf16 %v5879_v47, %v3130_v63  ;;  %v10097_v39 = vld [vmem:[#allocation46_spill] sm:$0xff] }
 0x377   :  { %v5880_v36 = vcombine.low %v2987_v46, %v2990_v3  ;;  %v2883_v5 = vmax.bf16 %v5845_v43, %v2882_v13  ;;  %v5873_v52 = vcombine.low %v9005_v58, %v2983_v56  ;;  %v5984_v16 = vcombine.low %v9013_v54, %v9013_v54  ;;  %6469 = vmatprep.subr.bf16.mxu1 %v10016_v37  ;;  %v10099_v53 = vld [vmem:[#allocation22_spill] sm:$0xff]  ;;  %v9069_v3 = vld [vmem:[#allocation3 + $0x94] sm:$0xff] }
 0x378   :  { %2591 = vmatmul.mubr.bf16.gmra.mxu0 %v10096_v31  ;;  %v2891_v17 = vmax.bf16 %v5852_v61, %v2890_v59  ;;  %v2740_v40 = vmul.bf16 %v8664_v20, %v10097_v39  ;;  %v2743_v29 = vmul.bf16 %v8664_v20, %v10098_v60  ;;  %v5846_v14 = vcombine.high %v2739_v34, %v2742_v15  ;;  %v9057_v34 = vld [vmem:[#allocation3 + $0xb0] sm:$0xf]  ;;  %v10100_v15 = vld [vmem:[#allocation53_spill] sm:$0xff] }
 0x379   :  { %6449 = vmatprep.mubr.msk.bf16.mxu0 %vm6882_vm8, %v10016_v37  ;;  %v2981_v30 = vmul.bf16 %v8683_v10, %v10097_v39  ;;  %v3123_v28 = vmax.bf16 %v5872_v2, %v5871_v11  ;;  %v4064_v41 = vsel %vm897_vm0, %v5982_v62, 4286644096  ;;  %v4067_v23 = vsel %vm897_vm0, %v5983_v1, 4286644096 }
 0x37a   :  { %v3132_v46 = vmax.bf16 %v5880_v36, %v3131_v4  ;;  %v2984_v25 = vmul.bf16 %v8683_v10, %v10098_v60  ;;  %v4138_v20 = vmul.bf16 %v9049_v6, %v10099_v53  ;;  %v4141_v12 = vmul.bf16 %v9053_v19, %v10099_v53  ;;  %v9095_v36 = vld [vmem:[#allocation3 + $0x9c] sm:$0xf] }
 0x37b   :  { %v2884_v35 = vmax.bf16 %v5846_v14, %v2883_v5  ;;  %v3124_v57 = vmax.bf16 %v5873_v52, %v3123_v28  ;;  %v3921_v21 = vmul.bf16 %v9057_v34, %v10100_v15  ;;  %v4071_v45 = vsel %vm897_vm0, %v5984_v16, 4286644096  ;;  %2892 = vmax.xlane.bf16.xlu0 %v2891_v17  ;;  %v10103_v14 = vld [vmem:[#allocation63_spill] sm:$0xff] }
 0x37c   :  { %v10101_v10 = vcombine.low %v10097_v39, %v10098_v60  ;;  %v4069_v48 = vmax.bf16 %v4067_v23, %v4064_v41  ;;  %v4139_v26 = vmul.bf16 %v9065_v27, %v9022_v8  ;;  %v4142_v18 = vmul.bf16 %v9069_v3, %v9022_v8 }
 0x37d   :  { %v9075_v9 = vcombine.low %v10102_v55, %v10102_v55  ;;  %v5874_v47 = vcombine.high %v9005_v58, %v2983_v56  ;;  %v5824_v63 = vcombine.low %v8899_v24, %v8934_v49  ;;  %v5985_v43 = vcombine.high %v9013_v54, %v9013_v54  ;;  %3133 = vmax.xlane.bf16.xlu1 %v3132_v46  ;;  %v9091_v54 = vld [vmem:[#allocation3 + $0x88] sm:$0xf]  ;;  %v9242_v55 = vld [vmem:[#allocation3 + $0x24] sm:$0xf] }
 0x37e   :  { %6420 = vmatmul.mubr.bf16.vlgmr.msra.gmra.mxu1 %v10101_v10  ;;  %v5847_v50 = vcombine.low %v2740_v40, %v2743_v29  ;;  %v4073_v59 = vmax.bf16 %v4071_v45, %v4069_v48  ;;  %v6005_v13 = vcombine.low %v4138_v20, %v4141_v12  ;;  %v6006_v11 = vcombine.high %v4138_v20, %v4141_v12  ;;  %v6803_v29 = vld [vmem:[#allocation2 + $0x74] sm:$0xf]  ;;  %v9117_v45 = vld [vmem:[#allocation3 + $0x50] sm:$0xff] }
 0x37f   :  { %6423 = vmatprep.mubr.msk.bf16.mxu1 %vm6882_vm8, %v10016_v37  ;;  %v5875_v2 = vcombine.low %v2981_v30, %v2984_v25  ;;  %v3125_v62 = vmax.bf16 %v5874_v47, %v3124_v57  ;;  %v5986_v1 = vcombine.low %v3921_v21, %v3921_v21  ;;  %v4144_v58 = vmul.bf16 %v8998_v38, %v10099_v53 }
 0x380   :  { %v2885_v56 = vmax.bf16 %v5847_v50, %v2884_v35  ;;  %v6007_v31 = vcombine.low %v4139_v26, %v4142_v18  ;;  %v3913_v61 = vmul.bf16 %v9049_v6, %v8758_v7  ;;  %v3916_v24 = vmul.bf16 %v9053_v19, %v8758_v7 }
 0x381   :  { %v4075_v49 = vsel %vm897_vm0, %v5985_v43, 4286644096  ;;  %v4140_v4 = vmul.bf16 %v9091_v54, %v9075_v9  ;;  %v4143_v5 = vmul.bf16 %v9095_v36, %v9075_v9  ;;  %v9101_v52 = vmul.bf16 %v9009_v32, %v9022_v8 }
 0x382   :  { %v4077_v16 = vmax.bf16 %v4075_v49, %v4073_v59  ;;  %v4282_v17 = vmax.bf16 %v6006_v11, %v6005_v13  ;;  %v9105_v39 = vmul.bf16 %v9065_v27, %v8974_v33  ;;  %v3917_v40 = vmul.bf16 %v9069_v3, %v8974_v33  ;;  %v9132_v13 = vld [vmem:[#allocation3 + $0x58] sm:$0xff] }
 0x383   :  { %v3126_v60 = vmax.bf16 %v5875_v2, %v3125_v62  ;;  %v5829_v30 = vcombine.low %v10103_v14, %v6803_v29  ;;  %v6010_v28 = vcombine.low %v4144_v58, %v4144_v58  ;;  %v6011_v41 = vcombine.high %v4144_v58, %v4144_v58  ;;  %2886 = vmax.xlane.bf16.xlu0 %v2885_v56 }
 0x384   :  { %v4079_v23 = vsel %vm897_vm0, %v5986_v1, 4286644096  ;;  %v4283_v46 = vmax.bf16 %v6007_v31, %v4282_v17  ;;  %v5977_v25 = vcombine.low %v3913_v61, %v3916_v24  ;;  %v5978_v20 = vcombine.high %v3913_v61, %v3916_v24  ;;  %v9138_v1 = vld [vmem:[#allocation3 + $0x6c] sm:$0xff] }
 0x385   :  { %v6008_v12 = vcombine.high %v4139_v26, %v4142_v18  ;;  %v6009_v35 = vcombine.low %v4140_v4, %v4143_v5  ;;  %v3915_v57 = vmul.bf16 %v9091_v54, %v10100_v15  ;;  %v6012_v21 = vcombine.low %v9101_v52, %v9101_v52  ;;  %3127 = vmax.xlane.bf16.xlu1 %v3126_v60  ;;  %v9122_v26 = vld [vmem:[#allocation3 + $0x64] sm:$0xff] }
 0x386   :  { %6424 = vmatmul.mubr.bf16.gmra.mxu1 %v5824_v63  ;;  %v4081_v10 = vmax.bf16 %v4079_v23, %v4077_v16  ;;  %v5979_v48 = vcombine.low %v9105_v39, %v3917_v40  ;;  %v3907_v47 = vmul.bf16 %v8758_v7, %v9117_v45  ;;  %v3910_v18 = vmul.bf16 %v9122_v26, %v8758_v7  ;;  %v6806_v23 = vld [vmem:[#allocation2 + $0x88] sm:$0xf] }
 0x387   :  { %6427 = vmatprep.mubr.msk.bf16.mxu1 %vm6882_vm8, %v10016_v37  ;;  %v3918_v63 = vmul.bf16 %v9095_v36, %v10100_v15  ;;  %v4146_v43 = vmul.bf16 %v9057_v34, %v9075_v9  ;;  %v4289_v50 = vsel %vm897_vm0, %v6010_v28, 4286644096  ;;  %v4292_v59 = vsel %vm897_vm0, %v6011_v41, 4286644096 }
 0x388   :  { %v4284_v11 = vmax.bf16 %v6008_v12, %v4283_v46  ;;  %v4057_v2 = vmax.bf16 %v5978_v20, %v5977_v25  ;;  %v9136_v62 = vmul.bf16 %v8974_v33, %v9132_v13  ;;  %v3911_v58 = vmul.bf16 %v9138_v1, %v8974_v33  ;;  %v6807_v46 = vld [vmem:[#allocation2 + $0x9c] sm:$0xf] }
 0x389   :  { %v5980_v56 = vcombine.high %v9105_v39, %v3917_v40  ;;  %v4296_v31 = vsel %vm897_vm0, %v6012_v21, 4286644096  ;;  %v4132_v61 = vmul.bf16 %v10099_v53, %v9117_v45  ;;  %v4135_v24 = vmul.bf16 %v9122_v26, %v10099_v53  ;;  %v9157_v12 = vld [vmem:[#allocation3 + $0x28] sm:$0xff]  ;;  %v9159_v21 = vld [vmem:[#allocation3 + $0x3c] sm:$0xff] }
 0x38a   :  { %v4058_v49 = vmax.bf16 %v5979_v48, %v4057_v2  ;;  %v4294_v4 = vmax.bf16 %v4292_v59, %v4289_v50  ;;  %v5972_v5 = vcombine.low %v3907_v47, %v3910_v18  ;;  %v5973_v16 = vcombine.high %v3907_v47, %v3910_v18  ;;  %v9171_v50 = vld [vmem:[#allocation3 + $0x30] sm:$0xff] }
 0x38b   :  { %v6013_v17 = vcombine.high %v9101_v52, %v9101_v52  ;;  %v6014_v60 = vcombine.low %v4146_v43, %v4146_v43  ;;  %v4133_v29 = vmul.bf16 %v9022_v8, %v9132_v13  ;;  %v4136_v39 = vmul.bf16 %v9138_v1, %v9022_v8  ;;  %4082 = vmax.xlane.bf16.xlu0 %v4081_v10 }
 0x38c   :  { %v4285_v40 = vmax.bf16 %v6009_v35, %v4284_v11  ;;  %v4298_v14 = vmax.bf16 %v4296_v31, %v4294_v4  ;;  %v5974_v28 = vcombine.low %v9136_v62, %v3911_v58  ;;  %v5981_v41 = vcombine.low %v3915_v57, %v3918_v63  ;;  %v9161_v35 = vld [vmem:[#allocation3 + $0x60] sm:$0xf]  ;;  %v9173_v11 = vld [vmem:[#allocation3 + $0x74] sm:$0xf]  ;;  %v9177_v31 = vld [vmem:[#allocation3 + $0x44] sm:$0xff] }
 0x38d   :  { %v5834_v52 = vcombine.low %v6806_v23, %v6807_v46  ;;  %v6000_v25 = vcombine.low %v4132_v61, %v4135_v24  ;;  %v6001_v20 = vcombine.high %v4132_v61, %v4135_v24  ;;  %v4059_v10 = vmax.bf16 %v5980_v56, %v4058_v49 }
 0x38e   :  { %6428 = vmatmul.mubr.bf16.gmra.mxu1 %v5829_v30  ;;  %4286 = vmax.xlane.bf16.xlu1 %v4285_v40  ;;  %v4051_v30 = vmax.bf16 %v5973_v16, %v5972_v5  ;;  %v3901_v57 = vmul.bf16 %v8758_v7, %v9157_v12  ;;  %v3904_v48 = vmul.bf16 %v8758_v7, %v9159_v21  ;;  %v4300_v47 = vsel %vm897_vm0, %v6013_v17, 4286644096 }
 0x38f   :  { %6431 = vmatprep.mubr.msk.bf16.mxu1 %vm6882_vm8, %v10016_v37  ;;  %v4304_v18 = vsel %vm897_vm0, %v6014_v60, 4286644096  ;;  %v3909_v63 = vmul.bf16 %v10100_v15, %v9161_v35  ;;  %v6002_v43 = vcombine.low %v4133_v29, %v4136_v39  ;;  %v4302_v59 = vmax.bf16 %v4300_v47, %v4298_v14 }
 0x390   :  { %v3912_v2 = vmul.bf16 %v9173_v11, %v10100_v15  ;;  %v4052_v56 = vmax.bf16 %v5974_v28, %v4051_v30  ;;  %v9181_v61 = vmul.bf16 %v8974_v33, %v9171_v50  ;;  %v4276_v24 = vmax.bf16 %v6001_v20, %v6000_v25 }
 0x391   :  { %v3905_v49 = vmul.bf16 %v8974_v33, %v9177_v31  ;;  %v4126_v4 = vmul.bf16 %v10099_v53, %v9157_v12  ;;  %v4129_v5 = vmul.bf16 %v10099_v53, %v9159_v21  ;;  %v4060_v16 = vmax.bf16 %v5981_v41, %v4059_v10 }
 0x392   :  { %v5975_v17 = vcombine.high %v9136_v62, %v3911_v58  ;;  %v4134_v60 = vmul.bf16 %v9075_v9, %v9161_v35  ;;  %v5967_v40 = vcombine.low %v3901_v57, %v3904_v48  ;;  %v4277_v14 = vmax.bf16 %v6002_v43, %v4276_v24  ;;  %v9201_v24 = vld [vmem:[#allocation3 + $0x38] sm:$0xf] }
 0x393   :  { %v5968_v28 = vcombine.high %v3901_v57, %v3904_v48  ;;  %v4127_v23 = vmul.bf16 %v9022_v8, %v9171_v50  ;;  %v4130_v46 = vmul.bf16 %v9022_v8, %v9177_v31  ;;  %4061 = vmax.xlane.bf16.xlu0 %v4060_v16  ;;  %v4306_v25 = vmax.bf16 %v4304_v18, %v4302_v59  ;;  %v6809_v57 = vld [vmem:[#allocation2 + $0xb0] sm:$0xf]  ;;  %v9203_v59 = vld [vmem:[#allocation3] sm:$0xff] }
 0x394   :  { %v4137_v41 = vmul.bf16 %v9173_v11, %v9075_v9  ;;  %v6003_v20 = vcombine.high %v4133_v29, %v4136_v39  ;;  %v4053_v62 = vmax.bf16 %v5975_v17, %v4052_v56  ;;  %v5969_v58 = vcombine.low %v9181_v61, %v3905_v49  ;;  %v9205_v29 = vld [vmem:[#allocation3 + $0x14] sm:$0xff]  ;;  %v9207_v56 = vld [vmem:[#allocation3 + $0x4c] sm:$0xf] }
 0x395   :  { %v5995_v10 = vcombine.low %v4126_v4, %v4129_v5  ;;  %v5996_v30 = vcombine.high %v4126_v4, %v4129_v5  ;;  %v5839_v48 = vcombine.low %v6809_v57, %v6809_v57  ;;  %v5976_v47 = vcombine.low %v3909_v63, %v3912_v2 }
 0x396   :  { %6432 = vmatmul.mubr.bf16.gmra.mxu1 %v5834_v52  ;;  %4307 = vmax.xlane.bf16.xlu1 %v4306_v25  ;;  %v4278_v43 = vmax.bf16 %v6003_v20, %v4277_v14  ;;  %v4045_v52 = vmax.bf16 %v5968_v28, %v5967_v40  ;;  %v5997_v18 = vcombine.low %v4127_v23, %v4130_v46  ;;  %v9217_v14 = vld [vmem:[#allocation3 + $0x8] sm:$0xff] }
 0x397   :  { %6435 = vmatprep.mubr.msk.bf16.mxu1 %vm6882_vm8, %v10016_v37  ;;  %v6004_v39 = vcombine.low %v4134_v60, %v4137_v41  ;;  %v3903_v16 = vmul.bf16 %v10100_v15, %v9201_v24  ;;  %v3895_v4 = vmul.bf16 %v8758_v7, %v9203_v59  ;;  %v3898_v63 = vmul.bf16 %v8758_v7, %v9205_v29  ;;  %v9219_v60 = vld [vmem:[#allocation3 + $0x1c] sm:$0xff] }
 0x398   :  { %v4054_v2 = vmax.bf16 %v5976_v47, %v4053_v62  ;;  %v3906_v5 = vmul.bf16 %v10100_v15, %v9207_v56  ;;  %v4046_v17 = vmax.bf16 %v5969_v58, %v4045_v52  ;;  %v4270_v40 = vmax.bf16 %v5996_v30, %v5995_v10 }
 0x399   :  { %v3896_v28 = vmul.bf16 %v8974_v33, %v9217_v14  ;;  %v3899_v25 = vmul.bf16 %v8974_v33, %v9219_v60  ;;  %v4120_v41 = vmul.bf16 %v10099_v53, %v9203_v59  ;;  %v4123_v7 = vmul.bf16 %v10099_v53, %v9205_v29 }
 0x39a   :  { %v4279_v20 = vmax.bf16 %v6004_v39, %v4278_v43  ;;  %v5970_v62 = vcombine.high %v9181_v61, %v3905_v49  ;;  %v4271_v58 = vmax.bf16 %v5997_v18, %v4270_v40  ;;  %v4121_v10 = vmul.bf16 %v9022_v8, %v9217_v14  ;;  %v9240_v40 = vld [vmem:[#allocation3 + $0x10] sm:$0xf] }
 0x39b   :  { %4055 = vmax.xlane.bf16.xlu0 %v4054_v2  ;;  %v5962_v30 = vcombine.low %v3895_v4, %v3898_v63  ;;  %v5963_v57 = vcombine.high %v3895_v4, %v3898_v63  ;;  %v4124_v33 = vmul.bf16 %v9022_v8, %v9219_v60  ;;  %v4128_v47 = vmul.bf16 %v9075_v9, %v9201_v24 }
 0x39c   :  { %v4131_v53 = vmul.bf16 %v9075_v9, %v9207_v56  ;;  %v5998_v43 = vcombine.high %v4127_v23, %v4130_v46  ;;  %v4047_v61 = vmax.bf16 %v5970_v62, %v4046_v17  ;;  %v5964_v49 = vcombine.low %v3896_v28, %v3899_v25 }
 0x39d   :  { %v5990_v52 = vcombine.low %v4120_v41, %v4123_v7  ;;  %v5971_v18 = vcombine.low %v3903_v16, %v3906_v5  ;;  %v4039_v4 = vmax.bf16 %v5963_v57, %v5962_v30  ;;  %v5992_v63 = vcombine.low %v4121_v10, %v4124_v33 }
 0x39e   :  { %6436 = vmatmul.mubr.bf16.gmra.mxu1 %v5839_v48  ;;  %4280 = vmax.xlane.bf16.xlu1 %v4279_v20  ;;  %v5991_v48 = vcombine.high %v4120_v41, %v4123_v7  ;;  %v4272_v39 = vmax.bf16 %v5998_v43, %v4271_v58  ;;  %v5999_v2 = vcombine.low %v4128_v47, %v4131_v53 }
 0x39f   :  { %6479 = vmatprep.mubr.msk.bf16.mxu1 %vm6882_vm8, %v10016_v37  ;;  %v4048_v8 = vmax.bf16 %v5971_v18, %v4047_v61  ;;  %v4040_v44 = vmax.bf16 %v5964_v49, %v4039_v4  ;;  %v3897_v23 = vmul.bf16 %v10100_v15, %v9240_v40  ;;  %v3900_v17 = vmul.bf16 %v10100_v15, %v9242_v55 }
 0x3a0   :  { %v4264_v0 = vmax.bf16 %v5991_v48, %v5990_v52  ;;  %v4273_v46 = vmax.bf16 %v5999_v2, %v4272_v39  ;;  %v5965_v16 = vcombine.high %v3896_v28, %v3899_v25  ;;  %v4122_v7 = vmul.bf16 %v9075_v9, %v9240_v40 }
 0x3a1   :  { %v4125_v20 = vmul.bf16 %v9075_v9, %v9242_v55  ;;  %v5993_v62 = vcombine.high %v4121_v10, %v4124_v33  ;;  %v5966_v58 = vcombine.low %v3897_v23, %v3900_v17  ;;  %v6622_v17 = vld [vmem:[%s9749_s4 + $0x24] sm:$0xff]  }
 0x3a2   :  { %v4265_v5 = vmax.bf16 %v5992_v63, %v4264_v0  ;;  %v4041_v41 = vmax.bf16 %v5965_v16, %v4040_v44  ;;  %v10104_v16 = vld [vmem:[#allocation33_spill] sm:$0xff] }
 0x3a3   :  { %4049 = vmax.xlane.bf16.xlu0 %v4048_v8  ;;  %v5994_v47 = vcombine.low %v4122_v7, %v4125_v20  ;;  %v10105_v7 = vld [vmem:[#allocation35_spill] sm:$0xff] }
 0x3a4   :  { %v4266_v30 = vmax.bf16 %v5993_v62, %v4265_v5  ;;  %v4042_v57 = vmax.bf16 %v5966_v58, %v4041_v41  ;;  %v6623_v58 = vld [vmem:[%s9749_s4 + $0x2c] sm:$0xff]  }
 0x3a6   :  { %4274 = vmax.xlane.bf16.xlu1 %v4273_v46  ;;  %v4267_v53 = vmax.bf16 %v5994_v47, %v4266_v30 }
 0x3ab   :  { %4043 = vmax.xlane.bf16.xlu0 %v4042_v57 }
 0x3ae   :  { %4268 = vmax.xlane.bf16.xlu1 %v4267_v53 }
 0x3ef   :  { %v2905_v43 = vpop.xlane.xlu0 %2904 }
 0x3f1   :  { %v3146_v15 = vpop.xlane.xlu1 %3145 }
 0x3f2   :  { %v3183_v9 = vsel %vm3168_vm10, %v2905_v43, %v3146_v15 }
 0x3f8   :  { %v2927_v0 = vpop.xlane.xlu0 %2926 }
 0x3fa   :  { %v3167_v28 = vpop.xlane.xlu1 %3166 }
 0x3fb   :  { %v3187_v44 = vsel %vm3168_vm10, %v2927_v0, %v3167_v28 }
 0x3fc   :  { %v3251_v25 = vsel %vm897_vm0, %v3187_v44, 0 }
 0x3fd   :  { %6440 = vmatpush3.bf16.msra.mxu0 %v3251_v25 }
 0x3fe   :  { %6441 = vmatprep.subr.bf16.mxu0 %v10016_v37 }
 0x400   :  { %v2899_v10 = vpop.xlane.xlu0 %2898 }
 0x401   :  { %6442 = vmatpush3.bf16.msra.mxu0 %v3183_v9  ;;  %v6624_v9 = vld [vmem:[%s9749_s4 + $0x34] sm:$0xff]  }
 0x402   :  { %v3140_v33 = vpop.xlane.xlu1 %3139  ;;  %6443 = vmatprep.subr.bf16.mxu0 %v10016_v37 }
 0x403   :  { %v3179_v61 = vsel %vm3168_vm10, %v2899_v10, %v3140_v33 }
 0x405   :  { %6444 = vmatpush3.bf16.msra.mxu0 %v3179_v61 }
 0x406   :  { %6445 = vmatprep.subr.bf16.mxu0 %v10016_v37 }
 0x408   :  { %v2893_v49 = vpop.xlane.xlu0 %2892 }
 0x40a   :  { %v3134_v52 = vpop.xlane.xlu1 %3133  ;;  %v2496_v18 = vpop.f32.mrf.mxu1 }
 0x40b   :  { %v3175_v48 = vsel %vm3168_vm10, %v2893_v49, %v3134_v52 }
 0x40c   :  { %6446 = vmatpush3.bf16.msra.mxu0 %v3175_v48  ;;  %v2498_v39 = vpop.f32.mrf.mxu1 }
 0x40d   :  { %6447 = vmatprep.subr.bf16.mxu0 %v10016_v37 }
 0x40e   :  { %v2499_v4 = vpop.f32.mrf.mxu1 }
 0x410   :  { %v2501_v63 = vpop.f32.mrf.mxu1  ;;  %v2887_v8 = vpop.xlane.xlu0 %2886 }
 0x411   :  { %v6625_v63 = vld [vmem:[%s9749_s4 + $0x3c] sm:$0xff]  }
 0x412   :  { %v3128_v2 = vpop.xlane.xlu1 %3127  ;;  %v2504_v46 = vpop.f32.mrf.mxu1 }
 0x413   :  { %v3171_v23 = vsel %vm3168_vm10, %v2887_v8, %v3128_v2 }
 0x414   :  { %6448 = vmatpush3.bf16.msra.mxu0 %v3171_v23  ;;  %v2506_v5 = vpop.f32.mrf.mxu1 }
 0x415   :  { %3648 = vmatprep.subr.bf16.mxu0 %v10104_v16 }
 0x416   :  { %v9267_v41 = vpop.f32.mrf.mxu1 }
 0x417   :  { %6450 = vmatmul.mubr.msk.bf16.vlgmr.msra.gmra.mxu0 %vm3235_vm11, %v6622_v17 }
 0x418   :  { %3649 = vmatpush1.bf16.xpose.msra.mxu0 %v10105_v7  ;;  %6453 = vmatprep.mubr.msk.bf16.mxu0 %vm6882_vm8, %v10016_v37  ;;  %v2509_v20 = vpop.f32.mrf.mxu1 }
 0x419   :  { %6499 = vmatprep.subr.bf16.mxu0 %v10016_v37  ;;  %v6626_v20 = vld [vmem:[%s9749_s4 + $0x44] ss:$0 sps:$4 sm:$0xff]  }
 0x41b   :  { %v9273_v62 = vpop.f32.mrf.mxu1 }
 0x41c   :  { %v2568_v30 = vpop.f32.mrf.mxu0 }
 0x41d   :  { %v2514_v57 = vpop.f32.mrf.mxu1  ;;  %v2569_v47 = vadd.f32 %v2568_v30, %v2496_v18 }
 0x41e   :  { %v2570_v53 = vpop.f32.mrf.mxu0  ;;  %v5935_v57 = vcombine.high %v9203_v59, %v9205_v29 }
 0x41f   :  { %6454 = vmatmul.mubr.msk.bf16.gmra.mxu0 %vm3235_vm11, %v6623_v58  ;;  %v9279_v43 = vpop.f32.mrf.mxu1 }
 0x420   :  { %6457 = vmatprep.mubr.msk.bf16.mxu0 %vm6882_vm8, %v10016_v37  ;;  %v2571_v15 = vpop.f32.mrf.mxu0 }
 0x421   :  { %v2517_v0 = vpop.f32.mrf.mxu1  ;;  %v2572_v28 = vadd.f32 %v2571_v15, %v2499_v4 }
 0x422   :  { %v2573_v44 = vpop.f32.mrf.mxu0 }
 0x423   :  { %v9283_v25 = vpop.f32.mrf.mxu1 }
 0x425   :  { %v2522_v33 = vpop.f32.mrf.mxu1 }
 0x426   :  { %v2576_v10 = vpop.f32.mrf.mxu0  ;;  %v5934_v33 = vcombine.low %v9203_v59, %v9205_v29  ;;  %v5939_v29 = vcombine.low %v9157_v12, %v9159_v21 }
 0x427   :  { %v2577_v61 = vadd.f32 %v2576_v10, %v2504_v46  ;;  %6458 = vmatmul.mubr.msk.bf16.gmra.mxu0 %vm3235_vm11, %v6624_v9  ;;  %v9289_v52 = vpop.f32.mrf.mxu1 }
 0x428   :  { %v2578_v49 = vpop.f32.mrf.mxu0  ;;  %6461 = vmatprep.mubr.msk.bf16.mxu0 %vm6882_vm8, %v10016_v37 }
 0x429   :  { %v2525_v18 = vpop.f32.mrf.mxu1 }
 0x42a   :  { %v2579_v48 = vpop.f32.mrf.mxu0 }
 0x42c   :  { %v2581_v39 = vpop.f32.mrf.mxu0 }
 0x42d   :  { %v9293_v4 = vpop.f32.mrf.mxu1  ;;  %v5940_v39 = vcombine.high %v9157_v12, %v9159_v21  ;;  %v5944_v12 = vcombine.low %v9117_v45, %v9122_v26 }
 0x42f   :  { %v2584_v8 = vpop.f32.mrf.mxu0  ;;  %v2530_v2 = vpop.f32.mrf.mxu1  ;;  %6462 = vmatmul.mubr.msk.bf16.gmra.mxu0 %vm3235_vm11, %v6625_v63 }
 0x430   :  { %6465 = vmatprep.mubr.msk.bf16.mxu0 %vm6882_vm8, %v10016_v37 }
 0x431   :  { %v2586_v23 = vpop.f32.mrf.mxu0  ;;  %v2531_v46 = vpop.f32.mrf.mxu1 }
 0x433   :  { %v2587_v17 = vpop.f32.mrf.mxu0  ;;  %v2532_v16 = vpop.f32.mrf.mxu1 }
 0x435   :  { %v2589_v5 = vpop.f32.mrf.mxu0  ;;  %v9301_v7 = vpop.f32.mrf.mxu1 }
 0x437   :  { %v2602_v30 = vpop.f32.mrf.mxu1  ;;  %6466 = vmatmul.mubr.msk.bf16.gmra.mxu0 %vm3235_vm11, %v6626_v20  ;;  %v2580_v20 = vadd.f32 %v2579_v48, %v9267_v41  ;;  %v2588_v41 = vadd.f32 %v2587_v17, %v9279_v43  ;;  %v5950_v48 = vcombine.high %v9049_v6, %v9053_v19 }
 0x438   :  { %v9306_v58 = vpop.f32.mrf.mxu0  ;;  %3666 = vmatprep.mubr.bf16.mxu0 %v5935_v57 }
 0x439   :  { %v2603_v15 = vpop.f32.mrf.mxu1 }
 0x43a   :  { %v2594_v53 = vpop.f32.mrf.mxu0 }
 0x43b   :  { %v2604_v44 = vpop.f32.mrf.mxu1 }
 0x43c   :  { %v2595_v0 = vpop.f32.mrf.mxu0 }
 0x43e   :  { %v2597_v9 = vpop.f32.mrf.mxu0  ;;  %v2640_v10 = vpop.f32.mrf.mxu1 }
 0x43f   :  { %v2641_v18 = vadd.f32 %v2640_v10, %v2569_v47  ;;  %3667 = vmatmul.mubr.bf16.vlgmr.msra.gmra.mxu0 %v5934_v33  ;;  %v2585_v10 = vadd.f32 %v2584_v8, %v9273_v62  ;;  %v5949_v8 = vcombine.low %v9049_v6, %v9053_v19  ;;  %v5954_v6 = vcombine.low %v8998_v38, %v8998_v38 }
 0x440   :  { %v6421_v49 = vpop.f32.mrf.mxu1  ;;  %6500 = vmatpush3.bf16.xpose.msra.mxu0 %v8575_v22  ;;  %3674 = vmatprep.mubr.bf16.mxu0 %v5940_v39 }
 0x441   :  { %6551 = vmatprep.subr.bf16.mxu0 %v10016_v37  ;;  %v9317_v46 = vmul.f32 0.0015625, %v2641_v18 }
 0x442   :  { %v2643_v63 = vpop.f32.mrf.mxu1 }
 0x443   :  { %v2644_v2 = vadd.f32 %v2643_v63, %v2572_v28  ;;  %v5945_v28 = vcombine.high %v9117_v45, %v9122_v26  ;;  %v5955_v26 = vcombine.high %v8998_v38, %v8998_v38  ;;  %v5938_v38 = vcombine.low %v9240_v40, %v9242_v55  ;;  %v6633_v55 = vld [vmem:[%s9749_s4] sm:$0xff]   ;;  %v10106_v40 = vld [vmem:[#allocation57_spill] sm:$0xff] }
 0x444   :  { %v6422_v23 = vpop.f32.mrf.mxu1 }
 0x445   :  { %v9319_v16 = vmul.f32 0.0015625, %v2644_v2 }
 0x446   :  { %v2648_v5 = vpop.f32.mrf.mxu1 }
 0x447   :  { %v3197_v59 = vpack.c.bf16 %v9319_v16, %v9317_v46  ;;  %v2649_v22 = vadd.f32 %v2648_v5, %v2577_v61  ;;  %3675 = vmatmul.mubr.bf16.gmra.mxu0 %v5939_v29  ;;  %v2601_v5 = vadd.f32 %v9301_v7, %v9293_v4  ;;  %v2596_v29 = vadd.f32 %v2595_v0, %v9289_v52  ;;  %v6635_v46 = vld [vmem:[%s9749_s4 + $0x8] sm:$0xff]  }
 0x448   :  { %v6425_v47 = vpop.f32.mrf.mxu1  ;;  %3682 = vmatprep.mubr.bf16.mxu0 %v5945_v28  ;;  %v5958_v16 = vcombine.low %v9057_v34, %v9057_v34  ;;  %v6639_v34 = vld [vmem:[%s9749_s4 + $0x20] ss:$0 sps:$4 sm:$0xff]  }
 0x449   :  { %v2680_v15 = vmul.f32 0.0015625, %v2649_v22  ;;  %v2593_v22 = vadd.f32 %v9306_v58, %v9283_v25  ;;  %v5943_v58 = vcombine.low %v9201_v24, %v9207_v56  ;;  %v5948_v24 = vcombine.low %v9161_v35, %v9173_v11  ;;  %v10107_v56 = vld [vmem:[#allocation59_spill] sm:$0xff]  ;;  %v6637_v11 = vld [vmem:[%s9749_s4 + $0x10] sm:$0xff]  }
 0x44a   :  { %v2651_v30 = vpop.f32.mrf.mxu1  ;;  %v5953_v35 = vcombine.low %v9091_v54, %v9095_v36  ;;  %v6638_v54 = vld [vmem:[%s9749_s4 + $0x18] sm:$0xff]   ;;  %v4287_v36 = vpop.xlane.xlu1 %4286 }
 0x44b   :  { %v2652_v57 = vadd.f32 %v2651_v30, %v2580_v20 }
 0x44c   :  { %v6426_v53 = vpop.f32.mrf.mxu1 }
 0x44d   :  { %v2681_v44 = vmul.f32 0.0015625, %v2652_v57 }
 0x44e   :  { %v2656_v9 = vpop.f32.mrf.mxu1 }
 0x44f   :  { %v3198_v33 = vpack.c.bf16 %v2681_v44, %v2680_v15  ;;  %v2657_v61 = vadd.f32 %v2656_v9, %v2585_v10  ;;  %3683 = vmatmul.mubr.bf16.gmra.mxu0 %v5944_v12  ;;  %v4308_v44 = vpop.xlane.xlu1 %4307  ;;  %v4083_v9 = vpop.xlane.xlu0 %4082  ;;  %v5942_v12 = vcombine.high %v9171_v50, %v9177_v31 }
 0x450   :  { %v6429_v21 = vpop.f32.mrf.mxu1  ;;  %3690 = vmatprep.mubr.bf16.mxu0 %v5950_v48  ;;  %v4327_v10 = vsel %vm3168_vm10, %v4083_v9, %v4308_v44 }
 0x451   :  { %v2682_v63 = vmul.f32 0.0015625, %v2657_v61  ;;  %v4390_v21 = vsel %vm897_vm0, %v4327_v10, 0  ;;  %v6646_v10 = vld [vmem:[%s9750_s5 + $0x2c] sm:$0xff]  }
 0x452   :  { %v2659_v49 = vpop.f32.mrf.mxu1 }
 0x453   :  { %v2660_v18 = vadd.f32 %v2659_v49, %v2588_v41  ;;  %v4062_v41 = vpop.xlane.xlu0 %4061  ;;  %v4281_v48 = vpop.xlane.xlu1 %4280  ;;  %v5947_v49 = vcombine.high %v9132_v13, %v9138_v1 }
 0x454   :  { %v6430_v39 = vpop.f32.mrf.mxu1  ;;  %v4323_v61 = vsel %vm3168_vm10, %v4062_v41, %v4287_v36  ;;  %v6644_v36 = vld [vmem:[%s9750_s5 + $0x24] sm:$0xff]  }
 0x455   :  { %v2683_v2 = vmul.f32 0.0015625, %v2660_v18 }
 0x456   :  { %v2664_v23 = vpop.f32.mrf.mxu1 }
 0x457   :  { %v3199_v62 = vpack.c.bf16 %v2683_v2, %v2682_v63  ;;  %3691 = vmatmul.mubr.bf16.gmra.mxu0 %v5949_v8  ;;  %v2665_v57 = vadd.f32 %v2664_v23, %v2593_v22  ;;  %v4275_v39 = vpop.xlane.xlu1 %4274 }
 0x458   :  { %v6433_v45 = vpop.f32.mrf.mxu1  ;;  %3698 = vmatprep.mubr.bf16.mxu0 %v5955_v26  ;;  %v5957_v26 = vcombine.high %v9009_v32, %v9009_v32 }
 0x459   :  { %v2684_v0 = vmul.f32 0.0015625, %v2665_v57  ;;  %v5951_v45 = vcombine.low %v9065_v27, %v9069_v3 }
 0x45a   :  { %v2667_v43 = vpop.f32.mrf.mxu1 }
 0x45b   :  { %v2668_v28 = vadd.f32 %v2667_v43, %v2596_v29  ;;  %v4269_v23 = vpop.xlane.xlu1 %4268 }
 0x45c   :  { %v6434_v17 = vpop.f32.mrf.mxu1 }
 0x45d   :  { %v2685_v4 = vmul.f32 0.0015625, %v2668_v28  ;;  %v6883_v28 = vmov 1  }
 0x45e   :  { %v2672_v47 = vpop.f32.mrf.mxu1  ;;  %6592 = vset.pattern.permute.xlu1 %v6883_v28 }
 0x45f   :  { %v2673_v20 = vadd.f32 %v2672_v47, %v2601_v5  ;;  %3699 = vmatmul.mubr.bf16.gmra.mxu0 %v5954_v6  ;;  %v3200_v25 = vpack.c.bf16 %v2685_v4, %v2684_v0  ;;  %v6884_v6 = vmov 0  }
 0x460   :  { %v6437_v19 = vpop.f32.mrf.mxu1  ;;  %6501 = vmatprep.mubr.msk.bf16.mxu0 %vm6882_vm8, %v10016_v37  ;;  %6591 = vset.pattern.permute.xlu0 %v6884_v6 }
 0x461   :  { %v2686_v30 = vmul.f32 0.0015625, %v2673_v20 }
 0x462   :  { %v2675_v53 = vpop.f32.mrf.mxu1 }
 0x463   :  { %v3201_v15 = vpack.c.bf16 %v2686_v30, %v2686_v30 }
 0x464   :  { %v6438_v52 = vpop.f32.mrf.mxu1 }
 0x465   :  { %v3364_v7 = vsel %vm897_vm0, %v3201_v15, 0 }
 0x466   :  { %6470 = vmatpush3.bf16.msra.mxu1 %v3364_v7 }
 0x467   :  { %6471 = vmatprep.subr.bf16.mxu1 %v10016_v37  ;;  %6502 = vmatmul.mubr.bf16.vlgmr.msra.gmra.mxu0 %v5938_v38 }
 0x468   :  { %6505 = vmatprep.mubr.msk.bf16.mxu0 %vm6882_vm8, %v10016_v37 }
 0x46a   :  { %6472 = vmatpush3.bf16.msra.mxu1 %v3200_v25 }
 0x46b   :  { %6473 = vmatprep.subr.bf16.mxu1 %v10016_v37 }
 0x46e   :  { %6474 = vmatpush3.bf16.msra.mxu1 %v3199_v62  ;;  %v5952_v62 = vcombine.high %v9065_v27, %v9069_v3 }
 0x46f   :  { %6475 = vmatprep.subr.bf16.mxu1 %v10016_v37  ;;  %6506 = vmatmul.mubr.bf16.gmra.mxu0 %v5943_v58 }
 0x470   :  { %6509 = vmatprep.mubr.msk.bf16.mxu0 %vm6882_vm8, %v10016_v37 }
 0x472   :  { %6476 = vmatpush3.bf16.msra.mxu1 %v3198_v33  ;;  %v5936_v33 = vcombine.low %v9217_v14, %v9219_v60 }
 0x473   :  { %6477 = vmatprep.subr.bf16.mxu1 %v10016_v37 }
 0x476   :  { %6478 = vmatpush3.bf16.msra.mxu1 %v3197_v59  ;;  %v5937_v59 = vcombine.high %v9217_v14, %v9219_v60  ;;  %v5941_v14 = vcombine.low %v9171_v50, %v9177_v31  ;;  %v4056_v60 = vpop.xlane.xlu0 %4055  ;;  %v5946_v50 = vcombine.low %v9132_v13, %v9138_v1  ;;  %v5956_v13 = vcombine.low %v9009_v32, %v9009_v32 }
 0x477   :  { %3720 = vmatprep.subr.bf16.mxu1 %v10106_v40  ;;  %6510 = vmatmul.mubr.bf16.gmra.mxu0 %v5948_v24  ;;  %v4319_v18 = vsel %vm3168_vm10, %v4056_v60, %v4281_v48 }
 0x478   :  { %6513 = vmatprep.mubr.msk.bf16.mxu0 %vm6882_vm8, %v10016_v37 }
 0x479   :  { %6480 = vmatmul.mubr.msk.bf16.vlgmr.msra.gmra.mxu1 %vm3235_vm11, %v6633_v55 }
 0x47a   :  { %3721 = vmatpush1.bf16.xpose.msra.mxu1 %v10107_v56  ;;  %6483 = vmatprep.mubr.msk.bf16.mxu1 %vm6882_vm8, %v10016_v37  ;;  %v4050_v63 = vpop.xlane.xlu0 %4049 }
 0x47b   :  { %6521 = vmatprep.subr.bf16.mxu1 %v10016_v37  ;;  %v4315_v2 = vsel %vm3168_vm10, %v4050_v63, %v4275_v39 }
 0x47e   :  { %v4044_v31 = vpop.xlane.xlu0 %4043 }
 0x47f   :  { %6514 = vmatmul.mubr.bf16.gmra.mxu0 %v5953_v35  ;;  %v4311_v8 = vsel %vm3168_vm10, %v4044_v31, %v4269_v23  ;;  %v6652_v31 = vld [vmem:[%s9750_s5 + $0x44] ss:$0 sps:$4 sm:$0xff]  }
 0x480   :  { %6517 = vmatprep.mubr.msk.bf16.mxu0 %vm6882_vm8, %v10016_v37 }
 0x481   :  { %6484 = vmatmul.mubr.msk.bf16.gmra.mxu1 %vm3235_vm11, %v6635_v46 }
 0x482   :  { %6487 = vmatprep.mubr.msk.bf16.mxu1 %vm6882_vm8, %v10016_v37 }
 0x487   :  { %6518 = vmatmul.mubr.bf16.gmra.mxu0 %v5958_v16 }
 0x488   :  { %6561 = vmatprep.mubr.msk.bf16.mxu0 %vm6882_vm8, %v10016_v37 }
 0x489   :  { %6488 = vmatmul.mubr.msk.bf16.gmra.mxu1 %vm3235_vm11, %v6637_v11 }
 0x48a   :  { %6491 = vmatprep.mubr.msk.bf16.mxu1 %vm6882_vm8, %v10016_v37 }
 0x491   :  { %6492 = vmatmul.mubr.msk.bf16.gmra.mxu1 %vm3235_vm11, %v6638_v54 }
 0x492   :  { %6495 = vmatprep.mubr.msk.bf16.mxu1 %vm6882_vm8, %v10016_v37 }
 0x499   :  { %6496 = vmatmul.mubr.msk.bf16.gmra.mxu1 %vm3235_vm11, %v6639_v34 }
 0x49a   :  { %3738 = vmatprep.mubr.bf16.mxu1 %v5937_v59 }
 0x4a1   :  { %3739 = vmatmul.mubr.bf16.vlgmr.msra.gmra.mxu1 %v5936_v33 }
 0x4a2   :  { %6522 = vmatpush3.bf16.msra.mxu1 %v4390_v21  ;;  %3746 = vmatprep.mubr.bf16.mxu1 %v5942_v12 }
 0x4a3   :  { %6523 = vmatprep.subr.bf16.mxu1 %v10016_v37 }
 0x4a6   :  { %6524 = vmatpush3.bf16.msra.mxu1 %v4323_v61  ;;  %v6648_v61 = vld [vmem:[%s9750_s5 + $0x34] sm:$0xff]  }
 0x4a7   :  { %6525 = vmatprep.subr.bf16.mxu1 %v10016_v37 }
 0x4a9   :  { %3747 = vmatmul.mubr.bf16.gmra.mxu1 %v5941_v14 }
 0x4aa   :  { %6526 = vmatpush3.bf16.msra.mxu1 %v4319_v18  ;;  %3754 = vmatprep.mubr.bf16.mxu1 %v5947_v49  ;;  %v6650_v18 = vld [vmem:[%s9750_s5 + $0x3c] sm:$0xff]  }
 0x4ab   :  { %6527 = vmatprep.subr.bf16.mxu1 %v10016_v37 }
 0x4ae   :  { %6528 = vmatpush3.bf16.msra.mxu1 %v4315_v2 }
 0x4af   :  { %6529 = vmatprep.subr.bf16.mxu1 %v10016_v37 }
 0x4b1   :  { %3755 = vmatmul.mubr.bf16.gmra.mxu1 %v5946_v50 }
 0x4b2   :  { %6530 = vmatpush3.bf16.msra.mxu1 %v4311_v8  ;;  %3762 = vmatprep.mubr.bf16.mxu1 %v5952_v62 }
 0x4b9   :  { %3763 = vmatmul.mubr.bf16.gmra.mxu1 %v5951_v45 }
 0x4ba   :  { %3770 = vmatprep.mubr.bf16.mxu1 %v5957_v26 }
 0x4c1   :  { %3771 = vmatmul.mubr.bf16.gmra.mxu1 %v5956_v13 }
 0x4c2   :  { %6531 = vmatprep.mubr.msk.bf16.mxu1 %vm6882_vm8, %v10016_v37 }
 0x4c9   :  { %6532 = vmatmul.mubr.msk.bf16.vlgmr.msra.gmra.mxu1 %vm3235_vm11, %v6644_v36 }
 0x4ca   :  { %6535 = vmatprep.mubr.msk.bf16.mxu1 %vm6882_vm8, %v10016_v37 }
 0x4d1   :  { %6536 = vmatmul.mubr.msk.bf16.gmra.mxu1 %vm3235_vm11, %v6646_v10 }
 0x4d2   :  { %6539 = vmatprep.mubr.msk.bf16.mxu1 %vm6882_vm8, %v10016_v37 }
 0x4d7   :  { %v9438_v1 = vpop.f32.mrf.mxu0 }
 0x4d9   :  { %v6451_v43 = vpop.f32.mrf.mxu0  ;;  %6540 = vmatmul.mubr.msk.bf16.gmra.mxu1 %vm3235_vm11, %v6648_v61 }
 0x4da   :  { %6543 = vmatprep.mubr.msk.bf16.mxu1 %vm6882_vm8, %v10016_v37 }
 0x4db   :  { %v9440_v17 = vpop.f32.mrf.mxu0 }
 0x4dd   :  { %v6452_v5 = vpop.f32.mrf.mxu0 }
 0x4df   :  { %v9442_v29 = vpop.f32.mrf.mxu0 }
 0x4e1   :  { %v6455_v27 = vpop.f32.mrf.mxu0  ;;  %6544 = vmatmul.mubr.msk.bf16.gmra.mxu1 %vm3235_vm11, %v6650_v18 }
 0x4e2   :  { %6547 = vmatprep.mubr.msk.bf16.mxu1 %vm6882_vm8, %v10016_v37 }
 0x4e3   :  { %v9444_v3 = vpop.f32.mrf.mxu0 }
 0x4e5   :  { %v6456_v47 = vpop.f32.mrf.mxu0 }
 0x4e7   :  { %v9446_v20 = vpop.f32.mrf.mxu0 }
 0x4e9   :  { %v6459_v22 = vpop.f32.mrf.mxu0  ;;  %6548 = vmatmul.mubr.msk.bf16.gmra.mxu1 %vm3235_vm11, %v6652_v31 }
 0x4eb   :  { %v9448_v32 = vpop.f32.mrf.mxu0 }
 0x4ed   :  { %v6460_v19 = vpop.f32.mrf.mxu0 }
 0x4ef   :  { %v9452_v30 = vpop.f32.mrf.mxu0 }
 0x4f1   :  { %v6463_v57 = vpop.f32.mrf.mxu0 }
 0x4f3   :  { %v9454_v53 = vpop.f32.mrf.mxu0 }
 0x4f5   :  { %v6464_v15 = vpop.f32.mrf.mxu0 }
 0x4f7   :  { %v9456_v4 = vpop.f32.mrf.mxu0 }
 0x4f9   :  { %v6467_v52 = vpop.f32.mrf.mxu0 }
 0x4fb   :  { %v3322_v7 = vpop.f32.mrf.mxu0 }
 0x4fd   :  { %v6468_v0 = vpop.f32.mrf.mxu0 }
 0x4ff   :  { %v9458_v38 = vpop.f32.mrf.mxu0 }
 0x501   :  { %v3670_v25 = vpop.f32.mrf.mxu0 }
 0x503   :  { %v9460_v58 = vpop.f32.mrf.mxu0 }
 0x505   :  { %v3673_v55 = vpop.f32.mrf.mxu0 }
 0x507   :  { %v9462_v40 = vpop.f32.mrf.mxu0 }
 0x509   :  { %v3678_v24 = vpop.f32.mrf.mxu0 }
 0x50b   :  { %v9464_v56 = vpop.f32.mrf.mxu0 }
 0x50d   :  { %v3681_v46 = vpop.f32.mrf.mxu0 }
 0x50f   :  { %v9466_v35 = vpop.f32.mrf.mxu0 }
 0x511   :  { %v3686_v11 = vpop.f32.mrf.mxu0 }
 0x513   :  { %v9468_v16 = vpop.f32.mrf.mxu0 }
 0x515   :  { %v3689_v54 = vpop.f32.mrf.mxu0 }
 0x517   :  { %v9470_v34 = vpop.f32.mrf.mxu0 }
 0x519   :  { %v3694_v59 = vpop.f32.mrf.mxu0 }
 0x51b   :  { %v9476_v44 = vpop.f32.mrf.mxu0 }
 0x51d   :  { %v3697_v9 = vpop.f32.mrf.mxu0 }
 0x51f   :  { %v9483_v33 = vpop.f32.mrf.mxu0 }
 0x521   :  { %v3702_v12 = vpop.f32.mrf.mxu0 }
 0x523   :  { %v3703_v21 = vpop.f32.mrf.mxu0 }
 0x525   :  { %v3704_v41 = vpop.f32.mrf.mxu0 }
 0x527   :  { %v9491_v48 = vpop.f32.mrf.mxu0 }
 0x529   :  { %v6503_v14 = vpop.f32.mrf.mxu0 }
 0x52b   :  { %v9494_v60 = vpop.f32.mrf.mxu0 }
 0x52d   :  { %v6504_v49 = vpop.f32.mrf.mxu0 }
 0x52f   :  { %v9501_v39 = vpop.f32.mrf.mxu0 }
 0x531   :  { %v6507_v63 = vpop.f32.mrf.mxu0 }
 0x533   :  { %v9504_v2 = vpop.f32.mrf.mxu0 }
 0x535   :  { %v6508_v23 = vpop.f32.mrf.mxu0 }
 0x537   :  { %v9511_v62 = vpop.f32.mrf.mxu0 }
 0x539   :  { %v3400_v50 = vpop.f32.mrf.mxu1  ;;  %v6511_v13 = vpop.f32.mrf.mxu0 }
 0x53a   :  { %v3401_v8 = vadd.f32 %v3400_v50, %v9438_v1 }
 0x53b   :  { %v6481_v45 = vpop.f32.mrf.mxu1  ;;  %v9515_v5 = vpop.f32.mrf.mxu0 }
 0x53c   :  { %v5925_v26 = vmul.f32 -1.442695, %v3401_v8 }
 0x53d   :  { %v3403_v43 = vpop.f32.mrf.mxu1  ;;  %v6512_v19 = vpop.f32.mrf.mxu0 }
 0x53e   :  { %6710 = vpow2.f32 %v5925_v26  ;;  %v3404_v27 = vadd.f32 %v3403_v43, %v9440_v17 }
 0x53f   :  { %v6482_v47 = vpop.f32.mrf.mxu1  ;;  %v9518_v15 = vpop.f32.mrf.mxu0 }
 0x540   :  { %v5926_v22 = vmul.f32 -1.442695, %v3404_v27 }
 0x541   :  { %v3408_v57 = vpop.f32.mrf.mxu1  ;;  %v6515_v0 = vpop.f32.mrf.mxu0 }
 0x542   :  { %6712 = vpow2.f32 %v5926_v22  ;;  %v3409_v1 = vadd.f32 %v3408_v57, %v9442_v29 }
 0x543   :  { %v6485_v52 = vpop.f32.mrf.mxu1  ;;  %v9521_v55 = vpop.f32.mrf.mxu0 }
 0x544   :  { %v5927_v7 = vmul.f32 -1.442695, %v3409_v1 }
 0x545   :  { %v3411_v25 = vpop.f32.mrf.mxu1  ;;  %v6516_v11 = vpop.f32.mrf.mxu0 }
 0x546   :  { %6714 = vpow2.f32 %v5927_v7  ;;  %v3412_v24 = vadd.f32 %v3411_v25, %v9444_v3 }
 0x547   :  { %v6486_v46 = vpop.f32.mrf.mxu1  ;;  %v9524_v36 = vpop.f32.mrf.mxu0 }
 0x548   :  { %v5928_v17 = vmul.f32 -1.442695, %v3412_v24 }
 0x549   :  { %v3416_v54 = vpop.f32.mrf.mxu1  ;;  %v6519_v12 = vpop.f32.mrf.mxu0 }
 0x54a   :  { %6716 = vpow2.f32 %v5928_v17  ;;  %v3417_v59 = vadd.f32 %v3416_v54, %v9446_v20 }
 0x54b   :  { %v6711_v9 = vpop.eup %6710  ;;  %v6489_v29 = vpop.f32.mrf.mxu1 }
 0x54c   :  { %v5929_v10 = vmul.f32 -1.442695, %v3417_v59  ;;  %v3465_v21 = vadd.f32 1.0, %v6711_v9  ;;  %v3847_v61 = vpop.f32.mrf.mxu0 }
 0x54d   :  { %v3419_v41 = vpop.f32.mrf.mxu1 }
 0x54e   :  { %v3420_v14 = vadd.f32 %v3419_v41, %v9448_v32  ;;  %6718 = vpow2.f32 %v5929_v10  ;;  %v6520_v23 = vpop.f32.mrf.mxu0 }
 0x54f   :  { %v6713_v49 = vpop.eup %6712  ;;  %v6490_v3 = vpop.f32.mrf.mxu1  ;;  %6720 = vrcp.f32 %v3465_v21 }
 0x550   :  { %v3466_v18 = vadd.f32 1.0, %v6713_v49  ;;  %v5930_v63 = vmul.f32 -1.442695, %v3420_v14 }
 0x551   :  { %v3424_v50 = vpop.f32.mrf.mxu1 }
 0x552   :  { %6722 = vrcp.f32 %v3466_v18  ;;  %v3425_v20 = vadd.f32 %v3424_v50, %v9452_v30 }
 0x553   :  { %v6715_v31 = vpop.eup %6714  ;;  %6724 = vpow2.f32 %v5930_v63  ;;  %v6493_v8 = vpop.f32.mrf.mxu1 }
 0x554   :  { %v3467_v45 = vadd.f32 1.0, %v6715_v31  ;;  %v5931_v26 = vmul.f32 -1.442695, %v3425_v20 }
 0x555   :  { %v3427_v13 = vpop.f32.mrf.mxu1 }
 0x556   :  { %v3428_v43 = vadd.f32 %v3427_v13, %v9454_v53  ;;  %6726 = vrcp.f32 %v3467_v45 }
 0x557   :  { %v6717_v32 = vpop.eup %6716  ;;  %v6494_v27 = vpop.f32.mrf.mxu1  ;;  %6728 = vpow2.f32 %v5931_v26 }
 0x558   :  { %v3468_v47 = vadd.f32 1.0, %v6717_v32  ;;  %v5932_v22 = vmul.f32 -1.442695, %v3428_v43 }
 0x559   :  { %v3432_v19 = vpop.f32.mrf.mxu1 }
 0x55a   :  { %6730 = vrcp.f32 %v3468_v47  ;;  %v3433_v57 = vadd.f32 %v3432_v19, %v9456_v4 }
 0x55b   :  { %6732 = vpow2.f32 %v5932_v22  ;;  %v6497_v30 = vpop.f32.mrf.mxu1  ;;  %v6719_v1 = vpop.eup %6718 }
 0x55c   :  { %v5933_v52 = vmul.f32 -1.442695, %v3433_v57  ;;  %v6721_v0 = vpop.eup %6720  ;;  %v3469_v53 = vadd.f32 1.0, %v6719_v1 }
 0x55d   :  { %v3435_v7 = vpop.f32.mrf.mxu1 }
 0x55e   :  { %6734 = vpow2.f32 %v5933_v52 }
 0x55f   :  { %v6723_v25 = vpop.eup %6722  ;;  %v6498_v24 = vpop.f32.mrf.mxu1 }
 0x560   :  { %v6725_v46 = vpop.eup %6724  ;;  %v3492_v17 = vpack.c.bf16 %v6723_v25, %v6721_v0 }
 0x561   :  { %v3470_v11 = vadd.f32 1.0, %v6725_v46  ;;  %v3740_v54 = vpop.f32.mrf.mxu1 }
 0x562   :  { %v3741_v59 = vadd.f32 %v3740_v54, %v9458_v38  ;;  %4890 = vperm.xlu1 %6592, %v3492_v17   ;;  %4638 = vperm.xlu0 %6591, %v3492_v17  }
 0x563   :  { %6736 = vrcp.f32 %v3470_v11  ;;  %v3742_v4 = vpop.f32.mrf.mxu1  ;;  %v6727_v9 = vpop.eup %6726 }
 0x564   :  { %6738 = vrcp.f32 %v3469_v53  ;;  %v6729_v10 = vpop.eup %6728  ;;  %v3813_v12 = vadd.f32 %v9491_v48, %v3741_v59 }
 0x565   :  { %v3743_v29 = vpop.f32.mrf.mxu1  ;;  %v3471_v63 = vadd.f32 1.0, %v6729_v10 }
 0x566   :  { %v3744_v21 = vadd.f32 %v3743_v29, %v9460_v58  ;;  %6593 = vset.pattern.permute.xlu1 %v6884_v6  ;;  %v9536_v23 = vmul.f32 0.0015625, %v3813_v12 }
 0x567   :  { %v6731_v41 = vpop.eup %6730  ;;  %v3745_v61 = vpop.f32.mrf.mxu1 }
 0x568   :  { %v6733_v14 = vpop.eup %6732  ;;  %v3816_v49 = vadd.f32 %v9494_v60, %v3744_v21  ;;  %v3493_v38 = vpack.c.bf16 %v6731_v41, %v6727_v9 }
 0x569   :  { %v3472_v3 = vadd.f32 1.0, %v6733_v14  ;;  %v3748_v18 = vpop.f32.mrf.mxu1 }
 0x56a   :  { %v9538_v50 = vmul.f32 0.0015625, %v3816_v49  ;;  %v3749_v20 = vadd.f32 %v3748_v18, %v9462_v40  ;;  %4643 = vperm.xlu1 %6593, %v3493_v38   ;;  %v6651_v18 = vld [vmem:[%s9750_s5 + $0x18] sm:$0xff]  }
 0x56b   :  { %v3750_v48 = vpop.f32.mrf.mxu1  ;;  %6740 = vrcp.f32 %v3472_v3  ;;  %v6735_v8 = vpop.eup %6734  ;;  %v6649_v3 = vld [vmem:[%s9750_s5 + $0x10] sm:$0xff]  }
 0x56c   :  { %v4337_v58 = vpack.c.bf16 %v9538_v50, %v9536_v23  ;;  %6742 = vrcp.f32 %v3471_v63  ;;  %v3821_v60 = vadd.f32 %v9501_v39, %v3749_v20  ;;  %v3473_v32 = vadd.f32 1.0, %v6735_v8  ;;  %v6653_v63 = vld [vmem:[%s9750_s5 + $0x20] ss:$0 sps:$4 sm:$0xff]   ;;  %v10110_v8 = vld [vmem:[#allocation70_spill] sm:$0xff] }
 0x56d   :  { %v3751_v31 = vpop.f32.mrf.mxu1  ;;  %v10108_v20 = vld [vmem:[#allocation43_spill] sm:$0xff] }
 0x56e   :  { %v3752_v45 = vadd.f32 %v3751_v31, %v9464_v56  ;;  %6594 = vset.pattern.permute.xlu1 %v6883_v28  ;;  %v3852_v47 = vmul.f32 0.0015625, %v3821_v60  ;;  %6744 = vrcp.f32 %v3473_v32 }
 0x56f   :  { %4894 = vperm.xlu1 %6594, %v3493_v38   ;;  %v3753_v26 = vpop.f32.mrf.mxu1 }
 0x570   :  { %v6737_v13 = vpop.eup %6736  ;;  %v3824_v40 = vadd.f32 %v9504_v2, %v3752_v45  ;;  %v10111_v45 = vld [vmem:[#allocation71_spill] sm:$0xff] }
 0x571   :  { %v6739_v43 = vpop.eup %6738  ;;  %v3756_v27 = vpop.f32.mrf.mxu1 }
 0x572   :  { %v3853_v22 = vmul.f32 0.0015625, %v3824_v40  ;;  %v3757_v19 = vadd.f32 %v3756_v27, %v9466_v35  ;;  %v3494_v57 = vpack.c.bf16 %v6737_v13, %v6739_v43  ;;  %v10112_v40 = vld [vmem:[#allocation40_spill] sm:$0xff]  ;;  %v10113_v43 = vld [vmem:[#allocation37_spill] sm:$0xff] }
 0x573   :  { %6595 = vset.pattern.permute.xlu1 %v6884_v6  ;;  %v3758_v39 = vpop.f32.mrf.mxu1  ;;  %v10114_v27 = vld [vmem:[#allocation36_spill] sm:$0xff] }
 0x574   :  { %v4338_v30 = vpack.c.bf16 %v3853_v22, %v3852_v47  ;;  %4648 = vperm.xlu1 %6595, %v3494_v57   ;;  %v3829_v1 = vadd.f32 %v9511_v62, %v3757_v19  ;;  %v10115_v22 = vld [vmem:[#allocation26_spill] sm:$0xff] }
 0x575   :  { %v3759_v56 = vpop.f32.mrf.mxu1 }
 0x576   :  { %v3760_v52 = vadd.f32 %v3759_v56, %v9468_v16  ;;  %v3854_v25 = vmul.f32 0.0015625, %v3829_v1  ;;  %v10116_v56 = vld [vmem:[#allocation28_spill] sm:$0xff] }
 0x577   :  { %v3761_v2 = vpop.f32.mrf.mxu1 }
 0x578   :  { %v3832_v7 = vadd.f32 %v9515_v5, %v3760_v52  ;;  %6596 = vset.pattern.permute.xlu1 %v6883_v28  ;;  %v6741_v0 = vpop.eup %6740 }
 0x579   :  { %4898 = vperm.xlu1 %6596, %v3494_v57   ;;  %v3764_v35 = vpop.f32.mrf.mxu1  ;;  %v6743_v53 = vpop.eup %6742 }
 0x57a   :  { %v3855_v24 = vmul.f32 0.0015625, %v3832_v7  ;;  %v3765_v46 = vadd.f32 %v3764_v35, %v9470_v34  ;;  %v3495_v54 = vpack.c.bf16 %v6741_v0, %v6743_v53  ;;  %v10117_v0 = vld [vmem:[#allocation38_spill] sm:$0xff] }
 0x57b   :  { %v3766_v17 = vpop.f32.mrf.mxu1  ;;  %v6745_v12 = vpop.eup %6744 }
 0x57c   :  { %v4339_v11 = vpack.c.bf16 %v3855_v24, %v3854_v25  ;;  %v3837_v16 = vadd.f32 %v9518_v15, %v3765_v46  ;;  %v4959_v24 = vld [vmem:[#allocation2] sm:$0xff]  ;;  %v4960_v46 = vld [vmem:[#allocation2 + $0x8] sm:$0xff] }
 0x57d   :  { %6597 = vset.pattern.permute.xlu1 %v6884_v6  ;;  %v3767_v62 = vpop.f32.mrf.mxu1 }
 0x57e   :  { %v3768_v5 = vadd.f32 %v3767_v62, %v9476_v44  ;;  %4653 = vperm.xlu1 %6597, %v3495_v54   ;;  %v3856_v29 = vmul.f32 0.0015625, %v3837_v16  ;;  %v3496_v44 = vpack.c.bf16 %v6745_v12, %v6745_v12  ;;  %v4961_v62 = vld [vmem:[#allocation2 + $0x10] sm:$0xf]  ;;  %v4962_v16 = vld [vmem:[#allocation2 + $0x14] sm:$0xff] }
 0x57f   :  { %v3769_v59 = vpop.f32.mrf.mxu1 }
 0x580   :  { %v3840_v4 = vadd.f32 %v9521_v55, %v3768_v5  ;;  %v4963_v5 = vld [vmem:[#allocation2 + $0x1c] sm:$0xff] }
 0x581   :  { %v3772_v9 = vpop.f32.mrf.mxu1 }
 0x582   :  { %v3857_v10 = vmul.f32 0.0015625, %v3840_v4  ;;  %v3773_v34 = vadd.f32 %v3772_v9, %v9483_v33  ;;  %6598 = vset.pattern.permute.xlu1 %v6883_v28  ;;  %v6645_v33 = vld [vmem:[%s9750_s5] sm:$0xff]  }
 0x583   :  { %4902 = vperm.xlu1 %6598, %v3495_v54   ;;  %v3774_v21 = vpop.f32.mrf.mxu1 }
 0x584   :  { %v4340_v41 = vpack.c.bf16 %v3857_v10, %v3856_v29  ;;  %v3845_v61 = vadd.f32 %v9524_v36, %v3773_v34  ;;  %v6647_v36 = vld [vmem:[%s9750_s5 + $0x8] sm:$0xff]   ;;  %v4964_v10 = vld [vmem:[#allocation2 + $0x24] sm:$0xf]  ;;  %s6885_s5 = smov [#allocation4]  }
 0x585   :  { %v3775_v15 = vpop.f32.mrf.mxu1  ;;  %s5726_s0 = sshll.u32 %s6885_s5, 4  ;;  %s5727_s0 = int_to_ptr.vmem [resolvable:$true] %s5726_s0 }
 0x586   :  { %v3858_v14 = vmul.f32 0.0015625, %v3845_v61  ;;  %s6837_s21 = scalar_lea.vmem %s5727_s0, 5760  ;;  %p6842_p1 = scmp.lt.s32.totalorder %s5727_s0, %s5727_s0 }
 0x587   :  { %6599 = vset.pattern.permute.xlu1 %v6884_v6  ;;  %v3776_v49 = vpop.f32.mrf.mxu1  ;;  %p6838_p0 = scmp.ne.s32.totalorder %s5727_s0, %s6837_s21  ;;  %p6843_p2 = scmp.lt.s32.totalorder %s6837_s21, %s6837_s21 }
 0x588   :  { %v4341_v55 = vpack.c.bf16 %v3858_v14, %v3858_v14  ;;  %4658 = vperm.xlu1 %6599, %v3496_v44  }
 0x589   :  { %v9603_v13 = vpop.f32.mrf.mxu1  ;;  %p6844_p3 = por %p6843_p2, %p6842_p1 }
 0x58a   :  { %v4503_v38 = vsel %vm897_vm0, %v4341_v55, 0 }
 0x58b   :  { %6552 = vmatpush3.bf16.msra.mxu0 %v4503_v38  ;;  %v6533_v52 = vpop.f32.mrf.mxu1  ;;  %p6845_p4 = pnand %p6844_p3, %p6838_p0 }
 0x58c   :  { %6600 = vset.pattern.permute.xlu1 %v6883_v28  ;;  %6553 = vmatprep.subr.bf16.mxu0 %v10016_v37 }
 0x58d   :  { %4906 = vperm.xlu1 %6600, %v3496_v44  }
 0x58f   :  { %6554 = vmatpush3.bf16.msra.mxu0 %v4340_v41 }
 0x590   :  { %6555 = vmatprep.subr.bf16.mxu0 %v10016_v37 }
 0x593   :  { %6556 = vmatpush3.bf16.msra.mxu0 %v4339_v11 }
 0x594   :  { %6557 = vmatprep.subr.bf16.mxu0 %v10016_v37 }
 0x597   :  { %6558 = vmatpush3.bf16.msra.mxu0 %v4338_v30 }
 0x598   :  { %6559 = vmatprep.subr.bf16.mxu0 %v10016_v37 }
 0x59b   :  { %6560 = vmatpush3.bf16.msra.mxu0 %v4337_v58  ;;  %v10109_v58 = vld [vmem:[#allocation41_spill] sm:$0xff] }
 0x59e   :  { %6562 = vmatmul.mubr.msk.bf16.vlgmr.msra.gmra.mxu0 %vm3235_vm11, %v6645_v33 }
 0x59f   :  { %6565 = vmatprep.mubr.msk.bf16.mxu0 %vm6882_vm8, %v10016_v37 }
 0x5a6   :  { %6566 = vmatmul.mubr.msk.bf16.gmra.mxu0 %vm3235_vm11, %v6647_v36 }
 0x5a7   :  { %6569 = vmatprep.mubr.msk.bf16.mxu0 %vm6882_vm8, %v10016_v37 }
 0x5ae   :  { %6570 = vmatmul.mubr.msk.bf16.gmra.mxu0 %vm3235_vm11, %v6649_v3 }
 0x5af   :  { %6573 = vmatprep.mubr.msk.bf16.mxu0 %vm6882_vm8, %v10016_v37 }
 0x5b6   :  { %6574 = vmatmul.mubr.msk.bf16.gmra.mxu0 %vm3235_vm11, %v6651_v18 }
 0x5b7   :  { %6577 = vmatprep.mubr.msk.bf16.mxu0 %vm6882_vm8, %v10016_v37 }
 0x5be   :  { %6578 = vmatmul.mubr.msk.bf16.gmra.mxu0 %vm3235_vm11, %v6653_v63 }
 0x5dd   :  { %v4891_v23 = vpop.permute.xlu1 %4890  ;;  %v4639_v50 = vpop.permute.xlu0 %4638 }
 0x5de   :  { %v4909_v48 = vmul.bf16 %v4891_v23, %v10108_v20  ;;  %v4910_v31 = vmul.bf16 %v4891_v23, %v10109_v58  ;;  %v4911_v60 = vmul.bf16 %v4891_v23, %v10110_v8  ;;  %v4912_v26 = vmul.bf16 %v4891_v23, %v10111_v45 }
 0x5df   :  { %v4913_v37 = vmul.bf16 %v4891_v23, %v10112_v40  ;;  %v4661_v32 = vmul.bf16 %v4639_v50, %v10113_v43  ;;  %v4662_v47 = vmul.bf16 %v4639_v50, %v10114_v27  ;;  %v4663_v19 = vmul.bf16 %v4639_v50, %v10115_v22 }
 0x5e0   :  { %v4934_v57 = vadd.bf16 1065369472, %v4909_v48  ;;  %v4935_v39 = vadd.bf16 1065369472, %v4910_v31  ;;  %v4936_v30 = vadd.bf16 1065369472, %v4911_v60  ;;  %v4664_v1 = vmul.bf16 %v4639_v50, %v10116_v56 }
 0x5e1   :  { %v4937_v2 = vadd.bf16 1065369472, %v4912_v26  ;;  %v4938_v7 = vadd.bf16 1065369472, %v4913_v37  ;;  %v4665_v35 = vmul.bf16 %v4639_v50, %v10117_v0  ;;  %v4686_v25 = vadd.bf16 1065369472, %v4661_v32 }
 0x5e2   :  { %v6080_v53 = vcombine.low %v4934_v57, %v4935_v39  ;;  %v6083_v17 = vcombine.high %v4934_v57, %v4935_v39  ;;  %v4687_v11 = vadd.bf16 1065369472, %v4662_v47  ;;  %v4688_v54 = vadd.bf16 1065369472, %v4663_v19  ;;  %v6810_v50 = vld [vmem:[#allocation2] sm:$0xff]  ;;  %v6811_v31 = vld [vmem:[#allocation2 + $0x8] sm:$0xff] }
 0x5e3   :  { %v6081_v59 = vcombine.low %v4936_v30, %v4937_v2  ;;  %v6082_v4 = vcombine.low %v4938_v7, %v4938_v7  ;;  %v6084_v9 = vcombine.high %v4936_v30, %v4937_v2  ;;  %v6085_v29 = vcombine.high %v4938_v7, %v4938_v7  ;;  %v6812_v26 = vld [vmem:[#allocation2 + $0x10] sm:$0xf]  ;;  %v6813_v32 = vld [vmem:[#allocation2 + $0x14] sm:$0xff]  ;;  %v6814_v19 = vld [vmem:[#allocation2 + $0x1c] sm:$0xff] }
 0x5e4   :  { %v5110_v34 = vmul.bf16 %v6080_v53, %v4959_v24  ;;  %v5113_v12 = vmul.bf16 %v6083_v17, %v4962_v16  ;;  %v4689_v21 = vadd.bf16 1065369472, %v4664_v1  ;;  %v4690_v41 = vadd.bf16 1065369472, %v4665_v35  ;;  %v6815_v39 = vld [vmem:[#allocation2 + $0x24] sm:$0xf] }
 0x5e5   :  { %v5111_v61 = vmul.bf16 %v6081_v59, %v4960_v46  ;;  %v5112_v15 = vmul.bf16 %v6082_v4, %v4961_v62  ;;  %v5114_v14 = vmul.bf16 %v6084_v9, %v4963_v5  ;;  %v5115_v44 = vmul.bf16 %v6085_v29, %v4964_v10  ;;  %v4644_v49 = vpop.permute.xlu1 %4643 }
 0x5e6   :  { %5138 = vst [vmem:[#allocation4 + $0xb4] sm:$0xff] %v5110_v34  ;;  %5141 = vst [vmem:[#allocation4 + $0xc8] sm:$0xff] %v5113_v12  ;;  %v6053_v55 = vcombine.low %v4686_v25, %v4687_v11  ;;  %v6054_v38 = vcombine.low %v4688_v54, %v4689_v21  ;;  %v6055_v33 = vcombine.low %v4690_v41, %v4690_v41  ;;  %v6816_v34 = vld [vmem:[#allocation2 + $0x28] sm:$0xff] }
 0x5e7   :  { %v6056_v36 = vcombine.high %v4686_v25, %v4687_v11  ;;  %5139 = vst [vmem:[#allocation4 + $0xbc] sm:$0xff] %v5111_v61  ;;  %5140 = vst [vmem:[#allocation4 + $0xc4] sm:$0xf] %v5112_v15  ;;  %v6057_v3 = vcombine.high %v4688_v54, %v4689_v21  ;;  %v6058_v18 = vcombine.high %v4690_v41, %v4690_v41  ;;  %v6817_v21 = vld [vmem:[#allocation2 + $0x3c] sm:$0xff]  ;;  %v6818_v61 = vld [vmem:[#allocation2 + $0x30] sm:$0xff] }
 0x5e8   :  { %5142 = vst [vmem:[#allocation4 + $0xd0] sm:$0xff] %v5114_v14  ;;  %5143 = vst [vmem:[#allocation4 + $0xd8] sm:$0xf] %v5115_v44  ;;  %v4666_v63 = vmul.bf16 %v4644_v49, %v10113_v43  ;;  %v4667_v23 = vmul.bf16 %v4644_v49, %v10114_v27  ;;  %v4835_v48 = vmul.bf16 %v6810_v50, %v6053_v55  ;;  %v6819_v14 = vld [vmem:[#allocation2 + $0x44] sm:$0xff] }
 0x5e9   :  { %v4836_v60 = vmul.bf16 %v6811_v31, %v6054_v38  ;;  %v4837_v37 = vmul.bf16 %v6812_v26, %v6055_v33  ;;  %v4838_v47 = vmul.bf16 %v6813_v32, %v6056_v36  ;;  %v4839_v57 = vmul.bf16 %v6814_v19, %v6057_v3  ;;  %v6820_v33 = vld [vmem:[#allocation2 + $0x38] sm:$0xf]  ;;  %v6821_v3 = vld [vmem:[#allocation2 + $0x4c] sm:$0xf] }
 0x5ea   :  { %v4840_v30 = vmul.bf16 %v6815_v39, %v6058_v18  ;;  %v4668_v1 = vmul.bf16 %v4644_v49, %v10115_v22  ;;  %v4669_v52 = vmul.bf16 %v4644_v49, %v10116_v56  ;;  %4862 = vst [vmem:[#allocation4] sm:$0xff] %v4835_v48  ;;  %v4670_v2 = vmul.bf16 %v4644_v49, %v10117_v0  ;;  %v4895_v25 = vpop.permute.xlu1 %4894  ;;  %v4965_v26 = vld [vmem:[#allocation2 + $0x28] sm:$0xff]  ;;  %v4966_v39 = vld [vmem:[#allocation2 + $0x30] sm:$0xff] }
 0x5eb   :  { %4863 = vst [vmem:[#allocation4 + $0x8] sm:$0xff] %v4836_v60  ;;  %4864 = vst [vmem:[#allocation4 + $0x10] sm:$0xf] %v4837_v37  ;;  %v4691_v7 = vadd.bf16 1065369472, %v4666_v63  ;;  %v4914_v53 = vmul.bf16 %v4895_v25, %v10108_v20  ;;  %v4915_v17 = vmul.bf16 %v4895_v25, %v10109_v58  ;;  %v4916_v16 = vmul.bf16 %v4895_v25, %v10110_v8  ;;  %v4968_v37 = vld [vmem:[#allocation2 + $0x3c] sm:$0xff] }
 0x5ec   :  { %4865 = vst [vmem:[#allocation4 + $0x14] sm:$0xff] %v4838_v47  ;;  %v4692_v35 = vadd.bf16 1065369472, %v4667_v23  ;;  %4866 = vst [vmem:[#allocation4 + $0x1c] sm:$0xff] %v4839_v57  ;;  %v4693_v24 = vadd.bf16 1065369472, %v4668_v1  ;;  %v4917_v4 = vmul.bf16 %v4895_v25, %v10111_v45  ;;  %v4918_v9 = vmul.bf16 %v4895_v25, %v10112_v40 }
 0x5ed   :  { %4867 = vst [vmem:[#allocation4 + $0x24] sm:$0xf] %v4840_v30  ;;  %v4694_v46 = vadd.bf16 1065369472, %v4669_v52  ;;  %v4695_v11 = vadd.bf16 1065369472, %v4670_v2 }
 0x5ee   :  { %v6059_v54 = vcombine.low %v4691_v7, %v4692_v35  ;;  %v6062_v62 = vcombine.high %v4691_v7, %v4692_v35  ;;  %v4939_v49 = vadd.bf16 1065369472, %v4914_v53  ;;  %v4940_v55 = vadd.bf16 1065369472, %v4915_v17  ;;  %v4969_v30 = vld [vmem:[#allocation2 + $0x44] sm:$0xff]  ;;  %v9624_v35 = vpop.f32.mrf.mxu1 }
 0x5ef   :  { %v6060_v5 = vcombine.low %v4693_v24, %v4694_v46  ;;  %v6063_v59 = vcombine.high %v4693_v24, %v4694_v46  ;;  %v6061_v29 = vcombine.low %v4695_v11, %v4695_v11  ;;  %v6064_v10 = vcombine.high %v4695_v11, %v4695_v11  ;;  %v4649_v38 = vpop.permute.xlu1 %4648  ;;  %v4967_v25 = vld [vmem:[#allocation2 + $0x38] sm:$0xf]  ;;  %v4970_v24 = vld [vmem:[#allocation2 + $0x4c] sm:$0xf] }
 0x5f0   :  { %v4841_v12 = vmul.bf16 %v6816_v34, %v6059_v54  ;;  %v4844_v41 = vmul.bf16 %v6817_v21, %v6062_v62  ;;  %v4941_v63 = vadd.bf16 1065369472, %v4916_v16  ;;  %v4942_v23 = vadd.bf16 1065369472, %v4917_v4  ;;  %v6534_v4 = vpop.f32.mrf.mxu1 }
 0x5f1   :  { %v4842_v15 = vmul.bf16 %v6818_v61, %v6060_v5  ;;  %v4845_v44 = vmul.bf16 %v6819_v14, %v6063_v59  ;;  %v4843_v36 = vmul.bf16 %v6820_v33, %v6061_v29  ;;  %v4846_v18 = vmul.bf16 %v6821_v3, %v6064_v10  ;;  %v4975_v4 = vld [vmem:[#allocation2 + $0x6c] sm:$0xff] }
 0x5f2   :  { %4868 = vst [vmem:[#allocation4 + $0x28] sm:$0xff] %v4841_v12  ;;  %4871 = vst [vmem:[#allocation4 + $0x3c] sm:$0xff] %v4844_v41  ;;  %v4943_v50 = vadd.bf16 1065369472, %v4918_v9  ;;  %v6086_v48 = vcombine.low %v4939_v49, %v4940_v55  ;;  %v6089_v31 = vcombine.high %v4939_v49, %v4940_v55  ;;  %v4671_v60 = vmul.bf16 %v4649_v38, %v10113_v43 }
 0x5f3   :  { %4869 = vst [vmem:[#allocation4 + $0x30] sm:$0xff] %v4842_v15  ;;  %4872 = vst [vmem:[#allocation4 + $0x44] sm:$0xff] %v4845_v44  ;;  %v6087_v32 = vcombine.low %v4941_v63, %v4942_v23  ;;  %v6090_v47 = vcombine.high %v4941_v63, %v4942_v23  ;;  %v4672_v19 = vmul.bf16 %v4649_v38, %v10114_v27  ;;  %v9631_v15 = vpop.f32.mrf.mxu1 }
 0x5f4   :  { %4870 = vst [vmem:[#allocation4 + $0x38] sm:$0xf] %v4843_v36  ;;  %4873 = vst [vmem:[#allocation4 + $0x4c] sm:$0xf] %v4846_v18  ;;  %v4673_v57 = vmul.bf16 %v4649_v38, %v10115_v22  ;;  %v6088_v1 = vcombine.low %v4943_v50, %v4943_v50  ;;  %v6091_v52 = vcombine.high %v4943_v50, %v4943_v50  ;;  %v4899_v54 = vpop.permute.xlu1 %4898  ;;  %v4696_v5 = vadd.bf16 1065369472, %v4671_v60 }
 0x5f5   :  { %v5116_v2 = vmul.bf16 %v6086_v48, %v4965_v26  ;;  %v5119_v7 = vmul.bf16 %v6089_v31, %v4968_v37  ;;  %v5117_v46 = vmul.bf16 %v6087_v32, %v4966_v39  ;;  %v5120_v53 = vmul.bf16 %v6090_v47, %v4969_v30  ;;  %v6823_v36 = vld [vmem:[#allocation2 + $0x64] sm:$0xff]  ;;  %v6537_v50 = vpop.f32.mrf.mxu1  ;;  %v6824_v48 = vld [vmem:[#allocation2 + $0x58] sm:$0xff]  ;;  %v6825_v60 = vld [vmem:[#allocation2 + $0x60] sm:$0xf] }
 0x5f6   :  { %v4674_v17 = vmul.bf16 %v4649_v38, %v10116_v56  ;;  %v4675_v11 = vmul.bf16 %v4649_v38, %v10117_v0  ;;  %v5118_v62 = vmul.bf16 %v6088_v1, %v4967_v25  ;;  %v5121_v16 = vmul.bf16 %v6091_v52, %v4970_v24  ;;  %v6822_v38 = vld [vmem:[#allocation2 + $0x50] sm:$0xff] }
 0x5f7   :  { %5144 = vst [vmem:[#allocation4 + $0xdc] sm:$0xff] %v5116_v2  ;;  %5147 = vst [vmem:[#allocation4 + $0xf0] sm:$0xff] %v5119_v7  ;;  %v4697_v59 = vadd.bf16 1065369472, %v4672_v19  ;;  %v4698_v9 = vadd.bf16 1065369472, %v4673_v57  ;;  %v4919_v34 = vmul.bf16 %v4899_v54, %v10108_v20  ;;  %v4920_v41 = vmul.bf16 %v4899_v54, %v10109_v58  ;;  %v9636_v52 = vpop.f32.mrf.mxu1 }
 0x5f8   :  { %5145 = vst [vmem:[#allocation4 + $0xe4] sm:$0xff] %v5117_v46  ;;  %5148 = vst [vmem:[#allocation4 + $0xf8] sm:$0xff] %v5120_v53  ;;  %v4699_v29 = vadd.bf16 1065369472, %v4674_v17  ;;  %v4700_v10 = vadd.bf16 1065369472, %v4675_v11  ;;  %v4921_v61 = vmul.bf16 %v4899_v54, %v10110_v8  ;;  %v4922_v18 = vmul.bf16 %v4899_v54, %v10111_v45 }
 0x5f9   :  { %5146 = vst [vmem:[#allocation4 + $0xec] sm:$0xf] %v5118_v62  ;;  %5149 = vst [vmem:[#allocation4 + $0x100] sm:$0xf] %v5121_v16  ;;  %v6065_v12 = vcombine.low %v4696_v5, %v4697_v59  ;;  %v6068_v21 = vcombine.high %v4696_v5, %v4697_v59  ;;  %v4923_v63 = vmul.bf16 %v4899_v54, %v10112_v40  ;;  %v4654_v23 = vpop.permute.xlu1 %4653  ;;  %v6826_v37 = vld [vmem:[#allocation2 + $0x6c] sm:$0xff]  ;;  %v4972_v53 = vld [vmem:[#allocation2 + $0x58] sm:$0xff]  ;;  %v6538_v16 = vpop.f32.mrf.mxu1 }
 0x5fa   :  { %v6066_v14 = vcombine.low %v4698_v9, %v4699_v29  ;;  %v6067_v44 = vcombine.low %v4700_v10, %v4700_v10  ;;  %v6069_v49 = vcombine.high %v4698_v9, %v4699_v29  ;;  %v6070_v55 = vcombine.high %v4700_v10, %v4700_v10  ;;  %v6827_v47 = vld [vmem:[#allocation2 + $0x74] sm:$0xf]  ;;  %v4973_v5 = vld [vmem:[#allocation2 + $0x60] sm:$0xf]  ;;  %v4974_v59 = vld [vmem:[#allocation2 + $0x64] sm:$0xff] }
 0x5fb   :  { %v4847_v33 = vmul.bf16 %v6822_v38, %v6065_v12  ;;  %v4850_v3 = vmul.bf16 %v6823_v36, %v6068_v21  ;;  %v4944_v57 = vadd.bf16 1065369472, %v4919_v34  ;;  %v4945_v39 = vadd.bf16 1065369472, %v4920_v41  ;;  %v4971_v46 = vld [vmem:[#allocation2 + $0x50] sm:$0xff] }
 0x5fc   :  { %v4848_v31 = vmul.bf16 %v6824_v48, %v6066_v14  ;;  %v4849_v26 = vmul.bf16 %v6825_v60, %v6067_v44  ;;  %v4851_v32 = vmul.bf16 %v6826_v37, %v6069_v49  ;;  %v4852_v19 = vmul.bf16 %v6827_v47, %v6070_v55  ;;  %v4976_v21 = vld [vmem:[#allocation2 + $0x74] sm:$0xf]  ;;  %v9642_v49 = vpop.f32.mrf.mxu1  ;;  %v6833_v16 = vld [vmem:[#allocation2 + $0x9c] sm:$0xf] }
 0x5fd   :  { %4874 = vst [vmem:[#allocation4 + $0x50] sm:$0xff] %v4847_v33  ;;  %4877 = vst [vmem:[#allocation4 + $0x64] sm:$0xff] %v4850_v3  ;;  %v4946_v30 = vadd.bf16 1065369472, %v4921_v61  ;;  %v4676_v1 = vmul.bf16 %v4654_v23, %v10113_v43  ;;  %v4947_v2 = vadd.bf16 1065369472, %v4922_v18  ;;  %v4677_v25 = vmul.bf16 %v4654_v23, %v10114_v27 }
 0x5fe   :  { %4875 = vst [vmem:[#allocation4 + $0x58] sm:$0xff] %v4848_v31  ;;  %4876 = vst [vmem:[#allocation4 + $0x60] sm:$0xf] %v4849_v26  ;;  %v4948_v7 = vadd.bf16 1065369472, %v4923_v63  ;;  %v4678_v24 = vmul.bf16 %v4654_v23, %v10115_v22  ;;  %v6092_v17 = vcombine.low %v4944_v57, %v4945_v39  ;;  %v6095_v11 = vcombine.high %v4944_v57, %v4945_v39  ;;  %v4903_v12 = vpop.permute.xlu1 %4902  ;;  %v6541_v50 = vpop.f32.mrf.mxu1  ;;  %v6828_v39 = vld [vmem:[#allocation2 + $0x78] sm:$0xff] }
 0x5ff   :  { %4878 = vst [vmem:[#allocation4 + $0x6c] sm:$0xff] %v4851_v32  ;;  %4879 = vst [vmem:[#allocation4 + $0x74] sm:$0xf] %v4852_v19  ;;  %v4679_v54 = vmul.bf16 %v4654_v23, %v10116_v56  ;;  %v4680_v62 = vmul.bf16 %v4654_v23, %v10117_v0  ;;  %v6093_v9 = vcombine.low %v4946_v30, %v4947_v2  ;;  %v4701_v14 = vadd.bf16 1065369472, %v4676_v1  ;;  %v6829_v1 = vld [vmem:[#allocation2 + $0x8c] sm:$0xff] }
 0x600   :  { %v6094_v29 = vcombine.low %v4948_v7, %v4948_v7  ;;  %v6096_v10 = vcombine.high %v4946_v30, %v4947_v2  ;;  %v6097_v34 = vcombine.high %v4948_v7, %v4948_v7  ;;  %v5122_v41 = vmul.bf16 %v6092_v17, %v4971_v46  ;;  %v6830_v46 = vld [vmem:[#allocation2 + $0x80] sm:$0xff]  ;;  %v6831_v17 = vld [vmem:[#allocation2 + $0x88] sm:$0xf] }
 0x601   :  { %v5125_v61 = vmul.bf16 %v6095_v11, %v4974_v59  ;;  %v4702_v44 = vadd.bf16 1065369472, %v4677_v25  ;;  %v5123_v55 = vmul.bf16 %v6093_v9, %v4972_v53  ;;  %v4703_v3 = vadd.bf16 1065369472, %v4678_v24  ;;  %v9649_v24 = vpop.f32.mrf.mxu1 }
 0x602   :  { %v5124_v38 = vmul.bf16 %v6094_v29, %v4973_v5  ;;  %v5126_v33 = vmul.bf16 %v6096_v10, %v4975_v4  ;;  %v5127_v36 = vmul.bf16 %v6097_v34, %v4976_v21  ;;  %5150 = vst [vmem:[#allocation4 + $0x104] sm:$0xff] %v5122_v41  ;;  %v4704_v18 = vadd.bf16 1065369472, %v4679_v54  ;;  %v6832_v54 = vld [vmem:[#allocation2 + $0x94] sm:$0xff] }
 0x603   :  { %5153 = vst [vmem:[#allocation4 + $0x118] sm:$0xff] %v5125_v61  ;;  %v4705_v63 = vadd.bf16 1065369472, %v4680_v62  ;;  %v6071_v23 = vcombine.low %v4701_v14, %v4702_v44  ;;  %5151 = vst [vmem:[#allocation4 + $0x10c] sm:$0xff] %v5123_v55  ;;  %v6074_v48 = vcombine.high %v4701_v14, %v4702_v44  ;;  %v4924_v31 = vmul.bf16 %v4903_v12, %v10108_v20  ;;  %v4659_v57 = vpop.permute.xlu1 %4658  ;;  %v6542_v10 = vpop.f32.mrf.mxu1  ;;  %v4977_v61 = vld [vmem:[#allocation2 + $0x78] sm:$0xff]  ;;  %v4978_v14 = vld [vmem:[#allocation2 + $0x80] sm:$0xff] }
 0x604   :  { %5152 = vst [vmem:[#allocation4 + $0x114] sm:$0xf] %v5124_v38  ;;  %5154 = vst [vmem:[#allocation4 + $0x120] sm:$0xff] %v5126_v33  ;;  %v4925_v60 = vmul.bf16 %v4903_v12, %v10109_v58  ;;  %v4926_v26 = vmul.bf16 %v4903_v12, %v10110_v8  ;;  %v6072_v37 = vcombine.low %v4703_v3, %v4704_v18 }
 0x605   :  { %5155 = vst [vmem:[#allocation4 + $0x128] sm:$0xf] %v5127_v36  ;;  %v6073_v32 = vcombine.low %v4705_v63, %v4705_v63  ;;  %v6075_v47 = vcombine.high %v4703_v3, %v4704_v18  ;;  %v6076_v19 = vcombine.high %v4705_v63, %v4705_v63  ;;  %v4853_v30 = vmul.bf16 %v6828_v39, %v6071_v23  ;;  %v4979_v36 = vld [vmem:[#allocation2 + $0x88] sm:$0xf]  ;;  %v4980_v3 = vld [vmem:[#allocation2 + $0x8c] sm:$0xff]  ;;  %v4981_v18 = vld [vmem:[#allocation2 + $0x94] sm:$0xff] }
 0x606   :  { %v4856_v2 = vmul.bf16 %v6829_v1, %v6074_v48  ;;  %v4927_v7 = vmul.bf16 %v4903_v12, %v10111_v45  ;;  %v4928_v25 = vmul.bf16 %v4903_v12, %v10112_v40  ;;  %v4854_v53 = vmul.bf16 %v6830_v46, %v6072_v37 }
 0x607   :  { %v4855_v11 = vmul.bf16 %v6831_v17, %v6073_v32  ;;  %v4857_v62 = vmul.bf16 %v6832_v54, %v6075_v47  ;;  %v4858_v5 = vmul.bf16 %v6833_v16, %v6076_v19  ;;  %4880 = vst [vmem:[#allocation4 + $0x78] sm:$0xff] %v4853_v30  ;;  %v4949_v59 = vadd.bf16 1065369472, %v4924_v31  ;;  %v6834_v54 = vld [vmem:[#allocation2 + $0xa0] sm:$0xff] }
 0x608   :  { %4883 = vst [vmem:[#allocation4 + $0x8c] sm:$0xff] %v4856_v2  ;;  %v4950_v4 = vadd.bf16 1065369472, %v4925_v60  ;;  %v4951_v9 = vadd.bf16 1065369472, %v4926_v26  ;;  %v4681_v29 = vmul.bf16 %v4659_v57, %v10113_v43  ;;  %4881 = vst [vmem:[#allocation4 + $0x80] sm:$0xff] %v4854_v53  ;;  %v4682_v21 = vmul.bf16 %v4659_v57, %v10114_v27  ;;  %v9656_v43 = vpop.f32.mrf.mxu1  ;;  %v4907_v37 = vpop.permute.xlu1 %4906 }
 0x609   :  { %4882 = vst [vmem:[#allocation4 + $0x88] sm:$0xf] %v4855_v11  ;;  %4884 = vst [vmem:[#allocation4 + $0x94] sm:$0xff] %v4857_v62  ;;  %v4952_v34 = vadd.bf16 1065369472, %v4927_v7  ;;  %v4683_v41 = vmul.bf16 %v4659_v57, %v10115_v22  ;;  %v4684_v38 = vmul.bf16 %v4659_v57, %v10116_v56  ;;  %v4685_v33 = vmul.bf16 %v4659_v57, %v10117_v0 }
 0x60a   :  { %4885 = vst [vmem:[#allocation4 + $0x9c] sm:$0xf] %v4858_v5  ;;  %v4953_v12 = vadd.bf16 1065369472, %v4928_v25  ;;  %v6098_v44 = vcombine.low %v4949_v59, %v4950_v4  ;;  %v6101_v55 = vcombine.high %v4949_v59, %v4950_v4  ;;  %v4982_v27 = vld [vmem:[#allocation2 + $0x9c] sm:$0xf]  ;;  %v6545_v32 = vpop.f32.mrf.mxu1  ;;  %v4929_v7 = vmul.bf16 %v4907_v37, %v10108_v20 }
 0x60b   :  { %v6099_v63 = vcombine.low %v4951_v9, %v4952_v34  ;;  %v6102_v50 = vcombine.high %v4951_v9, %v4952_v34  ;;  %v4706_v60 = vadd.bf16 1065369472, %v4681_v29  ;;  %v4707_v26 = vadd.bf16 1065369472, %v4682_v21  ;;  %v6835_v29 = vld [vmem:[#allocation2 + $0xa8] sm:$0xff]  ;;  %v4983_v21 = vld [vmem:[#allocation2 + $0xa0] sm:$0xff] }
 0x60c   :  { %v6100_v23 = vcombine.low %v4953_v12, %v4953_v12  ;;  %v6103_v48 = vcombine.high %v4953_v12, %v4953_v12  ;;  %v5128_v31 = vmul.bf16 %v6098_v44, %v4977_v61  ;;  %v5131_v22 = vmul.bf16 %v6101_v55, %v4980_v3  ;;  %v9658_v2 = vpop.f32.mrf.mxu1  ;;  %v6836_v34 = vld [vmem:[#allocation2 + $0xb0] sm:$0xf] }
 0x60d   :  { %v5129_v47 = vmul.bf16 %v6099_v63, %v4978_v14  ;;  %v5132_v19 = vmul.bf16 %v6102_v50, %v4981_v18  ;;  %v4708_v57 = vadd.bf16 1065369472, %v4683_v41  ;;  %v4709_v39 = vadd.bf16 1065369472, %v4684_v38  ;;  %v4984_v14 = vld [vmem:[#allocation2 + $0xa8] sm:$0xff] }
 0x60e   :  { %v5130_v56 = vmul.bf16 %v6100_v23, %v4979_v36  ;;  %v5133_v0 = vmul.bf16 %v6103_v48, %v4982_v27  ;;  %5156 = vst [vmem:[#allocation4 + $0x12c] sm:$0xff] %v5128_v31  ;;  %5159 = vst [vmem:[#allocation4 + $0x140] sm:$0xff] %v5131_v22  ;;  %v4710_v30 = vadd.bf16 1065369472, %v4685_v33  ;;  %v6077_v1 = vcombine.low %v4706_v60, %v4707_v26  ;;  %v6546_v5 = vpop.f32.mrf.mxu1  ;;  %v4985_v44 = vld [vmem:[#allocation2 + $0xb0] sm:$0xf] }
 0x60f   :  { %5157 = vst [vmem:[#allocation4 + $0x134] sm:$0xff] %v5129_v47  ;;  %5160 = vst [vmem:[#allocation4 + $0x148] sm:$0xff] %v5132_v19  ;;  %v4930_v25 = vmul.bf16 %v4907_v37, %v10109_v58  ;;  %v4931_v46 = vmul.bf16 %v4907_v37, %v10110_v8  ;;  %v4932_v53 = vmul.bf16 %v4907_v37, %v10111_v45  ;;  %v4954_v59 = vadd.bf16 1065369472, %v4929_v7 }
 0x610   :  { %5158 = vst [vmem:[#allocation4 + $0x13c] sm:$0xf] %v5130_v56  ;;  %5161 = vst [vmem:[#allocation4 + $0x150] sm:$0xf] %v5133_v0  ;;  %v6078_v17 = vcombine.low %v4708_v57, %v4709_v39  ;;  %v6079_v11 = vcombine.low %v4710_v30, %v4710_v30  ;;  %v4859_v62 = vmul.bf16 %v6834_v54, %v6077_v1  ;;  %v9665_v8 = vpop.f32.mrf.mxu1 }
 0x611   :  { %v4933_v16 = vmul.bf16 %v4907_v37, %v10112_v40  ;;  %v4955_v4 = vadd.bf16 1065369472, %v4930_v25  ;;  %v4956_v9 = vadd.bf16 1065369472, %v4931_v46  ;;  %v4957_v58 = vadd.bf16 1065369472, %v4932_v53 }
 0x612   :  { %v4860_v10 = vmul.bf16 %v6835_v29, %v6078_v17  ;;  %v4861_v20 = vmul.bf16 %v6836_v34, %v6079_v11  ;;  %4886 = vst [vmem:[#allocation4 + $0xa0] sm:$0xff] %v4859_v62  ;;  %v6549_v40 = vpop.f32.mrf.mxu1 }
 0x613   :  { %v4958_v12 = vadd.bf16 1065369472, %v4933_v16  ;;  %v6104_v45 = vcombine.low %v4954_v59, %v4955_v4  ;;  %v6105_v41 = vcombine.low %v4956_v9, %v4957_v58 }
 0x614   :  { %4887 = vst [vmem:[#allocation4 + $0xa8] sm:$0xff] %v4860_v10  ;;  %4888 = vst [vmem:[#allocation4 + $0xb0] sm:$0xf] %v4861_v20  ;;  %v4461_v36 = vpop.f32.mrf.mxu1 }
 0x615   :  { %v6106_v61 = vcombine.low %v4958_v12, %v4958_v12  ;;  %v5134_v55 = vmul.bf16 %v6104_v45, %v4983_v21  ;;  %v5135_v38 = vmul.bf16 %v6105_v41, %v4984_v14 }
 0x616   :  { %v6550_v3 = vpop.f32.mrf.mxu1 }
 0x617   :  { %v5136_v33 = vmul.bf16 %v6106_v61, %v4985_v44  ;;  %5162 = vst [vmem:[#allocation4 + $0x154] sm:$0xff] %v5134_v55  ;;  %5163 = vst [vmem:[#allocation4 + $0x15c] sm:$0xff] %v5135_v38 }
 0x619   :  { %5164 = vst [vmem:[#allocation4 + $0x164] sm:$0xf] %v5136_v33 }
 0x65e   :  { %v4539_v18 = vpop.f32.mrf.mxu0 }
 0x65f   :  { %v4540_v63 = vadd.f32 %v4539_v18, %v9603_v13 }
 0x660   :  { %v6563_v23 = vpop.f32.mrf.mxu0 }
 0x661   :  { %v6044_v50 = vmul.f32 -1.442695, %v4540_v63 }
 0x662   :  { %v4542_v48 = vpop.f32.mrf.mxu0 }
 0x663   :  { %6746 = vpow2.f32 %v6044_v50  ;;  %v4543_v27 = vadd.f32 %v4542_v48, %v9624_v35 }
 0x664   :  { %v6564_v31 = vpop.f32.mrf.mxu0 }
 0x665   :  { %v6045_v22 = vmul.f32 -1.442695, %v4543_v27 }
 0x666   :  { %v4547_v60 = vpop.f32.mrf.mxu0 }
 0x667   :  { %6748 = vpow2.f32 %v6045_v22  ;;  %v4548_v26 = vadd.f32 %v4547_v60, %v9631_v15 }
 0x668   :  { %v6567_v37 = vpop.f32.mrf.mxu0 }
 0x669   :  { %v6046_v32 = vmul.f32 -1.442695, %v4548_v26 }
 0x66a   :  { %v4550_v47 = vpop.f32.mrf.mxu0 }
 0x66b   :  { %6750 = vpow2.f32 %v6046_v32  ;;  %v4551_v56 = vadd.f32 %v4550_v47, %v9636_v52 }
 0x66c   :  { %v6568_v19 = vpop.f32.mrf.mxu0 }
 0x66d   :  { %v6047_v13 = vmul.f32 -1.442695, %v4551_v56 }
 0x66e   :  { %v4555_v0 = vpop.f32.mrf.mxu0 }
 0x66f   :  { %6752 = vpow2.f32 %v6047_v13  ;;  %v4556_v57 = vadd.f32 %v4555_v0, %v9642_v49 }
 0x670   :  { %v6747_v39 = vpop.eup %6746  ;;  %v6571_v35 = vpop.f32.mrf.mxu0 }
 0x671   :  { %v6048_v30 = vmul.f32 -1.442695, %v4556_v57  ;;  %v4604_v1 = vadd.f32 1.0, %v6747_v39 }
 0x672   :  { %v4558_v7 = vpop.f32.mrf.mxu0 }
 0x673   :  { %v4559_v25 = vadd.f32 %v4558_v7, %v9649_v24  ;;  %6754 = vpow2.f32 %v6048_v30 }
 0x674   :  { %v6749_v15 = vpop.eup %6748  ;;  %v6572_v46 = vpop.f32.mrf.mxu0  ;;  %6756 = vrcp.f32 %v4604_v1 }
 0x675   :  { %v4605_v53 = vadd.f32 1.0, %v6749_v15  ;;  %v6049_v17 = vmul.f32 -1.442695, %v4559_v25 }
 0x676   :  { %v4563_v52 = vpop.f32.mrf.mxu0 }
 0x677   :  { %6758 = vrcp.f32 %v4605_v53  ;;  %v4564_v11 = vadd.f32 %v4563_v52, %v9656_v43 }
 0x678   :  { %v6751_v54 = vpop.eup %6750  ;;  %6760 = vpow2.f32 %v6049_v17  ;;  %v6575_v49 = vpop.f32.mrf.mxu0 }
 0x679   :  { %v6050_v62 = vmul.f32 -1.442695, %v4564_v11  ;;  %v4606_v16 = vadd.f32 1.0, %v6751_v54 }
 0x67a   :  { %v4566_v5 = vpop.f32.mrf.mxu0 }
 0x67b   :  { %v4567_v59 = vadd.f32 %v4566_v5, %v9658_v2  ;;  %6762 = vpow2.f32 %v6050_v62 }
 0x67c   :  { %v6753_v4 = vpop.eup %6752  ;;  %v6576_v24 = vpop.f32.mrf.mxu0  ;;  %6764 = vrcp.f32 %v4606_v16 }
 0x67d   :  { %v4607_v9 = vadd.f32 1.0, %v6753_v4  ;;  %v6051_v29 = vmul.f32 -1.442695, %v4567_v59 }
 0x67e   :  { %v4571_v10 = vpop.f32.mrf.mxu0 }
 0x67f   :  { %6766 = vrcp.f32 %v4607_v9  ;;  %v4572_v34 = vadd.f32 %v4571_v10, %v9665_v8 }
 0x680   :  { %6768 = vpow2.f32 %v6051_v29  ;;  %v6579_v43 = vpop.f32.mrf.mxu0  ;;  %v6755_v20 = vpop.eup %6754 }
 0x681   :  { %v6052_v58 = vmul.f32 -1.442695, %v4572_v34  ;;  %v6757_v45 = vpop.eup %6756  ;;  %v4608_v21 = vadd.f32 1.0, %v6755_v20 }
 0x682   :  { %v4574_v12 = vpop.f32.mrf.mxu0 }
 0x683   :  { %6770 = vpow2.f32 %v6052_v58 }
 0x684   :  { %v6759_v41 = vpop.eup %6758  ;;  %v6580_v2 = vpop.f32.mrf.mxu0  ;;  %6772 = vrcp.f32 %v4608_v21 }
 0x685   :  { %v6761_v61 = vpop.eup %6760  ;;  %v4631_v40 = vpack.c.bf16 %v6759_v41, %v6757_v45 }
 0x686   :  { %v4609_v14 = vadd.f32 1.0, %v6761_v61 }
 0x687   :  { %5446 = vperm.xlu1 %6600, %v4631_v40   ;;  %5167 = vperm.xlu0 %6591, %v4631_v40  }
 0x688   :  { %6774 = vrcp.f32 %v4609_v14  ;;  %v6763_v44 = vpop.eup %6762 }
 0x689   :  { %v6765_v55 = vpop.eup %6764  ;;  %v4610_v8 = vadd.f32 1.0, %v6763_v44 }
 0x68b   :  { %6601 = vset.pattern.permute.xlu1 %v6884_v6  ;;  %6602 = vset.pattern.permute.xlu0 %v6883_v28  ;;  %6776 = vrcp.f32 %v4610_v8 }
 0x68c   :  { %v6767_v38 = vpop.eup %6766 }
 0x68d   :  { %v6769_v33 = vpop.eup %6768  ;;  %v4632_v36 = vpack.c.bf16 %v6767_v38, %v6765_v55 }
 0x68e   :  { %v4611_v3 = vadd.f32 1.0, %v6769_v33 }
 0x68f   :  { %5450 = vperm.xlu0 %6602, %v4632_v36   ;;  %5172 = vperm.xlu1 %6601, %v4632_v36  }
 0x690   :  { %v6771_v18 = vpop.eup %6770  ;;  %6778 = vrcp.f32 %v4611_v3 }
 0x691   :  { %v4612_v63 = vadd.f32 1.0, %v6771_v18  ;;  %v6773_v23 = vpop.eup %6772 }
 0x693   :  { %6780 = vrcp.f32 %v4612_v63  ;;  %6603 = vset.pattern.permute.xlu0 %v6884_v6  ;;  %6604 = vset.pattern.permute.xlu1 %v6883_v28 }
 0x695   :  { %v6775_v50 = vpop.eup %6774 }
 0x696   :  { %v4633_v48 = vpack.c.bf16 %v6775_v50, %v6773_v23 }
 0x698   :  { %5454 = vperm.xlu1 %6604, %v4633_v48   ;;  %5177 = vperm.xlu0 %6603, %v4633_v48   ;;  %v6777_v27 = vpop.eup %6776 }
 0x69c   :  { %6605 = vset.pattern.permute.xlu1 %v6884_v6 }
 0x69d   :  { %v6779_v31 = vpop.eup %6778 }
 0x69e   :  { %v4634_v22 = vpack.c.bf16 %v6779_v31, %v6777_v27 }
 0x6a0   :  { %v6781_v60 = vpop.eup %6780  ;;  %5182 = vperm.xlu1 %6605, %v4634_v22  }
 0x6a1   :  { %v4635_v26 = vpack.c.bf16 %v6781_v60, %v6781_v60 }
 0x6a3   :  { %5187 = vperm.xlu0 %6603, %v4635_v26  }
 0x6a4   :  { %6606 = vset.pattern.permute.xlu1 %v6883_v28 }
 0x6a5   :  { %5458 = vperm.xlu1 %6606, %v4634_v22  }
 0x6a7   :  { %6607 = vset.pattern.permute.xlu0 %v6883_v28 }
 0x6a8   :  { %5462 = vperm.xlu0 %6607, %v4635_v26  }
 0x6a9   :  { %6848 = shalt.err (!%p6845_p4)
}
 0x6aa   :  { %s6886_s22 = smov 320   ;;  %s6887_s1 = smov 20   ;;  %v10118_v37 = vld [vmem:[#allocation51_spill] sm:$0xff]  ;;  %v10119_v47 = vld [vmem:[#allocation49_spill] sm:$0xff]  ;;  %v10120_v0 = vld [vmem:[#allocation62_spill] sm:$0xff] }
 0x6ab   :  { %5732 = dma.vmem_to_hbm [thread:$0]  %s5727_s0, 5760, %s9751_s6, [#allocation5], %s6886_s22, %s6886_s22, %s6887_s1   ;;  %v10121_v39 = vld [vmem:[#allocation50_spill] sm:$0xff]  ;;  %v10122_v30 = vld [vmem:[#allocation47_spill] sm:$0xff]  ;;  %v10125_v49 = vld [vmem:[#allocation45_spill] sm:$0xff] }
 0x6ac   :  { %v10123_v7 = vld [vmem:[#allocation67_spill] sm:$0xff]  ;;  %v5515_v5 = vld [vmem:[#allocation3] sm:$0xff]  ;;  %v5518_v34 = vld [vmem:[#allocation3 + $0x14] sm:$0xff]  ;;  %s6888_s6 = smov [#allocation6]  }
 0x6ad   :  { %v10124_v17 = vld [vmem:[#allocation27_spill] sm:$0xff]  ;;  %v5519_v43 = vld [vmem:[#allocation3 + $0x1c] sm:$0xff]  ;;  %v5520_v21 = vld [vmem:[#allocation3 + $0x24] sm:$0xf]  ;;  %s5738_s25 = sshll.u32 %s6888_s6, 4  ;;  %s5739_s25 = int_to_ptr.vmem [resolvable:$true] %s5738_s25 }
 0x6ae   :  { %v5516_v59 = vld [vmem:[#allocation3 + $0x8] sm:$0xff]  ;;  %v5517_v10 = vld [vmem:[#allocation3 + $0x10] sm:$0xf]  ;;  %v5245_v22 = vld [vmem:[#allocation3 + $0x24] sm:$0xf]  ;;  %s6857_s26 = scalar_lea.vmem %s5739_s25, 5760  ;;  %p6862_p6 = scmp.lt.s32.totalorder %s5739_s25, %s5739_s25 }
 0x6af   :  { %v5242_v63 = vld [vmem:[#allocation3 + $0x10] sm:$0xf]  ;;  %p6858_p5 = scmp.ne.s32.totalorder %s5739_s25, %s6857_s26  ;;  %p6863_p7 = scmp.lt.s32.totalorder %s6857_s26, %s6857_s26 }
 0x6b1   :  { %p6864_p8 = por %p6863_p7, %p6862_p6 }
 0x6b3   :  { %p6865_p9 = pnand %p6864_p8, %p6858_p5 }
 0x702   :  { %v5447_v28 = vpop.permute.xlu1 %5446  ;;  %v5168_v6 = vpop.permute.xlu0 %5167 }
 0x703   :  { %v5465_v32 = vmul.bf16 %v5447_v28, %v10118_v37  ;;  %v5466_v56 = vmul.bf16 %v5447_v28, %v10119_v47  ;;  %v5467_v19 = vmul.bf16 %v5447_v28, %v8965_v42  ;;  %v5468_v13 = vmul.bf16 %v5447_v28, %v8993_v51 }
 0x704   :  { %v5469_v57 = vmul.bf16 %v5447_v28, %v10120_v0  ;;  %v5190_v35 = vmul.bf16 %v5168_v6, %v10121_v39  ;;  %v5191_v1 = vmul.bf16 %v5168_v6, %v10122_v30  ;;  %v5192_v25 = vmul.bf16 %v5168_v6, %v10123_v7 }
 0x705   :  { %v5490_v15 = vadd.bf16 1065369472, %v5465_v32  ;;  %v5491_v46 = vadd.bf16 1065369472, %v5466_v56  ;;  %v5492_v53 = vadd.bf16 1065369472, %v5467_v19  ;;  %v5193_v52 = vmul.bf16 %v5168_v6, %v10124_v17 }
 0x706   :  { %v5493_v11 = vadd.bf16 1065369472, %v5468_v13  ;;  %v5494_v54 = vadd.bf16 1065369472, %v5469_v57  ;;  %v5194_v62 = vmul.bf16 %v5168_v6, %v10125_v49  ;;  %v5215_v16 = vadd.bf16 1065369472, %v5190_v35 }
 0x707   :  { %v6134_v4 = vcombine.low %v5490_v15, %v5491_v46  ;;  %v6137_v24 = vcombine.high %v5490_v15, %v5491_v46  ;;  %v5216_v9 = vadd.bf16 1065369472, %v5191_v1  ;;  %v5217_v29 = vadd.bf16 1065369472, %v5192_v25 }
 0x708   :  { %v6135_v20 = vcombine.low %v5492_v53, %v5493_v11  ;;  %v6136_v58 = vcombine.low %v5494_v54, %v5494_v54  ;;  %v6138_v12 = vcombine.high %v5492_v53, %v5493_v11  ;;  %v6139_v45 = vcombine.high %v5494_v54, %v5494_v54 }
 0x709   :  { %v5666_v41 = vmul.bf16 %v6134_v4, %v5515_v5  ;;  %v5669_v2 = vmul.bf16 %v6137_v24, %v5518_v34  ;;  %v5218_v61 = vadd.bf16 1065369472, %v5193_v52  ;;  %v5219_v40 = vadd.bf16 1065369472, %v5194_v62 }
 0x70a   :  { %v5667_v14 = vmul.bf16 %v6135_v20, %v5516_v59  ;;  %v5668_v44 = vmul.bf16 %v6136_v58, %v5517_v10  ;;  %v5670_v55 = vmul.bf16 %v6138_v12, %v5519_v43  ;;  %v5671_v8 = vmul.bf16 %v6139_v45, %v5520_v21  ;;  %v5451_v38 = vpop.permute.xlu0 %5450  ;;  %v5173_v31 = vpop.permute.xlu1 %5172  ;;  %v5522_v10 = vld [vmem:[#allocation3 + $0x30] sm:$0xff] }
 0x70b   :  { %5694 = vst [vmem:[#allocation6 + $0xb4] sm:$0xff] %v5666_v41  ;;  %5697 = vst [vmem:[#allocation6 + $0xc8] sm:$0xff] %v5669_v2  ;;  %v6107_v33 = vcombine.low %v5215_v16, %v5216_v9  ;;  %v6108_v36 = vcombine.low %v5217_v29, %v5218_v61  ;;  %v6109_v3 = vcombine.low %v5219_v40, %v5219_v40  ;;  %v5526_v41 = vld [vmem:[#allocation3 + $0x4c] sm:$0xf] }
 0x70c   :  { %v6110_v18 = vcombine.high %v5215_v16, %v5216_v9  ;;  %5695 = vst [vmem:[#allocation6 + $0xbc] sm:$0xff] %v5667_v14  ;;  %5696 = vst [vmem:[#allocation6 + $0xc4] sm:$0xf] %v5668_v44  ;;  %v6111_v23 = vcombine.high %v5217_v29, %v5218_v61  ;;  %v6112_v50 = vcombine.high %v5219_v40, %v5219_v40 }
 0x70d   :  { %5698 = vst [vmem:[#allocation6 + $0xd0] sm:$0xff] %v5670_v55  ;;  %5699 = vst [vmem:[#allocation6 + $0xd8] sm:$0xf] %v5671_v8  ;;  %v5470_v48 = vmul.bf16 %v5451_v38, %v10118_v37  ;;  %v5471_v27 = vmul.bf16 %v5451_v38, %v10119_v47  ;;  %v5391_v60 = vmul.bf16 %v6107_v33, %v5515_v5  ;;  %v5521_v5 = vld [vmem:[#allocation3 + $0x28] sm:$0xff] }
 0x70e   :  { %v5392_v26 = vmul.bf16 %v6108_v36, %v5516_v59  ;;  %v5393_v28 = vmul.bf16 %v6109_v3, %v5242_v63  ;;  %v5394_v6 = vmul.bf16 %v6110_v18, %v5518_v34  ;;  %v5395_v32 = vmul.bf16 %v6111_v23, %v5519_v43  ;;  %v5524_v59 = vld [vmem:[#allocation3 + $0x3c] sm:$0xff]  ;;  %v5523_v34 = vld [vmem:[#allocation3 + $0x38] sm:$0xf]  ;;  %v5525_v43 = vld [vmem:[#allocation3 + $0x44] sm:$0xff] }
 0x70f   :  { %v5396_v56 = vmul.bf16 %v6112_v50, %v5245_v22  ;;  %v5472_v19 = vmul.bf16 %v5451_v38, %v8965_v42  ;;  %v5473_v13 = vmul.bf16 %v5451_v38, %v8993_v51  ;;  %5418 = vst [vmem:[#allocation6] sm:$0xff] %v5391_v60  ;;  %v5474_v57 = vmul.bf16 %v5451_v38, %v10120_v0 }
 0x710   :  { %5419 = vst [vmem:[#allocation6 + $0x8] sm:$0xff] %v5392_v26  ;;  %5420 = vst [vmem:[#allocation6 + $0x10] sm:$0xf] %v5393_v28  ;;  %v5495_v35 = vadd.bf16 1065369472, %v5470_v48  ;;  %v5195_v25 = vmul.bf16 %v5173_v31, %v10121_v39  ;;  %v5196_v53 = vmul.bf16 %v5173_v31, %v10122_v30  ;;  %v5197_v52 = vmul.bf16 %v5173_v31, %v10123_v7 }
 0x711   :  { %5421 = vst [vmem:[#allocation6 + $0x14] sm:$0xff] %v5394_v6  ;;  %v5496_v1 = vadd.bf16 1065369472, %v5471_v27  ;;  %5422 = vst [vmem:[#allocation6 + $0x1c] sm:$0xff] %v5395_v32  ;;  %v5497_v15 = vadd.bf16 1065369472, %v5472_v19  ;;  %v5198_v16 = vmul.bf16 %v5173_v31, %v10124_v17  ;;  %v5199_v9 = vmul.bf16 %v5173_v31, %v10125_v49 }
 0x712   :  { %5423 = vst [vmem:[#allocation6 + $0x24] sm:$0xf] %v5396_v56  ;;  %v5498_v46 = vadd.bf16 1065369472, %v5473_v13  ;;  %v5499_v11 = vadd.bf16 1065369472, %v5474_v57 }
 0x713   :  { %v6140_v54 = vcombine.low %v5495_v35, %v5496_v1  ;;  %v6143_v62 = vcombine.high %v5495_v35, %v5496_v1  ;;  %v5220_v29 = vadd.bf16 1065369472, %v5195_v25  ;;  %v5455_v21 = vpop.permute.xlu1 %5454  ;;  %v5221_v40 = vadd.bf16 1065369472, %v5196_v53  ;;  %v5248_v27 = vld [vmem:[#allocation3 + $0x38] sm:$0xf]  ;;  %v5178_v6 = vpop.permute.xlu0 %5177 }
 0x714   :  { %v6141_v4 = vcombine.low %v5497_v15, %v5498_v46  ;;  %v6144_v24 = vcombine.high %v5497_v15, %v5498_v46  ;;  %v6142_v20 = vcombine.low %v5499_v11, %v5499_v11  ;;  %v6145_v58 = vcombine.high %v5499_v11, %v5499_v11  ;;  %v5251_v31 = vld [vmem:[#allocation3 + $0x4c] sm:$0xf] }
 0x715   :  { %v5672_v12 = vmul.bf16 %v6140_v54, %v5521_v5  ;;  %v5675_v45 = vmul.bf16 %v6143_v62, %v5524_v59  ;;  %v5222_v14 = vadd.bf16 1065369472, %v5197_v52  ;;  %v5223_v8 = vadd.bf16 1065369472, %v5198_v16 }
 0x716   :  { %v5673_v2 = vmul.bf16 %v6141_v4, %v5522_v10  ;;  %v5676_v61 = vmul.bf16 %v6144_v24, %v5525_v43  ;;  %v5674_v44 = vmul.bf16 %v6142_v20, %v5523_v34  ;;  %v5677_v55 = vmul.bf16 %v6145_v58, %v5526_v41  ;;  %v5529_v34 = vld [vmem:[#allocation3 + $0x60] sm:$0xf]  ;;  %v5532_v41 = vld [vmem:[#allocation3 + $0x74] sm:$0xf] }
 0x717   :  { %5700 = vst [vmem:[#allocation6 + $0xdc] sm:$0xff] %v5672_v12  ;;  %5703 = vst [vmem:[#allocation6 + $0xf0] sm:$0xff] %v5675_v45  ;;  %v5224_v38 = vadd.bf16 1065369472, %v5199_v9  ;;  %v6113_v33 = vcombine.low %v5220_v29, %v5221_v40  ;;  %v6116_v36 = vcombine.high %v5220_v29, %v5221_v40  ;;  %v5475_v3 = vmul.bf16 %v5455_v21, %v10118_v37 }
 0x718   :  { %5701 = vst [vmem:[#allocation6 + $0xe4] sm:$0xff] %v5673_v2  ;;  %5704 = vst [vmem:[#allocation6 + $0xf8] sm:$0xff] %v5676_v61  ;;  %v5476_v18 = vmul.bf16 %v5455_v21, %v10119_v47  ;;  %v6114_v63 = vcombine.low %v5222_v14, %v5223_v8  ;;  %v6117_v50 = vcombine.high %v5222_v14, %v5223_v8 }
 0x719   :  { %5702 = vst [vmem:[#allocation6 + $0xec] sm:$0xf] %v5674_v44  ;;  %5705 = vst [vmem:[#allocation6 + $0x100] sm:$0xf] %v5677_v55  ;;  %v6115_v23 = vcombine.low %v5224_v38, %v5224_v38  ;;  %v6118_v48 = vcombine.high %v5224_v38, %v5224_v38  ;;  %v5397_v22 = vmul.bf16 %v6113_v33, %v5521_v5  ;;  %v5500_v35 = vadd.bf16 1065369472, %v5475_v3 }
 0x71a   :  { %v5400_v60 = vmul.bf16 %v6116_v36, %v5524_v59  ;;  %v5477_v26 = vmul.bf16 %v5455_v21, %v8965_v42  ;;  %v5478_v28 = vmul.bf16 %v5455_v21, %v8993_v51  ;;  %v5398_v32 = vmul.bf16 %v6114_v63, %v5522_v10  ;;  %v5527_v5 = vld [vmem:[#allocation3 + $0x50] sm:$0xff]  ;;  %v5530_v59 = vld [vmem:[#allocation3 + $0x64] sm:$0xff]  ;;  %v5528_v10 = vld [vmem:[#allocation3 + $0x58] sm:$0xff] }
 0x71b   :  { %v5399_v56 = vmul.bf16 %v6115_v23, %v5248_v27  ;;  %v5401_v19 = vmul.bf16 %v6117_v50, %v5525_v43  ;;  %v5402_v13 = vmul.bf16 %v6118_v48, %v5251_v31  ;;  %5424 = vst [vmem:[#allocation6 + $0x28] sm:$0xff] %v5397_v22  ;;  %v5479_v57 = vmul.bf16 %v5455_v21, %v10120_v0  ;;  %v5531_v43 = vld [vmem:[#allocation3 + $0x6c] sm:$0xff]  ;;  %v5183_v21 = vpop.permute.xlu1 %5182  ;;  %v5254_v27 = vld [vmem:[#allocation3 + $0x60] sm:$0xf]  ;;  %v5257_v31 = vld [vmem:[#allocation3 + $0x74] sm:$0xf] }
 0x71c   :  { %5427 = vst [vmem:[#allocation6 + $0x3c] sm:$0xff] %v5400_v60  ;;  %v5501_v1 = vadd.bf16 1065369472, %v5476_v18  ;;  %v5502_v25 = vadd.bf16 1065369472, %v5477_v26  ;;  %5425 = vst [vmem:[#allocation6 + $0x30] sm:$0xff] %v5398_v32  ;;  %v5200_v46 = vmul.bf16 %v5178_v6, %v10121_v39  ;;  %v5201_v53 = vmul.bf16 %v5178_v6, %v10122_v30 }
 0x71d   :  { %5426 = vst [vmem:[#allocation6 + $0x38] sm:$0xf] %v5399_v56  ;;  %5428 = vst [vmem:[#allocation6 + $0x44] sm:$0xff] %v5401_v19  ;;  %v5503_v15 = vadd.bf16 1065369472, %v5478_v28  ;;  %v5202_v52 = vmul.bf16 %v5178_v6, %v10123_v7  ;;  %v5203_v16 = vmul.bf16 %v5178_v6, %v10124_v17  ;;  %v5204_v9 = vmul.bf16 %v5178_v6, %v10125_v49 }
 0x71e   :  { %5429 = vst [vmem:[#allocation6 + $0x4c] sm:$0xf] %v5402_v13  ;;  %v5504_v11 = vadd.bf16 1065369472, %v5479_v57  ;;  %v6146_v54 = vcombine.low %v5500_v35, %v5501_v1  ;;  %v6149_v62 = vcombine.high %v5500_v35, %v5501_v1  ;;  %v5225_v29 = vadd.bf16 1065369472, %v5200_v46  ;;  %v5188_v6 = vpop.permute.xlu0 %5187 }
 0x71f   :  { %v6147_v4 = vcombine.low %v5502_v25, %v5503_v15  ;;  %v6150_v24 = vcombine.high %v5502_v25, %v5503_v15  ;;  %v5226_v40 = vadd.bf16 1065369472, %v5201_v53  ;;  %v5227_v14 = vadd.bf16 1065369472, %v5202_v52 }
 0x720   :  { %v6148_v20 = vcombine.low %v5504_v11, %v5504_v11  ;;  %v6151_v58 = vcombine.high %v5504_v11, %v5504_v11  ;;  %v5678_v12 = vmul.bf16 %v6146_v54, %v5527_v5  ;;  %v5681_v45 = vmul.bf16 %v6149_v62, %v5530_v59 }
 0x721   :  { %v5679_v2 = vmul.bf16 %v6147_v4, %v5528_v10  ;;  %v5682_v61 = vmul.bf16 %v6150_v24, %v5531_v43  ;;  %v5228_v8 = vadd.bf16 1065369472, %v5203_v16  ;;  %v5229_v38 = vadd.bf16 1065369472, %v5204_v9 }
 0x722   :  { %v5680_v44 = vmul.bf16 %v6148_v20, %v5529_v34  ;;  %v5683_v55 = vmul.bf16 %v6151_v58, %v5532_v41  ;;  %5706 = vst [vmem:[#allocation6 + $0x104] sm:$0xff] %v5678_v12  ;;  %5709 = vst [vmem:[#allocation6 + $0x118] sm:$0xff] %v5681_v45  ;;  %v6119_v33 = vcombine.low %v5225_v29, %v5226_v40  ;;  %v5260_v34 = vld [vmem:[#allocation3 + $0x88] sm:$0xf]  ;;  %v5263_v12 = vld [vmem:[#allocation3 + $0x9c] sm:$0xf] }
 0x723   :  { %5707 = vst [vmem:[#allocation6 + $0x10c] sm:$0xff] %v5679_v2  ;;  %5710 = vst [vmem:[#allocation6 + $0x120] sm:$0xff] %v5682_v61  ;;  %v6122_v36 = vcombine.high %v5225_v29, %v5226_v40  ;;  %v5205_v3 = vmul.bf16 %v5183_v21, %v10121_v39  ;;  %v5206_v18 = vmul.bf16 %v5183_v21, %v10122_v30 }
 0x724   :  { %5708 = vst [vmem:[#allocation6 + $0x114] sm:$0xf] %v5680_v44  ;;  %5711 = vst [vmem:[#allocation6 + $0x128] sm:$0xf] %v5683_v55  ;;  %v6120_v63 = vcombine.low %v5227_v14, %v5228_v8  ;;  %v6121_v23 = vcombine.low %v5229_v38, %v5229_v38  ;;  %v6123_v50 = vcombine.high %v5227_v14, %v5228_v8 }
 0x725   :  { %v6124_v48 = vcombine.high %v5229_v38, %v5229_v38  ;;  %v5403_v22 = vmul.bf16 %v6119_v33, %v5527_v5  ;;  %v5406_v60 = vmul.bf16 %v6122_v36, %v5530_v59  ;;  %v5207_v26 = vmul.bf16 %v5183_v21, %v10123_v7  ;;  %v5258_v5 = vld [vmem:[#allocation3 + $0x78] sm:$0xff]  ;;  %v5261_v59 = vld [vmem:[#allocation3 + $0x8c] sm:$0xff]  ;;  %v5264_v38 = vld [vmem:[#allocation3 + $0xa0] sm:$0xff] }
 0x726   :  { %v5208_v28 = vmul.bf16 %v5183_v21, %v10124_v17  ;;  %v5404_v32 = vmul.bf16 %v6120_v63, %v5528_v10  ;;  %v5405_v56 = vmul.bf16 %v6121_v23, %v5254_v27  ;;  %v5407_v19 = vmul.bf16 %v6123_v50, %v5531_v43  ;;  %v5259_v10 = vld [vmem:[#allocation3 + $0x80] sm:$0xff]  ;;  %v5262_v43 = vld [vmem:[#allocation3 + $0x94] sm:$0xff]  ;;  %v5265_v33 = vld [vmem:[#allocation3 + $0xa8] sm:$0xff]  ;;  %v5463_v50 = vpop.permute.xlu0 %5462 }
 0x727   :  { %v5408_v13 = vmul.bf16 %v6124_v48, %v5257_v31  ;;  %5430 = vst [vmem:[#allocation6 + $0x50] sm:$0xff] %v5403_v22  ;;  %5433 = vst [vmem:[#allocation6 + $0x64] sm:$0xff] %v5406_v60  ;;  %v5209_v57 = vmul.bf16 %v5183_v21, %v10125_v49  ;;  %v5230_v35 = vadd.bf16 1065369472, %v5205_v3  ;;  %v5231_v1 = vadd.bf16 1065369472, %v5206_v18 }
 0x728   :  { %v5232_v25 = vadd.bf16 1065369472, %v5207_v26  ;;  %5431 = vst [vmem:[#allocation6 + $0x58] sm:$0xff] %v5404_v32  ;;  %5432 = vst [vmem:[#allocation6 + $0x60] sm:$0xf] %v5405_v56  ;;  %v5210_v46 = vmul.bf16 %v5188_v6, %v10121_v39  ;;  %v5211_v53 = vmul.bf16 %v5188_v6, %v10122_v30  ;;  %v5212_v52 = vmul.bf16 %v5188_v6, %v10123_v7  ;;  %v5459_v7 = vpop.permute.xlu1 %5458 }
 0x729   :  { %5434 = vst [vmem:[#allocation6 + $0x6c] sm:$0xff] %v5407_v19  ;;  %5435 = vst [vmem:[#allocation6 + $0x74] sm:$0xf] %v5408_v13  ;;  %v5233_v15 = vadd.bf16 1065369472, %v5208_v28  ;;  %v6125_v54 = vcombine.low %v5230_v35, %v5231_v1  ;;  %v6128_v62 = vcombine.high %v5230_v35, %v5231_v1  ;;  %v5213_v16 = vmul.bf16 %v5188_v6, %v10124_v17 }
 0x72a   :  { %v5234_v11 = vadd.bf16 1065369472, %v5209_v57  ;;  %v5214_v9 = vmul.bf16 %v5188_v6, %v10125_v49  ;;  %v5235_v29 = vadd.bf16 1065369472, %v5210_v46  ;;  %v5236_v41 = vadd.bf16 1065369472, %v5211_v53 }
 0x72b   :  { %v6126_v4 = vcombine.low %v5232_v25, %v5233_v15  ;;  %v6129_v24 = vcombine.high %v5232_v25, %v5233_v15  ;;  %v5409_v30 = vmul.bf16 %v6125_v54, %v5258_v5  ;;  %v5412_v58 = vmul.bf16 %v6128_v62, %v5261_v59  ;;  %v5266_v36 = vld [vmem:[#allocation3 + $0xb0] sm:$0xf]  ;;  %v5535_v15 = vld [vmem:[#allocation3 + $0x88] sm:$0xf]  ;;  %v5538_v46 = vld [vmem:[#allocation3 + $0x9c] sm:$0xf] }
 0x72c   :  { %v6127_v39 = vcombine.low %v5234_v11, %v5234_v11  ;;  %v6130_v20 = vcombine.high %v5234_v11, %v5234_v11  ;;  %v5237_v17 = vadd.bf16 1065369472, %v5212_v52  ;;  %v5238_v40 = vadd.bf16 1065369472, %v5213_v16 }
 0x72d   :  { %v5410_v45 = vmul.bf16 %v6126_v4, %v5259_v10  ;;  %v5413_v21 = vmul.bf16 %v6129_v24, %v5262_v43  ;;  %5436 = vst [vmem:[#allocation6 + $0x78] sm:$0xff] %v5409_v30  ;;  %5439 = vst [vmem:[#allocation6 + $0x8c] sm:$0xff] %v5412_v58  ;;  %v5239_v49 = vadd.bf16 1065369472, %v5214_v9  ;;  %v6131_v14 = vcombine.low %v5235_v29, %v5236_v41 }
 0x72e   :  { %v5411_v2 = vmul.bf16 %v6127_v39, %v5260_v34  ;;  %v5414_v61 = vmul.bf16 %v6130_v20, %v5263_v12  ;;  %v5480_v44 = vmul.bf16 %v5459_v7, %v10118_v37  ;;  %v5481_v55 = vmul.bf16 %v5459_v7, %v10119_v47 }
 0x72f   :  { %5437 = vst [vmem:[#allocation6 + $0x80] sm:$0xff] %v5410_v45  ;;  %5440 = vst [vmem:[#allocation6 + $0x94] sm:$0xff] %v5413_v21  ;;  %v5482_v8 = vmul.bf16 %v5459_v7, %v8965_v42  ;;  %v6132_v3 = vcombine.low %v5237_v17, %v5238_v40  ;;  %v6133_v18 = vcombine.low %v5239_v49, %v5239_v49 }
 0x730   :  { %5438 = vst [vmem:[#allocation6 + $0x88] sm:$0xf] %v5411_v2  ;;  %5441 = vst [vmem:[#allocation6 + $0x9c] sm:$0xf] %v5414_v61  ;;  %v5483_v63 = vmul.bf16 %v5459_v7, %v8993_v51  ;;  %v5484_v23 = vmul.bf16 %v5459_v7, %v10120_v0  ;;  %v5415_v48 = vmul.bf16 %v6131_v14, %v5264_v38  ;;  %v5505_v27 = vadd.bf16 1065369472, %v5480_v44 }
 0x731   :  { %v5506_v31 = vadd.bf16 1065369472, %v5481_v55  ;;  %v5507_v22 = vadd.bf16 1065369472, %v5482_v8  ;;  %v5416_v60 = vmul.bf16 %v6132_v3, %v5265_v33  ;;  %v5417_v26 = vmul.bf16 %v6133_v18, %v5266_v36 }
 0x732   :  { %v5508_v28 = vadd.bf16 1065369472, %v5483_v63  ;;  %v5509_v6 = vadd.bf16 1065369472, %v5484_v23  ;;  %5442 = vst [vmem:[#allocation6 + $0xa0] sm:$0xff] %v5415_v48  ;;  %v5485_v19 = vmul.bf16 %v5463_v50, %v10118_v37  ;;  %v5486_v13 = vmul.bf16 %v5463_v50, %v10119_v47 }
 0x733   :  { %v6152_v32 = vcombine.low %v5505_v27, %v5506_v31  ;;  %v6155_v56 = vcombine.high %v5505_v27, %v5506_v31  ;;  %5443 = vst [vmem:[#allocation6 + $0xa8] sm:$0xff] %v5416_v60  ;;  %5444 = vst [vmem:[#allocation6 + $0xb0] sm:$0xf] %v5417_v26  ;;  %v5487_v11 = vmul.bf16 %v5463_v50, %v8965_v42 }
 0x734   :  { %v6153_v57 = vcombine.low %v5507_v22, %v5508_v28  ;;  %v6154_v35 = vcombine.low %v5509_v6, %v5509_v6  ;;  %v6156_v1 = vcombine.high %v5507_v22, %v5508_v28  ;;  %v6157_v25 = vcombine.high %v5509_v6, %v5509_v6 }
 0x735   :  { %v5684_v53 = vmul.bf16 %v6152_v32, %v5258_v5  ;;  %v5687_v52 = vmul.bf16 %v6155_v56, %v5261_v59  ;;  %v5488_v54 = vmul.bf16 %v5463_v50, %v8993_v51  ;;  %v5489_v47 = vmul.bf16 %v5463_v50, %v10120_v0 }
 0x736   :  { %v5685_v62 = vmul.bf16 %v6153_v57, %v5259_v10  ;;  %v5686_v16 = vmul.bf16 %v6154_v35, %v5535_v15  ;;  %v5688_v4 = vmul.bf16 %v6156_v1, %v5262_v43  ;;  %v5689_v37 = vmul.bf16 %v6157_v25, %v5538_v46  ;;  %v5541_v43 = vld [vmem:[#allocation3 + $0xb0] sm:$0xf] }
 0x737   :  { %5712 = vst [vmem:[#allocation6 + $0x12c] sm:$0xff] %v5684_v53  ;;  %5715 = vst [vmem:[#allocation6 + $0x140] sm:$0xff] %v5687_v52  ;;  %v5510_v24 = vadd.bf16 1065369472, %v5485_v19  ;;  %v5511_v9 = vadd.bf16 1065369472, %v5486_v13 }
 0x738   :  { %v5512_v29 = vadd.bf16 1065369472, %v5487_v11  ;;  %5713 = vst [vmem:[#allocation6 + $0x134] sm:$0xff] %v5685_v62  ;;  %5714 = vst [vmem:[#allocation6 + $0x13c] sm:$0xf] %v5686_v16 }
 0x739   :  { %5716 = vst [vmem:[#allocation6 + $0x148] sm:$0xff] %v5688_v4  ;;  %5717 = vst [vmem:[#allocation6 + $0x150] sm:$0xf] %v5689_v37  ;;  %v5513_v5 = vadd.bf16 1065369472, %v5488_v54  ;;  %v6158_v42 = vcombine.low %v5510_v24, %v5511_v9 }
 0x73a   :  { %v5514_v59 = vadd.bf16 1065369472, %v5489_v47 }
 0x73b   :  { %v6159_v34 = vcombine.low %v5512_v29, %v5513_v5  ;;  %v5690_v10 = vmul.bf16 %v6158_v42, %v5264_v38 }
 0x73c   :  { %v6160_v51 = vcombine.low %v5514_v59, %v5514_v59 }
 0x73d   :  { %v5691_v39 = vmul.bf16 %v6159_v34, %v5265_v33  ;;  %5718 = vst [vmem:[#allocation6 + $0x154] sm:$0xff] %v5690_v10 }
 0x73e   :  { %v5692_v20 = vmul.bf16 %v6160_v51, %v5541_v43 }
 0x73f   :  { %5719 = vst [vmem:[#allocation6 + $0x15c] sm:$0xff] %v5691_v39 }
 0x740   :  { %5720 = vst [vmem:[#allocation6 + $0x164] sm:$0xf] %v5692_v20 }
 0x741   :  { %6868 = shalt.err (!%p6865_p9)
}
 0x742   :  { %5744 = dma.vmem_to_hbm [thread:$0]  %s5739_s25, 5760, %s9752_s7, [#allocation7], %s6886_s22, %s6886_s22, %s6887_s1  }
 0x743   :  { %6877 = dma.done.wait [#allocation5], 5760  }
 0x744   :  { %6878 = vsyncadd [#allocation5], 4294961536 }
 0x745   :  { %6879 = dma.done.wait [#allocation7], 5760  }
 0x746   :  { %6880 = vsyncadd [#allocation7], 4294961536 }
 0x747   :  { %5751 = vsyncpa [#allocation5], 1 }
 0x748   :  { %5752 = vsyncpa [#allocation7], 1 }

</bundles_post_ra>
